<compile_context>
chip_gen: v5e
topology: v5e:2x2
jax: 0.10.0
libtpu: 0.0.40
codegen_flags: <defaults>
</compile_context>

<pallas_src>
import functools
import jax
import jax.numpy as jnp
import numpy as np
from jax.experimental import pallas as pl
from jax.experimental.pallas import tpu as pltpu

# ------------------- small, module-consistent config -------------------
B = 2                     # batch of image features
N_CLS = 3                 # number of classnames
N_CTX = 2                 # MaPLe context tokens
CTX_DIM = 512             # CLIP text width (ln_final.weight.shape[0])
VIS_DIM = 768             # hardcoded vis_dim in the module
SEQ_LEN = 16              # stands in for CLIP's 77-token context length
DEPTH = 3                 # PROMPT_DEPTH -> DEPTH - 1 compound layers
L = DEPTH - 1
SUF_LEN = SEQ_LEN - 1 - N_CTX
HID = CTX_DIM // 4
PARAM_DTYPE = jnp.bfloat16   # module runs fp16; bf16 is the TPU-native analogue


# ------------------- the single fused kernel -------------------
def prompt_learner_kernel(x_ref, w1_ref, b1_ref, w2_ref, b2_ref,
                          ctx_ref, base_ref, vis_ref,
                          wv_hbm_ref, bv_hbm_ref,
                          prompts_ref, ctext_ref,
                          wv_vmem, bv_vmem, dma_sem,
                          *, n_b, n_cls, n_ctx, seq_len):
    f32 = jnp.float32
    out_dt = prompts_ref.dtype

    # ---- start the big v2t weight DMA immediately so it overlaps the compute below ----
    cp_w = pltpu.make_async_copy(wv_hbm_ref, wv_vmem, dma_sem.at[0])
    cp_b = pltpu.make_async_copy(bv_hbm_ref, bv_vmem, dma_sem.at[1])
    cp_w.start()
    cp_b.start()

    # ---- meta_net: Linear -> ReLU -> Linear (pre-transposed weights, f32 accumulation) ----
    x = x_ref[...]                                                     # (B, D) bf16
    h = jnp.dot(x, w1_ref[...], preferred_element_type=f32)
    h = jnp.maximum(h + b1_ref[...].astype(f32), 0.0)                  # (B, H) f32
    bias = jnp.dot(h.astype(x.dtype), w2_ref[...], preferred_element_type=f32)
    bias = bias + b2_ref[...].astype(f32)                              # (B, D) f32

    # ---- prompt assembly: prompts[b, c] = base[c] + placed_b ----
    # base[c] = [prefix[c]; zeros(n_ctx, D); suffix[c]]  (precomputed at init), so the
    # merge is a plain add with a tile that is zero outside the ctx rows.
    ctx = ctx_ref[...].astype(f32)                                     # (n_ctx, D)
    row = jax.lax.broadcasted_iota(jnp.int32, (seq_len, 1), 0)         # (seq, 1)
    # ctx occupies rows [1, 1 + n_ctx): MaPLe's prefix is the single SOS token.
    ctx_mask = jnp.logical_and(row >= 1, row < 1 + n_ctx).astype(f32)  # (seq, 1)
    placed_ctx = jnp.zeros((seq_len, ctx.shape[1]), f32)               # (seq, D)
    for i in range(n_ctx):                                             # scattered ONCE
        placed_ctx = jnp.where(row == 1 + i, ctx[i:i + 1, :], placed_ctx)

    for b in range(n_b):
        # rows 1..n_ctx hold ctx + bias[b] (f32), everything else stays exactly zero.
        placed_b = (placed_ctx + ctx_mask * bias[b:b + 1, :]).astype(out_dt)
        for c in range(n_cls):
            prompts_ref[b, c] = base_ref[c] + placed_b                 # full (seq, D) store

    # ---- compound v2t projections: one batched MXU call over the layer dim ----
    cp_w.wait()
    cp_b.wait()
    o = jax.lax.dot_general(vis_ref[...], wv_vmem[...],
                            dimension_numbers=(((2,), (1,)), ((0,), (0,))),
                            preferred_element_type=f32)                # (L, n_ctx, D)
    o = o + bv_vmem[...].astype(f32)
    ctext_ref[...] = o.astype(ctext_ref.dtype)                         # single store


def prompt_learner_forward(im_features, p):
    n_b, d = im_features.shape
    n_cls, seq, _ = p["base"].shape
    n_ctx = p["ctx"].shape[0]
    depth_m1, _, vis_dim = p["vis"].shape
    dt = p["ctx"].dtype

    vmem = pl.BlockSpec(memory_space=pltpu.MemorySpace.VMEM)   # small inputs: auto-DMA'd
    hbm = pl.BlockSpec(memory_space=pl.ANY)                    # big v2t weights: manual DMA

    kern = functools.partial(prompt_learner_kernel, n_b=n_b, n_cls=n_cls,
                             n_ctx=n_ctx, seq_len=seq)
    prompts, ctext = pl.pallas_call(
        kern,
        out_shape=(jax.ShapeDtypeStruct((n_b, n_cls, seq, d), dt),
                   jax.ShapeDtypeStruct((depth_m1, n_ctx, d), dt)),
        in_specs=[vmem,   # im_features
                  vmem,   # w1 (pre-transposed)
                  vmem,   # b1
                  vmem,   # w2 (pre-transposed)
                  vmem,   # b2
                  vmem,   # ctx
                  vmem,   # base = [prefix; 0; suffix]
                  vmem,   # compound vision prompts
                  hbm,    # v2t weights (pre-transposed, per layer) -> overlapped DMA
                  hbm],   # v2t biases                            -> overlapped DMA
        out_specs=(vmem, vmem),
        scratch_shapes=[pltpu.VMEM((depth_m1, vis_dim, d), dt),
                        pltpu.VMEM((depth_m1, 1, d), dt),
                        pltpu.SemaphoreType.DMA((2,))],
        compiler_params=pltpu.CompilerParams(vmem_limit_bytes=32 * 1024 * 1024),
    )(im_features, p["w1_t"], p["b1"], p["w2_t"], p["b2"],
      p["ctx"], p["base"], p["vis"], p["wv_t"], p["bv"])
    return prompts, ctext


# ------------------- module wrapper (parameter setup = glue, compute = kernel) -------------------
class PromptLearnerPallas:
    def __init__(self, key, dtype=PARAM_DTYPE):
        ks = jax.random.split(key, 10)
        std = 0.02
        f32 = jnp.float32
        self.dtype = dtype
        # learnable context vectors, std=0.02 normal init (as in module)
        self.ctx = (std * jax.random.normal(ks[0], (N_CTX, CTX_DIM), f32)).astype(dtype)
        # token_prefix / token_suffix buffers (stand-ins for CLIP token embeddings)
        # TODO(synk): real module fills these from clip_model.token_embedding(tokenized prompts)
        self.token_prefix = (std * jax.random.normal(ks[1], (N_CLS, 1, CTX_DIM), f32)).astype(dtype)
        self.token_suffix = (std * jax.random.normal(ks[2], (N_CLS, SUF_LEN, CTX_DIM), f32)).astype(dtype)
        # meta_net: Linear(D, D//4) -> ReLU -> Linear(D//4, D); weights stored pre-transposed
        self.w1_t = (std * jax.random.normal(ks[3], (CTX_DIM, HID), f32)).astype(dtype)
        self.b1 = (std * jax.random.normal(ks[4], (1, HID), f32)).astype(dtype)
        self.w2_t = (std * jax.random.normal(ks[5], (HID, CTX_DIM), f32)).astype(dtype)
        self.b2 = (std * jax.random.normal(ks[6], (1, CTX_DIM), f32)).astype(dtype)
        # compound vision prompts, std=0.02 normal init
        self.compound_prompts_vision = (std * jax.random.normal(
            ks[7], (L, N_CTX, VIS_DIM), f32)).astype(dtype)
        # v2t projections: _get_clones(deepcopy) => per-layer DISTINCT trainable parameters
        # (identical at init in the module, diverging under training).  We keep one
        # (pre-transposed) weight per layer so trained weights are representable; the cost
        # of the duplicated bytes is hidden by the overlapped DMA inside the kernel.
        self.wv_t = (std * jax.random.normal(ks[8], (L, VIS_DIM, CTX_DIM), f32)).astype(dtype)
        self.bv = (std * jax.random.normal(ks[9], (L, 1, CTX_DIM), f32)).astype(dtype)
        # static part of every prompt: [prefix[c]; 0 (ctx slots); suffix[c]] (host-side prep)
        zeros_ctx = jnp.zeros((N_CLS, N_CTX, CTX_DIM), dtype)
        self.base = jnp.concatenate([self.token_prefix, zeros_ctx, self.token_suffix], axis=1)
        # self.proj, compound_prompt_projections_t2v and the compound_prompts_text params
        # are unused in forward() and therefore omitted.

    def forward(self, im_features):
        params = dict(w1_t=self.w1_t, b1=self.b1, w2_t=self.w2_t, b2=self.b2,
                      ctx=self.ctx, base=self.base,
                      vis=self.compound_prompts_vision, wv_t=self.wv_t, bv=self.bv)
        prompts, stacked = prompt_learner_forward(im_features.astype(self.dtype), params)
        compound_prompts_text = [stacked[i] for i in range(L)]
        return prompts, compound_prompts_text


# ------------------- pure-JAX reference for verification -------------------
def reference_forward(m, im_features):
    f32 = jnp.float32
    x = im_features.astype(m.dtype).astype(f32)
    h = jnp.maximum(x @ m.w1_t.astype(f32) + m.b1.astype(f32), 0.0)
    h = h.astype(m.dtype).astype(f32)                          # kernel feeds the MXU in bf16
    bias = h @ m.w2_t.astype(f32) + m.b2.astype(f32)           # (B, D) f32
    ctx_shifted = m.ctx.astype(f32)[None] + bias[:, None, :]   # (B, n_ctx, D)
    ctx_exp = jnp.broadcast_to(ctx_shifted[:, None], (B, N_CLS, N_CTX, CTX_DIM))
    prefix = jnp.broadcast_to(m.token_prefix.astype(f32)[None], (B, N_CLS, 1, CTX_DIM))
    suffix = jnp.broadcast_to(m.token_suffix.astype(f32)[None], (B, N_CLS, SUF_LEN, CTX_DIM))
    prompts = jnp.concatenate([prefix, ctx_exp, suffix], axis=2).astype(m.dtype)
    ctexts = [(m.compound_prompts_vision[i].astype(f32) @ m.wv_t[i].astype(f32)
               + m.bv[i].astype(f32)).astype(m.dtype)
              for i in range(L)]
    return prompts, ctexts


if __name__ == "__main__":
    key = jax.random.PRNGKey(0)
    k_param, k_feat = jax.random.split(key)
    model = PromptLearnerPallas(k_param)
    im_features = jax.random.normal(k_feat, (B, CTX_DIM), jnp.float32)

    prompts, compound_prompts_text = model.forward(im_features)
    prompts = jax.block_until_ready(prompts)
    compound_prompts_text = [jax.block_until_ready(t) for t in compound_prompts_text]

    # verify against pure-JAX reference (bf16 storage => moderate tolerance)
    ref_prompts, ref_ctexts = reference_forward(model, im_features)
    np.testing.assert_allclose(np.asarray(prompts.astype(jnp.float32)),
                               np.asarray(ref_prompts.astype(jnp.float32)),
                               rtol=2e-2, atol=2e-3)
    for got, ref in zip(compound_prompts_text, ref_ctexts):
        np.testing.assert_allclose(np.asarray(got.astype(jnp.float32)),
                                   np.asarray(ref.astype(jnp.float32)),
                                   rtol=2e-2, atol=2e-3)

    assert prompts.shape == (B, N_CLS, SEQ_LEN, CTX_DIM)
    assert len(compound_prompts_text) == DEPTH - 1
    assert compound_prompts_text[0].shape == (N_CTX, CTX_DIM)
    print("KERNEL_OK")
</pallas_src>

<mosaic_0001>
module attributes {stable_mosaic.version = 11 : i64} {
  func.func @prompt_learner_kernel(%arg0: memref<2x512xbf16, #tpu.memory_space<vmem>>, %arg1: memref<512x128xbf16, #tpu.memory_space<vmem>>, %arg2: memref<1x128xbf16, #tpu.memory_space<vmem>>, %arg3: memref<128x512xbf16, #tpu.memory_space<vmem>>, %arg4: memref<1x512xbf16, #tpu.memory_space<vmem>>, %arg5: memref<2x512xbf16, #tpu.memory_space<vmem>>, %arg6: memref<3x16x512xbf16, #tpu.memory_space<vmem>>, %arg7: memref<2x2x768xbf16, #tpu.memory_space<vmem>>, %arg8: memref<2x768x512xbf16, #tpu.memory_space<any>>, %arg9: memref<2x1x512xbf16, #tpu.memory_space<any>>, %arg10: memref<2x3x16x512xbf16, #tpu.memory_space<vmem>>, %arg11: memref<2x2x512xbf16, #tpu.memory_space<vmem>>, %arg12: memref<2x768x512xbf16, #tpu.memory_space<vmem>>, %arg13: memref<2x1x512xbf16, #tpu.memory_space<vmem>>, %arg14: memref<2x!tpu.dma_semaphore, #tpu.memory_space<semaphore_mem>>) attributes {dimension_semantics = [], scalar_prefetch = 0 : i64, scratch_operands = 3 : i64, tpu.core_type = #tpu.core_type<tc>} {
    %c0_i32 = arith.constant 0 : i32
    %0 = tpu.memref_slice %arg14[%c0_i32] : memref<2x!tpu.dma_semaphore, #tpu.memory_space<semaphore_mem>> -> memref<1x!tpu.dma_semaphore, #tpu.memory_space<semaphore_mem>>
    %1 = tpu.memref_squeeze %0 : memref<1x!tpu.dma_semaphore, #tpu.memory_space<semaphore_mem>> -> memref<!tpu.dma_semaphore, #tpu.memory_space<semaphore_mem>>
    tpu.enqueue_dma source(%arg8 : memref<2x768x512xbf16, #tpu.memory_space<any>>) target(%arg12 : memref<2x768x512xbf16, #tpu.memory_space<vmem>>) target_semaphore(%1 : memref<!tpu.dma_semaphore, #tpu.memory_space<semaphore_mem>>)
    %c1_i32 = arith.constant 1 : i32
    %2 = tpu.memref_slice %arg14[%c1_i32] : memref<2x!tpu.dma_semaphore, #tpu.memory_space<semaphore_mem>> -> memref<1x!tpu.dma_semaphore, #tpu.memory_space<semaphore_mem>>
    %3 = tpu.memref_squeeze %2 : memref<1x!tpu.dma_semaphore, #tpu.memory_space<semaphore_mem>> -> memref<!tpu.dma_semaphore, #tpu.memory_space<semaphore_mem>>
    tpu.enqueue_dma source(%arg9 : memref<2x1x512xbf16, #tpu.memory_space<any>>) target(%arg13 : memref<2x1x512xbf16, #tpu.memory_space<vmem>>) target_semaphore(%3 : memref<!tpu.dma_semaphore, #tpu.memory_space<semaphore_mem>>)
    %c0 = arith.constant 0 : index
    %c0_0 = arith.constant 0 : index
    %4 = vector.load %arg0[%c0, %c0_0] : memref<2x512xbf16, #tpu.memory_space<vmem>>, vector<2x512xbf16>
    %c0_1 = arith.constant 0 : index
    %c0_2 = arith.constant 0 : index
    %5 = vector.load %arg1[%c0_1, %c0_2] : memref<512x128xbf16, #tpu.memory_space<vmem>>, vector<512x128xbf16>
    %cst = arith.constant dense<0.000000e+00> : vector<2x128xf32>
    %6 = tpu.matmul %4, %5, %cst {dimension_numbers = #tpu.dot_dimension_numbers<[1], [0], [0], [1], [0, 0, 1, 1], [], []>} : vector<2x512xbf16>, vector<512x128xbf16>, vector<2x128xf32> -> vector<2x128xf32>
    %c0_3 = arith.constant 0 : index
    %c0_4 = arith.constant 0 : index
    %7 = vector.load %arg2[%c0_3, %c0_4] : memref<1x128xbf16, #tpu.memory_space<vmem>>, vector<1x128xbf16>
    %8 = arith.extf %7 : vector<1x128xbf16> to vector<1x128xf32>
    %9 = vector.broadcast %8 : vector<1x128xf32> to vector<2x128xf32>
    %10 = arith.addf %6, %9 : vector<2x128xf32>
    %cst_5 = arith.constant 0.000000e+00 : f32
    %11 = vector.broadcast %cst_5 : f32 to vector<2x128xf32>
    %12 = arith.maximumf %10, %11 : vector<2x128xf32>
    %13 = arith.truncf %12 : vector<2x128xf32> to vector<2x128xbf16>
    %c0_6 = arith.constant 0 : index
    %c0_7 = arith.constant 0 : index
    %14 = vector.load %arg3[%c0_6, %c0_7] : memref<128x512xbf16, #tpu.memory_space<vmem>>, vector<128x512xbf16>
    %cst_8 = arith.constant dense<0.000000e+00> : vector<2x512xf32>
    %15 = tpu.matmul %13, %14, %cst_8 {dimension_numbers = #tpu.dot_dimension_numbers<[1], [0], [0], [1], [0, 0, 1, 1], [], []>} : vector<2x128xbf16>, vector<128x512xbf16>, vector<2x512xf32> -> vector<2x512xf32>
    %c0_9 = arith.constant 0 : index
    %c0_10 = arith.constant 0 : index
    %16 = vector.load %arg4[%c0_9, %c0_10] : memref<1x512xbf16, #tpu.memory_space<vmem>>, vector<1x512xbf16>
    %17 = arith.extf %16 : vector<1x512xbf16> to vector<1x512xf32>
    %18 = vector.broadcast %17 : vector<1x512xf32> to vector<2x512xf32>
    %19 = arith.addf %15, %18 : vector<2x512xf32>
    %c0_11 = arith.constant 0 : index
    %c0_12 = arith.constant 0 : index
    %20 = vector.load %arg5[%c0_11, %c0_12] : memref<2x512xbf16, #tpu.memory_space<vmem>>, vector<2x512xbf16>
    %21 = arith.extf %20 : vector<2x512xbf16> to vector<2x512xf32>
    %22 = tpu.iota {dimensions = array<i32: 0>} : vector<16x1xi32>
    %c1_i32_13 = arith.constant 1 : i32
    %23 = vector.broadcast %c1_i32_13 : i32 to vector<16x1xi32>
    %24 = arith.cmpi sge, %22, %23 : vector<16x1xi32>
    %c3_i32 = arith.constant 3 : i32
    %25 = vector.broadcast %c3_i32 : i32 to vector<16x1xi32>
    %26 = arith.cmpi slt, %22, %25 : vector<16x1xi32>
    %27 = arith.andi %24, %26 : vector<16x1xi1>
    %28 = arith.extui %27 : vector<16x1xi1> to vector<16x1xi32>
    %29 = arith.sitofp %28 : vector<16x1xi32> to vector<16x1xf32>
    %cst_14 = arith.constant 0.000000e+00 : f32
    %30 = vector.broadcast %cst_14 : f32 to vector<16x512xf32>
    %c1_i32_15 = arith.constant 1 : i32
    %31 = vector.broadcast %c1_i32_15 : i32 to vector<16x1xi32>
    %32 = arith.cmpi eq, %22, %31 : vector<16x1xi32>
    %33 = vector.extract_strided_slice %21 {offsets = [0, 0], sizes = [1, 512], strides = [1, 1]} : vector<2x512xf32> to vector<1x512xf32>
    %34 = vector.shape_cast %32 : vector<16x1xi1> to vector<16x1xi1>
    %35 = vector.broadcast %34 : vector<16x1xi1> to vector<16x512xi1>
    %36 = vector.shape_cast %33 : vector<1x512xf32> to vector<1x512xf32>
    %37 = vector.broadcast %36 : vector<1x512xf32> to vector<16x512xf32>
    %38 = arith.select %35, %37, %30 : vector<16x512xi1>, vector<16x512xf32>
    %c2_i32 = arith.constant 2 : i32
    %39 = vector.broadcast %c2_i32 : i32 to vector<16x1xi32>
    %40 = arith.cmpi eq, %22, %39 : vector<16x1xi32>
    %41 = vector.extract_strided_slice %21 {offsets = [1, 0], sizes = [1, 512], strides = [1, 1]} : vector<2x512xf32> to vector<1x512xf32>
    %42 = vector.shape_cast %40 : vector<16x1xi1> to vector<16x1xi1>
    %43 = vector.broadcast %42 : vector<16x1xi1> to vector<16x512xi1>
    %44 = vector.shape_cast %41 : vector<1x512xf32> to vector<1x512xf32>
    %45 = vector.broadcast %44 : vector<1x512xf32> to vector<16x512xf32>
    %46 = arith.select %43, %45, %38 : vector<16x512xi1>, vector<16x512xf32>
    %47 = vector.extract_strided_slice %19 {offsets = [0, 0], sizes = [1, 512], strides = [1, 1]} : vector<2x512xf32> to vector<1x512xf32>
    %48 = vector.broadcast %29 : vector<16x1xf32> to vector<16x512xf32>
    %49 = vector.broadcast %47 : vector<1x512xf32> to vector<16x512xf32>
    %50 = arith.mulf %48, %49 : vector<16x512xf32>
    %51 = arith.addf %46, %50 : vector<16x512xf32>
    %52 = arith.truncf %51 : vector<16x512xf32> to vector<16x512xbf16>
    %c0_16 = arith.constant 0 : index
    %c0_17 = arith.constant 0 : index
    %c0_18 = arith.constant 0 : index
    %53 = vector.load %arg6[%c0_16, %c0_17, %c0_18] : memref<3x16x512xbf16, #tpu.memory_space<vmem>>, vector<1x16x512xbf16>
    %54 = vector.shape_cast %53 : vector<1x16x512xbf16> to vector<16x512xbf16>
    %55 = arith.addf %54, %52 : vector<16x512xbf16>
    %c0_19 = arith.constant 0 : index
    %c0_20 = arith.constant 0 : index
    %c0_21 = arith.constant 0 : index
    %c0_22 = arith.constant 0 : index
    %56 = vector.load %arg10[%c0_19, %c0_20, %c0_21, %c0_22] : memref<2x3x16x512xbf16, #tpu.memory_space<vmem>>, vector<1x1x16x512xbf16>
    %57 = vector.shape_cast %56 : vector<1x1x16x512xbf16> to vector<16x512xbf16>
    %58 = vector.shape_cast %55 : vector<16x512xbf16> to vector<1x1x16x512xbf16>
    tpu.vector_store %arg10[%c0_19, %c0_20, %c0_21, %c0_22], %58 {strides = array<i32>} : memref<2x3x16x512xbf16, #tpu.memory_space<vmem>>, vector<1x1x16x512xbf16>,
    %c1 = arith.constant 1 : index
    %c0_23 = arith.constant 0 : index
    %c0_24 = arith.constant 0 : index
    %59 = vector.load %arg6[%c1, %c0_23, %c0_24] : memref<3x16x512xbf16, #tpu.memory_space<vmem>>, vector<1x16x512xbf16>
    %60 = vector.shape_cast %59 : vector<1x16x512xbf16> to vector<16x512xbf16>
    %61 = arith.addf %60, %52 : vector<16x512xbf16>
    %c0_25 = arith.constant 0 : index
    %c1_26 = arith.constant 1 : index
    %c0_27 = arith.constant 0 : index
    %c0_28 = arith.constant 0 : index
    %62 = vector.load %arg10[%c0_25, %c1_26, %c0_27, %c0_28] : memref<2x3x16x512xbf16, #tpu.memory_space<vmem>>, vector<1x1x16x512xbf16>
    %63 = vector.shape_cast %62 : vector<1x1x16x512xbf16> to vector<16x512xbf16>
    %64 = vector.shape_cast %61 : vector<16x512xbf16> to vector<1x1x16x512xbf16>
    tpu.vector_store %arg10[%c0_25, %c1_26, %c0_27, %c0_28], %64 {strides = array<i32>} : memref<2x3x16x512xbf16, #tpu.memory_space<vmem>>, vector<1x1x16x512xbf16>,
    %c2 = arith.constant 2 : index
    %c0_29 = arith.constant 0 : index
    %c0_30 = arith.constant 0 : index
    %65 = vector.load %arg6[%c2, %c0_29, %c0_30] : memref<3x16x512xbf16, #tpu.memory_space<vmem>>, vector<1x16x512xbf16>
    %66 = vector.shape_cast %65 : vector<1x16x512xbf16> to vector<16x512xbf16>
    %67 = arith.addf %66, %52 : vector<16x512xbf16>
    %c0_31 = arith.constant 0 : index
    %c2_32 = arith.constant 2 : index
    %c0_33 = arith.constant 0 : index
    %c0_34 = arith.constant 0 : index
    %68 = vector.load %arg10[%c0_31, %c2_32, %c0_33, %c0_34] : memref<2x3x16x512xbf16, #tpu.memory_space<vmem>>, vector<1x1x16x512xbf16>
    %69 = vector.shape_cast %68 : vector<1x1x16x512xbf16> to vector<16x512xbf16>
    %70 = vector.shape_cast %67 : vector<16x512xbf16> to vector<1x1x16x512xbf16>
    tpu.vector_store %arg10[%c0_31, %c2_32, %c0_33, %c0_34], %70 {strides = array<i32>} : memref<2x3x16x512xbf16, #tpu.memory_space<vmem>>, vector<1x1x16x512xbf16>,
    %71 = vector.extract_strided_slice %19 {offsets = [1, 0], sizes = [1, 512], strides = [1, 1]} : vector<2x512xf32> to vector<1x512xf32>
    %72 = vector.broadcast %29 : vector<16x1xf32> to vector<16x512xf32>
    %73 = vector.broadcast %71 : vector<1x512xf32> to vector<16x512xf32>
    %74 = arith.mulf %72, %73 : vector<16x512xf32>
    %75 = arith.addf %46, %74 : vector<16x512xf32>
    %76 = arith.truncf %75 : vector<16x512xf32> to vector<16x512xbf16>
    %c0_35 = arith.constant 0 : index
    %c0_36 = arith.constant 0 : index
    %c0_37 = arith.constant 0 : index
    %77 = vector.load %arg6[%c0_35, %c0_36, %c0_37] : memref<3x16x512xbf16, #tpu.memory_space<vmem>>, vector<1x16x512xbf16>
    %78 = vector.shape_cast %77 : vector<1x16x512xbf16> to vector<16x512xbf16>
    %79 = arith.addf %78, %76 : vector<16x512xbf16>
    %c1_38 = arith.constant 1 : index
    %c0_39 = arith.constant 0 : index
    %c0_40 = arith.constant 0 : index
    %c0_41 = arith.constant 0 : index
    %80 = vector.load %arg10[%c1_38, %c0_39, %c0_40, %c0_41] : memref<2x3x16x512xbf16, #tpu.memory_space<vmem>>, vector<1x1x16x512xbf16>
    %81 = vector.shape_cast %80 : vector<1x1x16x512xbf16> to vector<16x512xbf16>
    %82 = vector.shape_cast %79 : vector<16x512xbf16> to vector<1x1x16x512xbf16>
    tpu.vector_store %arg10[%c1_38, %c0_39, %c0_40, %c0_41], %82 {strides = array<i32>} : memref<2x3x16x512xbf16, #tpu.memory_space<vmem>>, vector<1x1x16x512xbf16>,
    %c1_42 = arith.constant 1 : index
    %c0_43 = arith.constant 0 : index
    %c0_44 = arith.constant 0 : index
    %83 = vector.load %arg6[%c1_42, %c0_43, %c0_44] : memref<3x16x512xbf16, #tpu.memory_space<vmem>>, vector<1x16x512xbf16>
    %84 = vector.shape_cast %83 : vector<1x16x512xbf16> to vector<16x512xbf16>
    %85 = arith.addf %84, %76 : vector<16x512xbf16>
    %c1_45 = arith.constant 1 : index
    %c1_46 = arith.constant 1 : index
    %c0_47 = arith.constant 0 : index
    %c0_48 = arith.constant 0 : index
    %86 = vector.load %arg10[%c1_45, %c1_46, %c0_47, %c0_48] : memref<2x3x16x512xbf16, #tpu.memory_space<vmem>>, vector<1x1x16x512xbf16>
    %87 = vector.shape_cast %86 : vector<1x1x16x512xbf16> to vector<16x512xbf16>
    %88 = vector.shape_cast %85 : vector<16x512xbf16> to vector<1x1x16x512xbf16>
    tpu.vector_store %arg10[%c1_45, %c1_46, %c0_47, %c0_48], %88 {strides = array<i32>} : memref<2x3x16x512xbf16, #tpu.memory_space<vmem>>, vector<1x1x16x512xbf16>,
    %c2_49 = arith.constant 2 : index
    %c0_50 = arith.constant 0 : index
    %c0_51 = arith.constant 0 : index
    %89 = vector.load %arg6[%c2_49, %c0_50, %c0_51] : memref<3x16x512xbf16, #tpu.memory_space<vmem>>, vector<1x16x512xbf16>
    %90 = vector.shape_cast %89 : vector<1x16x512xbf16> to vector<16x512xbf16>
    %91 = arith.addf %90, %76 : vector<16x512xbf16>
    %c1_52 = arith.constant 1 : index
    %c2_53 = arith.constant 2 : index
    %c0_54 = arith.constant 0 : index
    %c0_55 = arith.constant 0 : index
    %92 = vector.load %arg10[%c1_52, %c2_53, %c0_54, %c0_55] : memref<2x3x16x512xbf16, #tpu.memory_space<vmem>>, vector<1x1x16x512xbf16>
    %93 = vector.shape_cast %92 : vector<1x1x16x512xbf16> to vector<16x512xbf16>
    %94 = vector.shape_cast %91 : vector<16x512xbf16> to vector<1x1x16x512xbf16>
    tpu.vector_store %arg10[%c1_52, %c2_53, %c0_54, %c0_55], %94 {strides = array<i32>} : memref<2x3x16x512xbf16, #tpu.memory_space<vmem>>, vector<1x1x16x512xbf16>,
    %c0_i32_56 = arith.constant 0 : i32
    %95 = tpu.memref_slice %arg14[%c0_i32_56] : memref<2x!tpu.dma_semaphore, #tpu.memory_space<semaphore_mem>> -> memref<1x!tpu.dma_semaphore, #tpu.memory_space<semaphore_mem>>
    %96 = tpu.memref_squeeze %95 : memref<1x!tpu.dma_semaphore, #tpu.memory_space<semaphore_mem>> -> memref<!tpu.dma_semaphore, #tpu.memory_space<semaphore_mem>>
    tpu.wait_dma2 semaphore(%96 : memref<!tpu.dma_semaphore, #tpu.memory_space<semaphore_mem>>) src(%arg8 : memref<2x768x512xbf16, #tpu.memory_space<any>>) dst(%arg12 : memref<2x768x512xbf16, #tpu.memory_space<vmem>>)
    %c1_i32_57 = arith.constant 1 : i32
    %97 = tpu.memref_slice %arg14[%c1_i32_57] : memref<2x!tpu.dma_semaphore, #tpu.memory_space<semaphore_mem>> -> memref<1x!tpu.dma_semaphore, #tpu.memory_space<semaphore_mem>>
    %98 = tpu.memref_squeeze %97 : memref<1x!tpu.dma_semaphore, #tpu.memory_space<semaphore_mem>> -> memref<!tpu.dma_semaphore, #tpu.memory_space<semaphore_mem>>
    tpu.wait_dma2 semaphore(%98 : memref<!tpu.dma_semaphore, #tpu.memory_space<semaphore_mem>>) src(%arg9 : memref<2x1x512xbf16, #tpu.memory_space<any>>) dst(%arg13 : memref<2x1x512xbf16, #tpu.memory_space<vmem>>)
    %c0_58 = arith.constant 0 : index
    %c0_59 = arith.constant 0 : index
    %c0_60 = arith.constant 0 : index
    %99 = vector.load %arg7[%c0_58, %c0_59, %c0_60] : memref<2x2x768xbf16, #tpu.memory_space<vmem>>, vector<2x2x768xbf16>
    %c0_61 = arith.constant 0 : index
    %c0_62 = arith.constant 0 : index
    %c0_63 = arith.constant 0 : index
    %100 = vector.load %arg12[%c0_61, %c0_62, %c0_63] : memref<2x768x512xbf16, #tpu.memory_space<vmem>>, vector<2x768x512xbf16>
    %cst_64 = arith.constant dense<0.000000e+00> : vector<2x2x512xf32>
    %101 = tpu.matmul %99, %100, %cst_64 {dimension_numbers = #tpu.dot_dimension_numbers<[2], [1], [1], [2], [0, 0, 0, 1, 1, 2], [0], [0]>} : vector<2x2x768xbf16>, vector<2x768x512xbf16>, vector<2x2x512xf32> -> vector<2x2x512xf32>
    %c0_65 = arith.constant 0 : index
    %c0_66 = arith.constant 0 : index
    %c0_67 = arith.constant 0 : index
    %102 = vector.load %arg13[%c0_65, %c0_66, %c0_67] : memref<2x1x512xbf16, #tpu.memory_space<vmem>>, vector<2x1x512xbf16>
    %103 = arith.extf %102 : vector<2x1x512xbf16> to vector<2x1x512xf32>
    %104 = vector.broadcast %103 : vector<2x1x512xf32> to vector<2x2x512xf32>
    %105 = arith.addf %101, %104 : vector<2x2x512xf32>
    %106 = arith.truncf %105 : vector<2x2x512xf32> to vector<2x2x512xbf16>
    %c0_68 = arith.constant 0 : index
    %c0_69 = arith.constant 0 : index
    %c0_70 = arith.constant 0 : index
    %107 = vector.load %arg11[%c0_68, %c0_69, %c0_70] : memref<2x2x512xbf16, #tpu.memory_space<vmem>>, vector<2x2x512xbf16>
    tpu.vector_store %arg11[%c0_68, %c0_69, %c0_70], %106 {strides = array<i32>} : memref<2x2x512xbf16, #tpu.memory_space<vmem>>, vector<2x2x512xbf16>,
    return
  }
}

</mosaic_0001>

<bundles_post_ra>
// kernel: tpu_custom_call.1
= control target key start
LH: loop header
LB: loop body
LE: loop exit
PB: predicated region body
PF: predicated region fallthrough
CT: control target
= control target key end

     0   :  { %17 = vsyncpa [#allocation6], 0  ;;  %s7136_s0 = inlined_call_operand.hbm [shape: bf16[2,512], index: 0, kind: input, shape index: {}]   ;;  %s7137_s1 = inlined_call_operand.hbm [shape: bf16[512,128], index: 1, kind: input, shape index: {}]   ;;  %s7138_s2 = inlined_call_operand.hbm [shape: bf16[1,128], index: 2, kind: input, shape index: {}]   ;;  %s7139_s3 = inlined_call_operand.hbm [shape: bf16[128,512], index: 3, kind: input, shape index: {}]   ;;  %s7140_s4 = inlined_call_operand.hbm [shape: bf16[1,512], index: 4, kind: input, shape index: {}]   ;;  %s7141_s5 = inlined_call_operand.hbm [shape: bf16[2,512], index: 5, kind: input, shape index: {}]   ;;  %s7142_s6 = inlined_call_operand.hbm [shape: bf16[3,16,512], index: 6, kind: input, shape index: {}]   ;;  %s7143_s7 = inlined_call_operand.hbm [shape: bf16[2,2,768], index: 7, kind: input, shape index: {}]   ;;  %s7144_s8 = inlined_call_operand.hbm [shape: bf16[2,768,512], index: 8, kind: input, shape index: {}]   ;;  %s7145_s9 = inlined_call_operand.vmem [shape: bf16[2,1,512], index: 9, kind: input, shape index: {}]   ;;  %s7146_s10 = inlined_call_operand.hbm [shape: bf16[2,3,16,512], index: 10, kind: output, shape index: {0}]   ;;  %s7147_s11 = inlined_call_operand.hbm [shape: bf16[2,2,512], index: 11, kind: output, shape index: {1}]  }
   0x1   :  { %18 = vsyncpa [#allocation9], 0 }
   0x2   :  { %19 = vsyncpa [#allocation12], 0 }
   0x3   :  { %20 = vsyncpa [#allocation15], 0 }
   0x4   :  { %21 = vsyncpa [#allocation18], 0 }
   0x5   :  { %22 = vsyncpa [#allocation7], 0  ;;  %s39_s19 = sshll.u32 %s7137_s1, 4  ;;  %s40_s19 = int_to_ptr.hbm [resolvable:$true] %s39_s19 }
   0x6   :  { %23 = vsyncpa [#allocation21], 0  ;;  %s6733_s20 = smov [#allocation8]   ;;  %s63_s24 = sshll.u32 %s7139_s3, 4  ;;  %s64_s24 = int_to_ptr.hbm [resolvable:$true] %s63_s24 }
   0x7   :  { %s41_s21 = sshll.u32 %s6733_s20, 4  ;;  %s6734_s25 = smov 64   ;;  %s42_s21 = int_to_ptr.vmem [resolvable:$true] %s41_s21 }
   0x8   :  { %s6735_s26 = smov 4   ;;  %s6736_s27 = smov [#allocation11]  }
   0x9   :  { %47 = dma.hbm_to_vmem [thread:$0]  %s40_s19, 4096, %s42_s21, [#allocation9], %s6734_s25, %s6734_s25, %s6735_s26  }
   0xa   :  { %s65_s28 = sshll.u32 %s6736_s27, 4  ;;  %s6737_s1 = smov 256   ;;  %s66_s28 = int_to_ptr.vmem [resolvable:$true] %s65_s28 }
   0xb   :  { %s6738_s29 = smov 16   ;;  %s88_s3 = sshll.u32 %s7141_s5, 4  ;;  %s89_s3 = int_to_ptr.hbm [resolvable:$true] %s88_s3 }
   0xc   :  { %71 = dma.hbm_to_vmem [thread:$0]  %s64_s24, 4096, %s66_s28, [#allocation12], %s6737_s1, %s6737_s1, %s6738_s29  }
   0xd   :  { %s6739_s13 = smov [#allocation14]   ;;  %s29_s17 = sshll.u32 %s7136_s0, 4  ;;  %s30_s17 = int_to_ptr.hbm [resolvable:$true] %s29_s17 }
   0xe   :  { %s90_s14 = sshll.u32 %s6739_s13, 4  ;;  %s6740_s18 = smov [#allocation5]   ;;  %s91_s14 = int_to_ptr.vmem [resolvable:$true] %s90_s14 }
   0xf   :  { %93 = dma.hbm_to_vmem [thread:$0]  %s89_s3, 64, %s91_s14, [#allocation15]  }
  0x10   :  { %s31_s19 = sshll.u32 %s6740_s18, 4  ;;  %s53_s22 = sshll.u32 %s7138_s2, 4  ;;  %s32_s19 = int_to_ptr.vmem [resolvable:$true] %s31_s19  ;;  %s54_s22 = int_to_ptr.hbm [resolvable:$true] %s53_s22 }
  0x11   :  { %34 = dma.hbm_to_vmem [thread:$0]  %s30_s17, 64, %s32_s19, [#allocation6]  }
  0x12   :  { %s77_s24 = sshll.u32 %s7140_s4, 4  ;;  %s6741_s27 = smov [#allocation10]   ;;  %s78_s24 = int_to_ptr.hbm [resolvable:$true] %s77_s24 }
  0x13   :  { %s55_s28 = sshll.u32 %s6741_s27, 4  ;;  %s6742_s0 = smov [#allocation13]   ;;  %s56_s28 = int_to_ptr.vmem [resolvable:$true] %s55_s28 }
  0x14   :  { %58 = dma.hbm_to_vmem [thread:$0]  %s54_s22, 16, %s56_s28, [#allocation9]  }
  0x15   :  { %s79_s30 = sshll.u32 %s6742_s0, 4  ;;  %s98_s13 = sshll.u32 %s7142_s6, 4  ;;  %s80_s30 = int_to_ptr.vmem [resolvable:$true] %s79_s30  ;;  %s99_s13 = int_to_ptr.hbm [resolvable:$true] %s98_s13 }
  0x16   :  { %82 = dma.hbm_to_vmem [thread:$0]  %s78_s24, 64, %s80_s30, [#allocation12]  }
  0x17   :  { %s111_s15 = sshll.u32 %s7143_s7, 4  ;;  %s6743_s16 = smov [#allocation16]   ;;  %s112_s15 = int_to_ptr.hbm [resolvable:$true] %s111_s15 }
  0x18   :  { %s100_s4 = sshll.u32 %s6743_s16, 4  ;;  %s6744_s17 = smov [#allocation17]   ;;  %s101_s4 = int_to_ptr.vmem [resolvable:$true] %s100_s4 }
  0x19   :  { %106 = dma.hbm_to_vmem [thread:$0]  %s99_s13, 1536, %s101_s4, [#allocation15], %s6737_s1, %s6737_s1, %s6738_s29  }
  0x1a   :  { %s113_s18 = sshll.u32 %s6744_s17, 4  ;;  %s6745_s19 = smov 96   ;;  %s114_s18 = int_to_ptr.vmem [resolvable:$true] %s113_s18 }
  0x1b   :  { %s6746_s6 = smov 6  }
  0x1c   :  { %119 = dma.hbm_to_vmem [thread:$0]  %s112_s15, 192, %s114_s18, [#allocation18], %s6745_s19, %s6745_s19, %s6746_s6  }
  0x1d   :  { %6715 = dma.done.wait [#allocation6], 64  }
  0x1e   :  { %6716 = vsyncadd [#allocation6], 4294967232 }
  0x1f   :  { %6717 = dma.done.wait [#allocation9], 4112  }
  0x20   :  { %6718 = vsyncadd [#allocation9], 4294963184 }
  0x21   :  { %6719 = dma.done.wait [#allocation12], 4160  }
  0x22   :  { %6720 = vsyncadd [#allocation12], 4294963136 }
  0x23   :  { %6721 = dma.done.wait [#allocation15], 1600  }
  0x24   :  { %6722 = vsyncadd [#allocation15], 4294965696 }
  0x25   :  { %6723 = dma.done.wait [#allocation18], 192  }
  0x26   :  { %6724 = vsyncadd [#allocation18], 4294967104  ;;  %s159_s21 = sshll.u32 %s7144_s8, 4  ;;  %s6747_s22 = smov [#allocation2]   ;;  %v6850_v0 = vld [vmem:[%s7145_s9] sm:$0xff]  ;;  %s160_s21 = int_to_ptr.hbm [resolvable:$true] %s159_s21 }
  0x27   :  { %s161_s5 = sshll.u32 %s6747_s22, 4  ;;  %s162_s5 = int_to_ptr.vmem [resolvable:$true] %s161_s5 }
  0x28   :  { %164 = dma.hbm_to_vmem [thread:$0]  %s160_s21, 49152, %s162_s5, [#allocation4] }
  0x29   :  { %199 = vsyncadd [#allocation4 + $0x1], 128  ;;  %v5982_v1 = vld [vmem:[#allocation8 + $0x38] sm:$0xff]  ;;  %v5981_v5 = vld [vmem:[#allocation8 + $0x30] sm:$0xff] }
  0x2a   :  { %v5990_v2 = vld [vmem:[#allocation8 + $0x78] sm:$0xff]  ;;  %470 = vmatpush.bf16.msra.mxu0 %v5982_v1  ;;  %v5989_v6 = vld [vmem:[#allocation8 + $0x70] sm:$0xff]  ;;  %v5980_v9 = vld [vmem:[#allocation8 + $0x28] sm:$0xff] }
  0x2b   :  { %v5998_v3 = vld [vmem:[#allocation8 + $0xb8] sm:$0xff]  ;;  %483 = vmatpush.bf16.msra.mxu1 %v5990_v2  ;;  %v5997_v7 = vld [vmem:[#allocation8 + $0xb0] sm:$0xff]  ;;  %v5988_v10 = vld [vmem:[#allocation8 + $0x68] sm:$0xff] }
  0x2c   :  { %v6006_v4 = vld [vmem:[#allocation8 + $0xf8] sm:$0xff]  ;;  %496 = vmatpush.bf16.msra.mxu2 %v5998_v3  ;;  %v6005_v8 = vld [vmem:[#allocation8 + $0xf0] sm:$0xff]  ;;  %v5996_v11 = vld [vmem:[#allocation8 + $0xa8] sm:$0xff] }
  0x2d   :  { %509 = vmatpush.bf16.msra.mxu3 %v6006_v4  ;;  %v6004_v12 = vld [vmem:[#allocation8 + $0xe8] sm:$0xff]  ;;  %v5979_v13 = vld [vmem:[#allocation8 + $0x20] sm:$0xff]  ;;  %v200_v17 = vld [vmem:[#allocation5] sm:$0xf] }
  0x2e   :  { %471 = vmatpush.bf16.msra.mxu0 %v5981_v5  ;;  %v5987_v14 = vld [vmem:[#allocation8 + $0x60] sm:$0xff]  ;;  %269 = vst [vmem:[#allocation1] ss:$9 sm:$0xff] %v200_v17  ;;  %v5978_v18 = vld [vmem:[#allocation8 + $0x18] sm:$0xff]  ;;  %v5977_v22 = vld [vmem:[#allocation8 + $0x10] sm:$0xff] }
  0x2f   :  { %484 = vmatpush.bf16.msra.mxu1 %v5989_v6  ;;  %v5995_v15 = vld [vmem:[#allocation8 + $0xa0] sm:$0xff]  ;;  %v5986_v19 = vld [vmem:[#allocation8 + $0x58] sm:$0xff]  ;;  %v5985_v23 = vld [vmem:[#allocation8 + $0x50] sm:$0xff] }
  0x30   :  { %497 = vmatpush.bf16.msra.mxu2 %v5997_v7  ;;  %v6003_v16 = vld [vmem:[#allocation8 + $0xe0] sm:$0xff]  ;;  %v5994_v20 = vld [vmem:[#allocation8 + $0x98] sm:$0xff]  ;;  %v5993_v24 = vld [vmem:[#allocation8 + $0x90] sm:$0xff] }
  0x31   :  { %510 = vmatpush.bf16.msra.mxu3 %v6005_v8  ;;  %v6002_v21 = vld [vmem:[#allocation8 + $0xd8] sm:$0xff]  ;;  %v6001_v25 = vld [vmem:[#allocation8 + $0xd0] sm:$0xff]  ;;  %v5976_v26 = vld [vmem:[#allocation8 + $0x8] sm:$0xff] }
  0x32   :  { %472 = vmatpush.bf16.msra.mxu0 %v5980_v9  ;;  %v5984_v27 = vld [vmem:[#allocation8 + $0x48] sm:$0xff]  ;;  %v4422_v30 = vld [vmem:[#allocation11 + $0xe0] sm:$0xf]  ;;  %v6037_v31 = vld [vmem:[#allocation11 + $0xec] sm:$0xf0] }
  0x33   :  { %485 = vmatpush.bf16.msra.mxu1 %v5988_v10  ;;  %v5992_v28 = vld [vmem:[#allocation8 + $0x88] sm:$0xff]  ;;  %v4424_v33 = vld [vmem:[#allocation11 + $0xf0] sm:$0xf0]  ;;  %v5975_v34 = vld [vmem:[#allocation8] sm:$0xff]  ;;  %v4423_v40 = vor.u32 %v6037_v31, %v4422_v30 }
  0x34   :  { %498 = vmatpush.bf16.msra.mxu2 %v5996_v11  ;;  %v6000_v29 = vld [vmem:[#allocation8 + $0xc8] sm:$0xff]  ;;  %v5983_v35 = vld [vmem:[#allocation8 + $0x40] sm:$0xff]  ;;  %v6038_v39 = vld [vmem:[#allocation11 + $0xf4] sm:$0xf0] }
  0x35   :  { %511 = vmatpush.bf16.msra.mxu3 %v6004_v12  ;;  %v6035_v32 = vld [vmem:[#allocation11 + $0xe4] sm:$0xf]  ;;  %v4430_v38 = vld [vmem:[#allocation11 + $0xe8] sm:$0xf]  ;;  %v6036_v42 = vld [vmem:[#allocation11 + $0xec] sm:$0xf] }
  0x36   :  { %473 = vmatpush.bf16.msra.mxu0 %v5979_v13  ;;  %v5991_v36 = vld [vmem:[#allocation8 + $0x80] sm:$0xff]  ;;  %v4427_v41 = vor.u32 %v6035_v32, %v4424_v33  ;;  %v6033_v45 = vld [vmem:[#allocation11 + $0xcc] sm:$0xf0]  ;;  %v4408_v47 = vld [vmem:[#allocation11 + $0xd0] sm:$0xf0]  ;;  %v4431_v53 = vor.u32 %v6038_v39, %v4430_v38 }
  0x37   :  { %486 = vmatpush.bf16.msra.mxu1 %v5987_v14  ;;  %v5999_v37 = vld [vmem:[#allocation8 + $0xc0] sm:$0xff]  ;;  %v270_v48 = vld [vmem:[#allocation1] sm:$0xff]  ;;  %v4414_v50 = vld [vmem:[#allocation11 + $0xc8] sm:$0xf] }
  0x38   :  { %499 = vmatpush.bf16.msra.mxu2 %v5995_v15  ;;  %v4432_v43 = vld [vmem:[#allocation11 + $0xf8] sm:$0xf0]  ;;  %v4406_v44 = vld [vmem:[#allocation11 + $0xc0] sm:$0xf]  ;;  %v6031_v46 = vld [vmem:[#allocation11 + $0xc4] sm:$0xf] }
  0x39   :  { %512 = vmatpush.bf16.msra.mxu3 %v6003_v16  ;;  %v271_v49 = vld [vmem:[#allocation1 + $0x9] sm:$0xff]  ;;  %v272_v51 = vld [vmem:[#allocation1 + $0x12] sm:$0xff]  ;;  %v273_v52 = vld [vmem:[#allocation1 + $0x1b] sm:$0xff]  ;;  %v4435_v54 = vor.u32 %v6036_v42, %v4432_v43  ;;  %v4407_v56 = vor.u32 %v6033_v45, %v4406_v44  ;;  %v4411_v57 = vor.u32 %v6031_v46, %v4408_v47 }
  0x3a   :  { %474 = vmatpush.bf16.msra.mxu0 %v5978_v18  ;;  %v6034_v55 = vld [vmem:[#allocation11 + $0xd4] sm:$0xf0]  ;;  %v6032_v58 = vld [vmem:[#allocation11 + $0xcc] sm:$0xf]  ;;  %v4416_v59 = vld [vmem:[#allocation11 + $0xd8] sm:$0xf0] }
  0x3b   :  { %487 = vmatpush.bf16.msra.mxu1 %v5986_v19  ;;  %v4390_v60 = vld [vmem:[#allocation11 + $0xa0] sm:$0xf]  ;;  %v6029_v61 = vld [vmem:[#allocation11 + $0xac] sm:$0xf0]  ;;  %v6027_v62 = vld [vmem:[#allocation11 + $0xa4] sm:$0xf]  ;;  %v4415_v1 = vor.u32 %v6034_v55, %v4414_v50  ;;  %v4419_v2 = vor.u32 %v6032_v58, %v4416_v59 }
  0x3c   :  { %500 = vmatpush.bf16.msra.mxu2 %v5994_v20  ;;  %v4392_v63 = vld [vmem:[#allocation11 + $0xb0] sm:$0xf0]  ;;  %v4398_v3 = vld [vmem:[#allocation11 + $0xa8] sm:$0xf]  ;;  %v6030_v4 = vld [vmem:[#allocation11 + $0xb4] sm:$0xf0]  ;;  %v4391_v5 = vor.u32 %v6029_v61, %v4390_v60 }
  0x3d   :  { %513 = vmatpush.bf16.msra.mxu3 %v6002_v21  ;;  %v4395_v6 = vor.u32 %v6027_v62, %v4392_v63  ;;  %v6028_v7 = vld [vmem:[#allocation11 + $0xac] sm:$0xf]  ;;  %v4400_v8 = vld [vmem:[#allocation11 + $0xb8] sm:$0xf0]  ;;  %v4374_v9 = vld [vmem:[#allocation11 + $0x80] sm:$0xf]  ;;  %v4399_v13 = vor.u32 %v6030_v4, %v4398_v3 }
  0x3e   :  { %475 = vmatpush.bf16.msra.mxu0 %v5977_v22  ;;  %v6025_v10 = vld [vmem:[#allocation11 + $0x8c] sm:$0xf0]  ;;  %v6023_v11 = vld [vmem:[#allocation11 + $0x84] sm:$0xf]  ;;  %v4376_v12 = vld [vmem:[#allocation11 + $0x90] sm:$0xf0]  ;;  %v4403_v14 = vor.u32 %v6028_v7, %v4400_v8 }
  0x3f   :  { %488 = vmatpush.bf16.msra.mxu1 %v5985_v23  ;;  %v4382_v15 = vld [vmem:[#allocation11 + $0x88] sm:$0xf]  ;;  %v4375_v16 = vor.u32 %v6025_v10, %v4374_v9  ;;  %v4379_v17 = vor.u32 %v6023_v11, %v4376_v12  ;;  %v6026_v18 = vld [vmem:[#allocation11 + $0x94] sm:$0xf0]  ;;  %v6024_v19 = vld [vmem:[#allocation11 + $0x8c] sm:$0xf] }
  0x40   :  { %501 = vmatpush.bf16.msra.mxu2 %v5993_v24  ;;  %v4384_v20 = vld [vmem:[#allocation11 + $0x98] sm:$0xf0]  ;;  %v4383_v21 = vor.u32 %v6026_v18, %v4382_v15  ;;  %v4358_v23 = vld [vmem:[#allocation11 + $0x60] sm:$0xf]  ;;  %v6021_v24 = vld [vmem:[#allocation11 + $0x6c] sm:$0xf0] }
  0x41   :  { %514 = vmatpush.bf16.msra.mxu3 %v6001_v25  ;;  %v4387_v22 = vor.u32 %v6024_v19, %v4384_v20  ;;  %v6019_v25 = vld [vmem:[#allocation11 + $0x64] sm:$0xf]  ;;  %v6020_v32 = vld [vmem:[#allocation11 + $0x6c] sm:$0xf]  ;;  %v4368_v33 = vld [vmem:[#allocation11 + $0x78] sm:$0xf0] }
  0x42   :  { %476 = vmatpush.bf16.msra.mxu0 %v5976_v26  ;;  %v4359_v26 = vor.u32 %v6021_v24, %v4358_v23  ;;  %v4344_v39 = vld [vmem:[#allocation11 + $0x50] sm:$0xf0]  ;;  %v6016_v44 = vld [vmem:[#allocation11 + $0x4c] sm:$0xf]  ;;  %v4352_v45 = vld [vmem:[#allocation11 + $0x58] sm:$0xf0] }
  0x43   :  { %489 = vmatpush.bf16.msra.mxu1 %v5984_v27  ;;  %v4360_v27 = vld [vmem:[#allocation11 + $0x70] sm:$0xf0]  ;;  %v4355_v46 = vor.u32 %v6016_v44, %v4352_v45  ;;  %v4326_v47 = vld [vmem:[#allocation11 + $0x20] sm:$0xf]  ;;  %v6009_v60 = vld [vmem:[#allocation11 + $0xc] sm:$0xf0] }
  0x44   :  { %502 = vmatpush.bf16.msra.mxu2 %v5992_v28  ;;  %v4366_v28 = vld [vmem:[#allocation11 + $0x68] sm:$0xf]  ;;  %v4363_v30 = vor.u32 %v6019_v25, %v4360_v27  ;;  %v4310_v59 = vld [vmem:[#allocation11] sm:$0xf]  ;;  %v6007_v61 = vld [vmem:[#allocation11 + $0x4] sm:$0xf]  ;;  %v785_v27 = vlaneseq }
  0x45   :  { %515 = vmatpush.bf16.msra.mxu3 %v6000_v29  ;;  %v6022_v29 = vld [vmem:[#allocation11 + $0x74] sm:$0xf0]  ;;  %v4311_v62 = vor.u32 %v6009_v60, %v4310_v59  ;;  %v4312_v63 = vld [vmem:[#allocation11 + $0x10] sm:$0xf0]  ;;  %v265_v8 = vld [vmem:[#allocation10] sm:$0x1] }
  0x46   :  { %477 = vmatpush.bf16.msra.mxu0 %v5975_v34  ;;  %v4367_v31 = vor.u32 %v6022_v29, %v4366_v28  ;;  %v4371_v34 = vor.u32 %v6020_v32, %v4368_v33  ;;  %v4315_v3 = vor.u32 %v6007_v61, %v4312_v63  ;;  %v266_v9 = vunpack.c.l.bf16 %v265_v8  ;;  %v783_v25 = vld [vmem:[#allocation14] sm:$0xf]  ;;  %v556_v28 = vld [vmem:[#allocation13] sm:$0xf]  ;;  %v6864_v45 = vld [vmem:[#allocation16 + $0x30] sm:$0xff] }
  0x47   :  { %490 = vmatpush.bf16.msra.mxu1 %v5983_v35  ;;  %v4342_v35 = vld [vmem:[#allocation11 + $0x40] sm:$0xf]  ;;  %v6852_v29 = vshrl.u32 %v785_v27, 7  ;;  %v557_v32 = vunpack.c.l.bf16 %v556_v28  ;;  %v921_v59 = vunpack.c.h.bf16 %v6864_v45 }
  0x48   :  { %503 = vmatpush.bf16.msra.mxu2 %v5991_v36  ;;  %v6017_v36 = vld [vmem:[#allocation11 + $0x4c] sm:$0xf0]  ;;  %v267_v10 = vperm.slane %v266_v9, 0 }
  0x49   :  { %516 = vmatpush.bf16.msra.mxu3 %v5999_v37  ;;  %478 = vmatmul.bf16.vlgmr.msra.gmra.mxu0 %v270_v48  ;;  %v6015_v37 = vld [vmem:[#allocation11 + $0x44] sm:$0xf]  ;;  %v4343_v38 = vor.u32 %v6017_v36, %v4342_v35  ;;  %v6013_v48 = vld [vmem:[#allocation11 + $0x2c] sm:$0xf0]  ;;  %vm788_vm0 = vcmp.ge.s32.totalorder %v6852_v29, 1  ;;  %vm790_vm1 = vcmp.lt.s32.totalorder %v6852_v29, 3 }
  0x4a   :  { %731 = vmatpush.bf16.msrb.mxu0 %v4423_v40  ;;  %491 = vmatmul.bf16.vlgmr.msra.gmra.mxu1 %v271_v49  ;;  %v4350_v40 = vld [vmem:[#allocation11 + $0x48] sm:$0xf]  ;;  %v4347_v42 = vor.u32 %v6015_v37, %v4344_v39  ;;  %v6011_v49 = vld [vmem:[#allocation11 + $0x24] sm:$0xf]  ;;  %v4327_v50 = vor.u32 %v6013_v48, %v4326_v47  ;;  %v559_v37 = vperm.slane %v557_v32, 0  ;;  %vm798_vm2 = vcmp.eq.s32.totalorder %v6852_v29, 1  ;;  %vm792_vm3 = vmand %vm788_vm0, %vm790_vm1 }
  0x4b   :  { %744 = vmatpush.bf16.msrb.mxu1 %v4427_v41  ;;  %504 = vmatmul.bf16.vlgmr.msra.gmra.mxu2 %v272_v51  ;;  %v6018_v41 = vld [vmem:[#allocation11 + $0x54] sm:$0xf0]  ;;  %v4328_v51 = vld [vmem:[#allocation11 + $0x30] sm:$0xf0]  ;;  %vm825_vm4 = vcmp.eq.s32.totalorder %v6852_v29, 2  ;;  %v562_v8 = vperm.slane %v557_v32, 6 }
  0x4c   :  { %517 = vmatmul.bf16.vlgmr.msra.gmra.mxu3 %v273_v52  ;;  %757 = vmatpush.bf16.msrb.mxu2 %v4431_v53  ;;  %v4351_v43 = vor.u32 %v6018_v41, %v4350_v40  ;;  %v4334_v52 = vld [vmem:[#allocation11 + $0x28] sm:$0xf]  ;;  %v6014_v53 = vld [vmem:[#allocation11 + $0x34] sm:$0xf0]  ;;  %v567_v44 = vperm.slane %v559_v37, 0 }
  0x4d   :  { %770 = vmatpush.bf16.msrb.mxu3 %v4435_v54  ;;  %v4331_v54 = vor.u32 %v6011_v49, %v4328_v51  ;;  %v4335_v55 = vor.u32 %v6014_v53, %v4334_v52  ;;  %v6868_v49 = vld [vmem:[#allocation16] sm:$0xff] }
  0x4e   :  { %732 = vmatpush.bf16.msrb.mxu0 %v4407_v56  ;;  %v6012_v56 = vld [vmem:[#allocation11 + $0x2c] sm:$0xf]  ;;  %v880_v63 = vunpack.c.h.bf16 %v6868_v49 }
  0x4f   :  { %745 = vmatpush.bf16.msrb.mxu1 %v4411_v57  ;;  %v4336_v57 = vld [vmem:[#allocation11 + $0x38] sm:$0xf0] }
  0x50   :  { %758 = vmatpush.bf16.msrb.mxu2 %v4415_v1  ;;  %v4339_v58 = vor.u32 %v6012_v56, %v4336_v57  ;;  %v4318_v1 = vld [vmem:[#allocation11 + $0x8] sm:$0xf] }
  0x51   :  { %771 = vmatpush.bf16.msrb.mxu3 %v4419_v2  ;;  %v6010_v2 = vld [vmem:[#allocation11 + $0x14] sm:$0xf0]  ;;  %v6878_v57 = vld [vmem:[#allocation16 + $0x20] sm:$0xff] }
  0x52   :  { %733 = vmatpush.bf16.msrb.mxu0 %v4391_v5  ;;  %v4319_v4 = vor.u32 %v6010_v2, %v4318_v1  ;;  %v6008_v5 = vld [vmem:[#allocation11 + $0xc] sm:$0xf] }
  0x53   :  { %746 = vmatpush.bf16.msrb.mxu1 %v4395_v6  ;;  %v4320_v6 = vld [vmem:[#allocation11 + $0x18] sm:$0xf0]  ;;  %v6884_v1 = vld [vmem:[#allocation16 + $0x40] sm:$0xff] }
  0x54   :  { %759 = vmatpush.bf16.msrb.mxu2 %v4399_v13  ;;  %v4323_v7 = vor.u32 %v6008_v5, %v4320_v6  ;;  %v561_v6 = vperm.slane %v557_v32, 4 }
  0x55   :  { %772 = vmatpush.bf16.msrb.mxu3 %v4403_v14 }
  0x56   :  { %734 = vmatpush.bf16.msrb.mxu0 %v4375_v16 }
  0x57   :  { %747 = vmatpush.bf16.msrb.mxu1 %v4379_v17 }
  0x58   :  { %760 = vmatpush.bf16.msrb.mxu2 %v4383_v21 }
  0x59   :  { %773 = vmatpush.bf16.msrb.mxu3 %v4387_v22 }
  0x5a   :  { %735 = vmatpush.bf16.msrb.mxu0 %v4359_v26  ;;  %v784_v26 = vunpack.c.l.bf16 %v783_v25 }
  0x5b   :  { %748 = vmatpush.bf16.msrb.mxu1 %v4363_v30 }
  0x5c   :  { %761 = vmatpush.bf16.msrb.mxu2 %v4367_v31  ;;  %v805_v30 = vperm.slane %v784_v26, 0  ;;  %v806_v31 = vperm.slane %v784_v26, 2  ;;  %v831_v33 = vperm.slane %v784_v26, 1  ;;  %v807_v51 = vperm.slane %v784_v26, 4 }
  0x5d   :  { %774 = vmatpush.bf16.msrb.mxu3 %v4371_v34  ;;  %v832_v34 = vperm.slane %v784_v26, 3  ;;  %v808_v52 = vperm.slane %v784_v26, 6  ;;  %v833_v60 = vperm.slane %v784_v26, 5  ;;  %v834_v61 = vperm.slane %v784_v26, 7 }
  0x5e   :  { %736 = vmatpush.bf16.msrb.mxu0 %v4343_v38  ;;  %v813_v35 = vperm.slane %v805_v30, 0  ;;  %v814_v36 = vperm.slane %v806_v31, 0  ;;  %v560_v38 = vperm.slane %v557_v32, 2  ;;  %v839_v39 = vperm.slane %v831_v33, 1 }
  0x5f   :  { %749 = vmatpush.bf16.msrb.mxu1 %v4347_v42  ;;  %v840_v40 = vperm.slane %v832_v34, 1  ;;  %v816_v9 = vperm.slane %v808_v52, 0 }
  0x60   :  { %762 = vmatpush.bf16.msrb.mxu2 %v4351_v43  ;;  %v817_v41 = vsel %vm798_vm2, %v813_v35, 0.0  ;;  %v818_v42 = vsel %vm798_vm2, %v814_v36, 0.0  ;;  %v6862_v43 = vld [vmem:[#allocation16 + $0x10] sm:$0xff]  ;;  %v568_v48 = vperm.slane %v560_v38, 0  ;;  %v6900_v35 = vld [vmem:[#allocation16 + $0x18] sm:$0xff] }
  0x61   :  { %775 = vmatpush.bf16.msrb.mxu3 %v4355_v46  ;;  %v6748_v46 = vmov 0.0   ;;  %v843_v53 = vsel %vm825_vm4, %v839_v39, %v817_v41  ;;  %v884_v56 = vunpack.c.h.bf16 %v6862_v43  ;;  %v820_v25 = vsel %vm798_vm2, %v816_v9, 0.0 }
  0x62   :  { %737 = vmatpush.bf16.msrb.mxu0 %v4327_v50  ;;  %v6866_v47 = vsel %vm792_vm3, 1.0, %v6748_v46  ;;  %v6870_v50 = vld [vmem:[#allocation16 + $0x50] sm:$0xff] }
  0x63   :  { %750 = vmatpush.bf16.msrb.mxu1 %v4331_v54  ;;  %v844_v54 = vsel %vm825_vm4, %v840_v40, %v818_v42  ;;  %v950_v2 = vunpack.c.l.bf16 %v6870_v50 }
  0x64   :  { %763 = vmatpush.bf16.msrb.mxu2 %v4335_v55  ;;  %v883_v55 = vunpack.c.l.bf16 %v6862_v43 }
  0x65   :  { %776 = vmatpush.bf16.msrb.mxu3 %v4339_v58  ;;  %v920_v58 = vunpack.c.l.bf16 %v6864_v45 }
  0x66   :  { %738 = vmatpush.bf16.msrb.mxu0 %v4311_v62  ;;  %v879_v62 = vunpack.c.l.bf16 %v6868_v49 }
  0x67   :  { %751 = vmatpush.bf16.msrb.mxu1 %v4315_v3  ;;  %v951_v3 = vunpack.c.h.bf16 %v6870_v50  ;;  %v6975_v50 = vld [vmem:[#allocation16 + $0x58] sm:$0xff] }
  0x68   :  { %764 = vmatpush.bf16.msrb.mxu2 %v4319_v4 }
  0x69   :  { %777 = vmatpush.bf16.msrb.mxu3 %v4323_v7  ;;  %v815_v7 = vperm.slane %v807_v51, 0 }
  0xc6   :  { %v479_v11 = vpop.f32.mrf.mxu0 }
  0xc7   :  { %v492_v12 = vpop.f32.mrf.mxu1  ;;  %v480_v13 = vadd.f32 %v479_v11, %v267_v10 }
  0xc9   :  { %v493_v14 = vadd.f32 %v492_v12, %v480_v13  ;;  %v916_v12 = vunpack.c.l.bf16 %v6878_v57  ;;  %v917_v13 = vunpack.c.h.bf16 %v6878_v57 }
  0xce   :  { %v505_v15 = vpop.f32.mrf.mxu2  ;;  %v481_v18 = vpop.f32.mrf.mxu0 }
  0xcf   :  { %v518_v16 = vpop.f32.mrf.mxu3  ;;  %v506_v17 = vadd.f32 %v505_v15, %v493_v14  ;;  %v494_v19 = vpop.f32.mrf.mxu1  ;;  %v946_v14 = vunpack.c.l.bf16 %v6884_v1  ;;  %v947_v15 = vunpack.c.h.bf16 %v6884_v1 }
  0xd1   :  { %v519_v20 = vadd.f32 %v518_v16, %v506_v17  ;;  %v841_v16 = vperm.slane %v833_v60, 1  ;;  %v842_v17 = vperm.slane %v834_v61, 1 }
  0xd3   :  { %v522_v21 = vmax.f32 %v519_v20, 0.0  ;;  %v6908_v41 = vsel %vm825_vm4, %v842_v17, %v820_v25 }
  0xd5   :  { %v523_v22 = vpack.c.bf16 %v522_v21, %v522_v21 }
  0xd6   :  { %v507_v23 = vpop.f32.mrf.mxu2 }
  0xd7   :  { %v520_v24 = vpop.f32.mrf.mxu3  ;;  %739 = vmatmul.bf16.vlgmr.msrb.gmra.mxu0 %v523_v22  ;;  %752 = vmatmul.bf16.vlgmr.msrb.gmra.mxu1 %v523_v22  ;;  %v819_v23 = vsel %vm798_vm2, %v815_v7, 0.0 }
  0xd8   :  { %765 = vmatmul.bf16.vlgmr.msrb.gmra.mxu2 %v523_v22  ;;  %778 = vmatmul.bf16.vlgmr.msrb.gmra.mxu3 %v523_v22  ;;  %v569_v22 = vperm.slane %v561_v6, 0  ;;  %v570_v24 = vperm.slane %v562_v8, 0  ;;  %v6904_v39 = vsel %vm825_vm4, %v841_v16, %v819_v23 }
 0x154   :  { %v740_v4 = vpop.f32.mrf.mxu0  ;;  %v753_v5 = vpop.f32.mrf.mxu1 }
 0x155   :  { %v741_v10 = vadd.f32 %v740_v4, %v567_v44  ;;  %v754_v11 = vadd.f32 %v753_v5, %v568_v48  ;;  %v886_v4 = vunpack.c.h.bf16 %v6900_v35 }
 0x157   :  { %v851_v18 = vperm.slane %v741_v10, 0  ;;  %v971_v19 = vperm.slane %v741_v10, 1  ;;  %v852_v20 = vperm.slane %v754_v11, 0  ;;  %v972_v21 = vperm.slane %v754_v11, 1 }
 0x159   :  { %v855_v26 = vmul.f32 %v6866_v47, %v851_v18  ;;  %v859_v27 = vmul.f32 0.0, %v851_v18  ;;  %v975_v28 = vmul.f32 %v6866_v47, %v971_v19  ;;  %v979_v30 = vmul.f32 0.0, %v971_v19 }
 0x15a   :  { %v856_v31 = vmul.f32 %v6866_v47, %v852_v20  ;;  %v860_v32 = vmul.f32 0.0, %v852_v20  ;;  %v976_v33 = vmul.f32 %v6866_v47, %v972_v21  ;;  %v980_v34 = vmul.f32 0.0, %v972_v21 }
 0x15b   :  { %v863_v36 = vadd.f32 %v855_v26, %v843_v53  ;;  %v983_v37 = vadd.f32 %v975_v28, %v843_v53  ;;  %v766_v38 = vpop.f32.mrf.mxu2  ;;  %v779_v40 = vpop.f32.mrf.mxu3  ;;  %v885_v53 = vunpack.c.l.bf16 %v6900_v35 }
 0x15c   :  { %v864_v42 = vadd.f32 %v856_v31, %v844_v54  ;;  %v873_v44 = vpack.c.bf16 %v860_v32, %v859_v27  ;;  %v984_v46 = vadd.f32 %v976_v33, %v844_v54  ;;  %v993_v48 = vpack.c.bf16 %v980_v34, %v979_v30  ;;  %v742_v51 = vpop.f32.mrf.mxu0  ;;  %v755_v52 = vpop.f32.mrf.mxu1 }
 0x15d   :  { %v6910_v60 = vadd.f32 %v766_v38, %v569_v22  ;;  %v6912_v61 = vadd.f32 %v779_v40, %v570_v24 }
 0x15e   :  { %v871_v5 = vpack.c.bf16 %v864_v42, %v863_v36  ;;  %v891_v6 = vunpack.c.l.bf16 %v873_v44  ;;  %v892_v7 = vunpack.c.h.bf16 %v873_v44  ;;  %v991_v29 = vpack.c.bf16 %v984_v46, %v983_v37 }
 0x15f   :  { %v1011_v8 = vunpack.c.l.bf16 %v993_v48  ;;  %v1012_v9 = vunpack.c.h.bf16 %v993_v48  ;;  %v853_v10 = vperm.slane %v6910_v60, 0  ;;  %v973_v54 = vperm.slane %v6910_v60, 1 }
 0x160   :  { %v887_v11 = vunpack.c.l.bf16 %v871_v5  ;;  %v888_v16 = vunpack.c.h.bf16 %v871_v5  ;;  %v899_v17 = vadd.f32 %v891_v6, %v883_v55  ;;  %v900_v18 = vadd.f32 %v892_v7, %v884_v56  ;;  %v6954_v5 = vld [vmem:[#allocation16 + $0x38] sm:$0xff] }
 0x161   :  { %v928_v19 = vadd.f32 %v920_v58, %v891_v6  ;;  %v929_v20 = vadd.f32 %v921_v59, %v892_v7  ;;  %v958_v21 = vadd.f32 %v950_v2, %v891_v6  ;;  %v959_v22 = vadd.f32 %v951_v3, %v892_v7 }
 0x162   :  { %v895_v23 = vadd.f32 %v887_v11, %v879_v62  ;;  %v896_v24 = vadd.f32 %v888_v16, %v880_v63  ;;  %v905_v25 = vpack.c.bf16 %v900_v18, %v899_v17  ;;  %v924_v26 = vadd.f32 %v916_v12, %v887_v11  ;;  %v913_v17 = vld [vmem:[#allocation16 + $0x28] sm:$0xff] }
 0x163   :  { %v925_v27 = vadd.f32 %v917_v13, %v888_v16  ;;  %v934_v28 = vpack.c.bf16 %v929_v20, %v928_v19  ;;  %v954_v30 = vadd.f32 %v946_v14, %v887_v11  ;;  %v955_v31 = vadd.f32 %v947_v15, %v888_v16  ;;  %v768_v32 = vpop.f32.mrf.mxu2  ;;  %v781_v33 = vpop.f32.mrf.mxu3  ;;  %v943_v19 = vld [vmem:[#allocation16 + $0x48] sm:$0xff] }
 0x164   :  { %v903_v34 = vpack.c.bf16 %v896_v24, %v895_v23  ;;  %909 = vst [vmem:[#allocation19 + $0x10] sm:$0xff] %v905_v25  ;;  %v964_v36 = vpack.c.bf16 %v959_v22, %v958_v21  ;;  %v1007_v37 = vunpack.c.l.bf16 %v991_v29  ;;  %v1008_v38 = vunpack.c.h.bf16 %v991_v29 }
 0x165   :  { %v932_v40 = vpack.c.bf16 %v925_v27, %v924_v26  ;;  %939 = vst [vmem:[#allocation19 + $0x30] sm:$0xff] %v934_v28  ;;  %v962_v42 = vpack.c.bf16 %v955_v31, %v954_v30  ;;  %v1019_v44 = vadd.f32 %v1011_v8, %v883_v55  ;;  %v1020_v46 = vadd.f32 %v1012_v9, %v884_v56 }
 0x166   :  { %907 = vst [vmem:[#allocation19] sm:$0xff] %v903_v34  ;;  %v1015_v48 = vadd.f32 %v1007_v37, %v879_v62  ;;  %v1016_v51 = vadd.f32 %v1008_v38, %v880_v63  ;;  %v1044_v52 = vadd.f32 %v1007_v37, %v916_v12  ;;  %v1045_v60 = vadd.f32 %v1008_v38, %v917_v13 }
 0x167   :  { %937 = vst [vmem:[#allocation19 + $0x20] sm:$0xff] %v932_v40  ;;  %v1025_v55 = vpack.c.bf16 %v1020_v46, %v1019_v44  ;;  %v1048_v43 = vadd.f32 %v1011_v8, %v920_v58  ;;  %v1049_v56 = vadd.f32 %v1012_v9, %v921_v59  ;;  %v1073_v49 = vadd.f32 %v1007_v37, %v946_v14  ;;  %v6969_v59 = vld [vmem:[#allocation16 + $0x8] sm:$0xff] }
 0x168   :  { %967 = vst [vmem:[#allocation19 + $0x40] sm:$0xff] %v962_v42  ;;  %v1023_v62 = vpack.c.bf16 %v1016_v51, %v1015_v48  ;;  %v1052_v63 = vpack.c.bf16 %v1045_v60, %v1044_v52  ;;  %v1074_v57 = vadd.f32 %v1008_v38, %v947_v15  ;;  %v1077_v12 = vadd.f32 %v1011_v8, %v950_v2 }
 0x169   :  { %969 = vst [vmem:[#allocation19 + $0x50] sm:$0xff] %v964_v36  ;;  %v1054_v13 = vpack.c.bf16 %v1049_v56, %v1048_v43  ;;  %v1078_v58 = vadd.f32 %v1012_v9, %v951_v3  ;;  %v857_v45 = vmul.f32 %v6866_v47, %v853_v10  ;;  %v922_v14 = vunpack.c.l.bf16 %v6954_v5 }
 0x16a   :  { %1028 = vst [vmem:[#allocation19 + $0x60] sm:$0xff] %v1023_v62  ;;  %v1081_v6 = vpack.c.bf16 %v1074_v57, %v1073_v49  ;;  %v861_v7 = vmul.f32 0.0, %v853_v10  ;;  %v977_v1 = vmul.f32 %v6866_v47, %v973_v54  ;;  %v854_v15 = vperm.slane %v6912_v61, 0 }
 0x16b   :  { %1030 = vst [vmem:[#allocation19 + $0x70] sm:$0xff] %v1025_v55  ;;  %v1083_v2 = vpack.c.bf16 %v1078_v58, %v1077_v12  ;;  %v981_v29 = vmul.f32 0.0, %v973_v54  ;;  %v923_v8 = vunpack.c.h.bf16 %v6954_v5  ;;  %v974_v3 = vperm.slane %v6912_v61, 1 }
 0x16c   :  { %1057 = vst [vmem:[#allocation19 + $0x80] sm:$0xff] %v1052_v63  ;;  %v865_v9 = vadd.f32 %v857_v45, %v6904_v39  ;;  %v858_v11 = vmul.f32 %v6866_v47, %v854_v15  ;;  %v862_v16 = vmul.f32 0.0, %v854_v15  ;;  %v881_v10 = vunpack.c.l.bf16 %v6969_v59 }
 0x16d   :  { %1059 = vst [vmem:[#allocation19 + $0x90] sm:$0xff] %v1054_v13  ;;  %v985_v18 = vadd.f32 %v977_v1, %v6904_v39  ;;  %v882_v54 = vunpack.c.h.bf16 %v6969_v59  ;;  %v978_v20 = vmul.f32 %v6866_v47, %v974_v3  ;;  %v982_v21 = vmul.f32 0.0, %v974_v3 }
 0x16e   :  { %1086 = vst [vmem:[#allocation19 + $0xa0] sm:$0xff] %v1081_v6  ;;  %v866_v61 = vadd.f32 %v858_v11, %v6908_v41  ;;  %v874_v22 = vpack.c.bf16 %v862_v16, %v861_v7  ;;  %v952_v23 = vunpack.c.l.bf16 %v6975_v50  ;;  %v953_v24 = vunpack.c.h.bf16 %v6975_v50 }
 0x16f   :  { %1088 = vst [vmem:[#allocation19 + $0xb0] sm:$0xff] %v1083_v2  ;;  %v918_v25 = vunpack.c.l.bf16 %v913_v17  ;;  %v919_v26 = vunpack.c.h.bf16 %v913_v17  ;;  %v986_v27 = vadd.f32 %v978_v20, %v6908_v41  ;;  %v994_v39 = vpack.c.bf16 %v982_v21, %v981_v29 }
 0x170   :  { %v872_v28 = vpack.c.bf16 %v866_v61, %v865_v9  ;;  %v893_v30 = vunpack.c.l.bf16 %v874_v22  ;;  %v894_v31 = vunpack.c.h.bf16 %v874_v22  ;;  %v948_v32 = vunpack.c.l.bf16 %v943_v19 }
 0x171   :  { %v949_v47 = vunpack.c.h.bf16 %v943_v19  ;;  %v992_v33 = vpack.c.bf16 %v986_v27, %v985_v18  ;;  %v1013_v34 = vunpack.c.l.bf16 %v994_v39  ;;  %v1014_v36 = vunpack.c.h.bf16 %v994_v39 }
 0x172   :  { %v889_v37 = vunpack.c.l.bf16 %v872_v28  ;;  %v890_v38 = vunpack.c.h.bf16 %v872_v28  ;;  %v901_v40 = vadd.f32 %v893_v30, %v885_v53  ;;  %v902_v42 = vadd.f32 %v894_v31, %v886_v4 }
 0x173   :  { %v930_v41 = vadd.f32 %v922_v14, %v893_v30  ;;  %v931_v44 = vadd.f32 %v923_v8, %v894_v31  ;;  %v960_v46 = vadd.f32 %v952_v23, %v893_v30  ;;  %v961_v48 = vadd.f32 %v953_v24, %v894_v31 }
 0x174   :  { %v897_v51 = vadd.f32 %v889_v37, %v881_v10  ;;  %v898_v52 = vadd.f32 %v890_v38, %v882_v54  ;;  %v906_v60 = vpack.c.bf16 %v902_v42, %v901_v40  ;;  %v926_v55 = vadd.f32 %v918_v25, %v889_v37 }
 0x175   :  { %v927_v43 = vadd.f32 %v919_v26, %v890_v38  ;;  %v935_v56 = vpack.c.bf16 %v931_v44, %v930_v41  ;;  %v956_v49 = vadd.f32 %v948_v32, %v889_v37  ;;  %v957_v62 = vadd.f32 %v949_v47, %v890_v38 }
 0x176   :  { %v904_v63 = vpack.c.bf16 %v898_v52, %v897_v51  ;;  %910 = vst [vmem:[#allocation19 + $0x18] sm:$0xff] %v906_v60  ;;  %v965_v57 = vpack.c.bf16 %v961_v48, %v960_v46  ;;  %v1009_v12 = vunpack.c.l.bf16 %v992_v33  ;;  %v1010_v13 = vunpack.c.h.bf16 %v992_v33 }
 0x177   :  { %v933_v58 = vpack.c.bf16 %v927_v43, %v926_v55  ;;  %940 = vst [vmem:[#allocation19 + $0x38] sm:$0xff] %v935_v56  ;;  %v963_v45 = vpack.c.bf16 %v957_v62, %v956_v49  ;;  %v1021_v59 = vadd.f32 %v1013_v34, %v885_v53  ;;  %v1022_v6 = vadd.f32 %v1014_v36, %v886_v4 }
 0x178   :  { %908 = vst [vmem:[#allocation19 + $0x8] sm:$0xff] %v904_v63  ;;  %v1017_v7 = vadd.f32 %v1009_v12, %v881_v10  ;;  %v1018_v1 = vadd.f32 %v1010_v13, %v882_v54  ;;  %v1046_v15 = vadd.f32 %v1009_v12, %v918_v25  ;;  %v1047_v2 = vadd.f32 %v1010_v13, %v919_v26 }
 0x179   :  { %938 = vst [vmem:[#allocation19 + $0x28] sm:$0xff] %v933_v58  ;;  %v1026_v29 = vpack.c.bf16 %v1022_v6, %v1021_v59  ;;  %v1050_v50 = vadd.f32 %v1013_v34, %v922_v14  ;;  %v1051_v3 = vadd.f32 %v1014_v36, %v923_v8  ;;  %v1075_v9 = vadd.f32 %v1009_v12, %v948_v32 }
 0x17a   :  { %968 = vst [vmem:[#allocation19 + $0x48] sm:$0xff] %v963_v45  ;;  %v1024_v11 = vpack.c.bf16 %v1018_v1, %v1017_v7  ;;  %v1053_v53 = vpack.c.bf16 %v1047_v2, %v1046_v15  ;;  %v1076_v16 = vadd.f32 %v1010_v13, %v949_v47  ;;  %v1079_v35 = vadd.f32 %v1013_v34, %v952_v23 }
 0x17b   :  { %970 = vst [vmem:[#allocation19 + $0x58] sm:$0xff] %v965_v57  ;;  %v1055_v4 = vpack.c.bf16 %v1051_v3, %v1050_v50  ;;  %v1080_v10 = vadd.f32 %v1014_v36, %v953_v24 }
 0x17c   :  { %1029 = vst [vmem:[#allocation19 + $0x68] sm:$0xff] %v1024_v11  ;;  %v1082_v17 = vpack.c.bf16 %v1076_v16, %v1075_v9 }
 0x17d   :  { %1031 = vst [vmem:[#allocation19 + $0x78] sm:$0xff] %v1026_v29  ;;  %v1084_v18 = vpack.c.bf16 %v1080_v10, %v1079_v35 }
 0x17e   :  { %1058 = vst [vmem:[#allocation19 + $0x88] sm:$0xff] %v1053_v53 }
 0x17f   :  { %1060 = vst [vmem:[#allocation19 + $0x98] sm:$0xff] %v1055_v4 }
 0x180   :  { %1087 = vst [vmem:[#allocation19 + $0xa8] sm:$0xff] %v1082_v17 }
 0x181   :  { %1089 = vst [vmem:[#allocation19 + $0xb8] sm:$0xff] %v1084_v18 }
 0x182   :  { %6725 = dma.done.wait [#allocation4], 49152 }
 0x183   :  { %6726 = vsyncadd [#allocation4], 4294918144 }
 0x184   :  { %6727 = dma.done.wait [#allocation4 + $0x1], 128 }
 0x185   :  { %6728 = vsyncadd [#allocation4 + $0x1], 4294967168  ;;  %v4551_v5 = vld [vmem:[#allocation2 + $0xe0] sm:$0xf]  ;;  %v6069_v14 = vld [vmem:[#allocation2 + $0xec] sm:$0xf0] }
 0x186   :  { %v4679_v8 = vld [vmem:[#allocation2 + $0x1e0] sm:$0xf]  ;;  %v4552_v54 = vor.u32 %v6069_v14, %v4551_v5  ;;  %v6101_v19 = vld [vmem:[#allocation2 + $0x1ec] sm:$0xf0]  ;;  %vm4101_vm5 = vcmask 1040384   ;;  %vm4105_vm6 = vcmask 1042434  }
 0x187   :  { %v4807_v20 = vld [vmem:[#allocation2 + $0x2e0] sm:$0xf]  ;;  %v6133_v21 = vld [vmem:[#allocation2 + $0x2ec] sm:$0xf0]  ;;  %v4680_v61 = vor.u32 %v6101_v19, %v4679_v8  ;;  %vm4109_vm7 = vcmask 1041408   ;;  %s4128_s27 = sshll.u32 %s7146_s10, 4  ;;  %s4129_s27 = int_to_ptr.hbm [resolvable:$true] %s4128_s27 }
 0x188   :  { %v4808_v22 = vor.u32 %v6133_v21, %v4807_v20  ;;  %v4935_v23 = vld [vmem:[#allocation2 + $0x3e0] sm:$0xf]  ;;  %v6165_v24 = vld [vmem:[#allocation2 + $0x3ec] sm:$0xf0]  ;;  %2489 = vmatpush.bf16.msra.mxu0 %v4552_v54  ;;  %s6749_s28 = smov [#allocation19]   ;;  %s6750_s10 = smov [#allocation20]  }
 0x189   :  { %v4535_v25 = vld [vmem:[#allocation2 + $0xc0] sm:$0xf]  ;;  %v4936_v26 = vor.u32 %v6165_v24, %v4935_v23  ;;  %v6065_v27 = vld [vmem:[#allocation2 + $0xcc] sm:$0xf0]  ;;  %2502 = vmatpush.bf16.msra.mxu1 %v4680_v61  ;;  %s4126_s0 = sshll.u32 %s6749_s28, 4  ;;  %s4141_s12 = sshll.u32 %s7147_s11, 4  ;;  %s4127_s0 = int_to_ptr.vmem [resolvable:$true] %s4126_s0  ;;  %s4142_s12 = int_to_ptr.hbm [resolvable:$true] %s4141_s12 }
 0x18a   :  { %v4663_v39 = vld [vmem:[#allocation2 + $0x1c0] sm:$0xf]  ;;  %v6097_v28 = vld [vmem:[#allocation2 + $0x1cc] sm:$0xf0]  ;;  %2515 = vmatpush.bf16.msra.mxu2 %v4808_v22  ;;  %v4536_v30 = vor.u32 %v6065_v27, %v4535_v25  ;;  %4134 = dma.vmem_to_hbm [thread:$0]  %s4127_s0, 3072, %s4129_s27, [#allocation7], %s6737_s1, %s6737_s1, %s6738_s29  }
 0x18b   :  { %v4664_v31 = vor.u32 %v6097_v28, %v4663_v39  ;;  %v4791_v32 = vld [vmem:[#allocation2 + $0x2c0] sm:$0xf]  ;;  %v6129_v47 = vld [vmem:[#allocation2 + $0x2cc] sm:$0xf0]  ;;  %2528 = vmatpush.bf16.msra.mxu3 %v4936_v26  ;;  %s4139_s1 = sshll.u32 %s6750_s10, 4  ;;  %s4140_s1 = int_to_ptr.vmem [resolvable:$true] %s4139_s1 }
 0x18c   :  { %v4919_v33 = vld [vmem:[#allocation2 + $0x3c0] sm:$0xf]  ;;  %v4792_v34 = vor.u32 %v6129_v47, %v4791_v32  ;;  %v6161_v36 = vld [vmem:[#allocation2 + $0x3cc] sm:$0xf0]  ;;  %2490 = vmatpush.bf16.msra.mxu0 %v4536_v30 }
 0x18d   :  { %v4519_v37 = vld [vmem:[#allocation2 + $0xa0] sm:$0xf]  ;;  %v6061_v38 = vld [vmem:[#allocation2 + $0xac] sm:$0xf0]  ;;  %v4920_v40 = vor.u32 %v6161_v36, %v4919_v33  ;;  %2503 = vmatpush.bf16.msra.mxu1 %v4664_v31 }
 0x18e   :  { %v4647_v42 = vld [vmem:[#allocation2 + $0x1a0] sm:$0xf]  ;;  %v6093_v41 = vld [vmem:[#allocation2 + $0x1ac] sm:$0xf0]  ;;  %v4520_v46 = vor.u32 %v6061_v38, %v4519_v37  ;;  %2516 = vmatpush.bf16.msra.mxu2 %v4792_v34 }
 0x18f   :  { %v4775_v44 = vld [vmem:[#allocation2 + $0x2a0] sm:$0xf]  ;;  %v6125_v48 = vld [vmem:[#allocation2 + $0x2ac] sm:$0xf0]  ;;  %v4648_v60 = vor.u32 %v6093_v41, %v4647_v42  ;;  %2529 = vmatpush.bf16.msra.mxu3 %v4920_v40 }
 0x190   :  { %v4903_v51 = vld [vmem:[#allocation2 + $0x3a0] sm:$0xf]  ;;  %v6157_v52 = vld [vmem:[#allocation2 + $0x3ac] sm:$0xf0]  ;;  %v4776_v55 = vor.u32 %v6125_v48, %v4775_v44  ;;  %2491 = vmatpush.bf16.msra.mxu0 %v4520_v46 }
 0x191   :  { %v4503_v43 = vld [vmem:[#allocation2 + $0x80] sm:$0xf]  ;;  %v6057_v56 = vld [vmem:[#allocation2 + $0x8c] sm:$0xf0]  ;;  %v4904_v62 = vor.u32 %v6157_v52, %v4903_v51  ;;  %2504 = vmatpush.bf16.msra.mxu1 %v4648_v60 }
 0x192   :  { %v4631_v49 = vld [vmem:[#allocation2 + $0x180] sm:$0xf]  ;;  %v6089_v63 = vld [vmem:[#allocation2 + $0x18c] sm:$0xf0]  ;;  %v4504_v45 = vor.u32 %v6057_v56, %v4503_v43  ;;  %2517 = vmatpush.bf16.msra.mxu2 %v4776_v55  ;;  %v6067_v55 = vld [vmem:[#allocation2 + $0xe4] sm:$0xf] }
 0x193   :  { %v4759_v57 = vld [vmem:[#allocation2 + $0x280] sm:$0xf]  ;;  %v6121_v12 = vld [vmem:[#allocation2 + $0x28c] sm:$0xf0]  ;;  %v4632_v59 = vor.u32 %v6089_v63, %v4631_v49  ;;  %2530 = vmatpush.bf16.msra.mxu3 %v4904_v62  ;;  %v4553_v43 = vld [vmem:[#allocation2 + $0xf0] sm:$0xf0] }
 0x194   :  { %v4887_v13 = vld [vmem:[#allocation2 + $0x380] sm:$0xf]  ;;  %v6153_v58 = vld [vmem:[#allocation2 + $0x38c] sm:$0xf0]  ;;  %v4760_v6 = vor.u32 %v6121_v12, %v4759_v57  ;;  %2492 = vmatpush.bf16.msra.mxu0 %v4504_v45  ;;  %v6099_v62 = vld [vmem:[#allocation2 + $0x1e4] sm:$0xf] }
 0x195   :  { %v4487_v7 = vld [vmem:[#allocation2 + $0x60] sm:$0xf]  ;;  %v6053_v1 = vld [vmem:[#allocation2 + $0x6c] sm:$0xf0]  ;;  %v4888_v2 = vor.u32 %v6153_v58, %v4887_v13  ;;  %2505 = vmatpush.bf16.msra.mxu1 %v4632_v59  ;;  %v4681_v63 = vld [vmem:[#allocation2 + $0x1f0] sm:$0xf0]  ;;  %v4556_v58 = vor.u32 %v6067_v55, %v4553_v43 }
 0x196   :  { %v4615_v15 = vld [vmem:[#allocation2 + $0x160] sm:$0xf]  ;;  %v6085_v29 = vld [vmem:[#allocation2 + $0x16c] sm:$0xf0]  ;;  %v4488_v53 = vor.u32 %v6053_v1, %v4487_v7  ;;  %2518 = vmatpush.bf16.msra.mxu2 %v4760_v6  ;;  %v4684_v7 = vor.u32 %v6099_v62, %v4681_v63  ;;  %v6047_v63 = vld [vmem:[#allocation2 + $0x44] sm:$0xf] }
 0x197   :  { %v4743_v50 = vld [vmem:[#allocation2 + $0x260] sm:$0xf]  ;;  %v6117_v3 = vld [vmem:[#allocation2 + $0x26c] sm:$0xf0]  ;;  %v4616_v16 = vor.u32 %v6085_v29, %v4615_v15  ;;  %2531 = vmatpush.bf16.msra.mxu3 %v4888_v2  ;;  %v6063_v15 = vld [vmem:[#allocation2 + $0xc4] sm:$0xf] }
 0x198   :  { %v4871_v9 = vld [vmem:[#allocation2 + $0x360] sm:$0xf]  ;;  %v6149_v11 = vld [vmem:[#allocation2 + $0x36c] sm:$0xf0]  ;;  %v4744_v35 = vor.u32 %v6117_v3, %v4743_v50  ;;  %2493 = vmatpush.bf16.msra.mxu0 %v4488_v53  ;;  %v4537_v2 = vld [vmem:[#allocation2 + $0xd0] sm:$0xf0] }
 0x199   :  { %v4471_v4 = vld [vmem:[#allocation2 + $0x40] sm:$0xf]  ;;  %v6049_v10 = vld [vmem:[#allocation2 + $0x4c] sm:$0xf0]  ;;  %v4872_v18 = vor.u32 %v6149_v11, %v4871_v9  ;;  %2506 = vmatpush.bf16.msra.mxu1 %v4616_v16  ;;  %v6095_v29 = vld [vmem:[#allocation2 + $0x1c4] sm:$0xf]  ;;  %v4540_v11 = vor.u32 %v6063_v15, %v4537_v2 }
 0x19a   :  { %v4599_v17 = vld [vmem:[#allocation2 + $0x140] sm:$0xf]  ;;  %v6081_v5 = vld [vmem:[#allocation2 + $0x14c] sm:$0xf0]  ;;  %v4472_v20 = vor.u32 %v6049_v10, %v4471_v4  ;;  %2519 = vmatpush.bf16.msra.mxu2 %v4744_v35  ;;  %v4665_v50 = vld [vmem:[#allocation2 + $0x1d0] sm:$0xf0] }
 0x19b   :  { %v4727_v14 = vld [vmem:[#allocation2 + $0x240] sm:$0xf]  ;;  %v6113_v8 = vld [vmem:[#allocation2 + $0x24c] sm:$0xf0]  ;;  %v4600_v21 = vor.u32 %v6081_v5, %v4599_v17  ;;  %2532 = vmatpush.bf16.msra.mxu3 %v4872_v18  ;;  %v4668_v4 = vor.u32 %v6095_v29, %v4665_v50  ;;  %v6059_v17 = vld [vmem:[#allocation2 + $0xa4] sm:$0xf] }
 0x19c   :  { %v4855_v54 = vld [vmem:[#allocation2 + $0x340] sm:$0xf]  ;;  %v6145_v19 = vld [vmem:[#allocation2 + $0x34c] sm:$0xf0]  ;;  %v4728_v61 = vor.u32 %v6113_v8, %v4727_v14  ;;  %2494 = vmatpush.bf16.msra.mxu0 %v4472_v20  ;;  %v4521_v18 = vld [vmem:[#allocation2 + $0xb0] sm:$0xf0] }
 0x19d   :  { %v4455_v22 = vld [vmem:[#allocation2 + $0x20] sm:$0xf]  ;;  %v6045_v23 = vld [vmem:[#allocation2 + $0x2c] sm:$0xf0]  ;;  %v4856_v25 = vor.u32 %v6145_v19, %v4855_v54  ;;  %2507 = vmatpush.bf16.msra.mxu1 %v4600_v21  ;;  %v6091_v5 = vld [vmem:[#allocation2 + $0x1a4] sm:$0xf]  ;;  %v4524_v21 = vor.u32 %v6059_v17, %v4521_v18 }
 0x19e   :  { %v4583_v24 = vld [vmem:[#allocation2 + $0x120] sm:$0xf]  ;;  %v6077_v26 = vld [vmem:[#allocation2 + $0x12c] sm:$0xf0]  ;;  %v4456_v31 = vor.u32 %v6045_v23, %v4455_v22  ;;  %2520 = vmatpush.bf16.msra.mxu2 %v4728_v61  ;;  %v4649_v14 = vld [vmem:[#allocation2 + $0x1b0] sm:$0xf0] }
 0x19f   :  { %v4711_v27 = vld [vmem:[#allocation2 + $0x220] sm:$0xf]  ;;  %v6109_v39 = vld [vmem:[#allocation2 + $0x22c] sm:$0xf0]  ;;  %v4584_v33 = vor.u32 %v6077_v26, %v4583_v24  ;;  %2533 = vmatpush.bf16.msra.mxu3 %v4856_v25  ;;  %v4652_v23 = vor.u32 %v6091_v5, %v4649_v14  ;;  %v6055_v25 = vld [vmem:[#allocation2 + $0x84] sm:$0xf] }
 0x1a0   :  { %v4839_v28 = vld [vmem:[#allocation2 + $0x320] sm:$0xf]  ;;  %v6141_v30 = vld [vmem:[#allocation2 + $0x32c] sm:$0xf0]  ;;  %v4712_v34 = vor.u32 %v6109_v39, %v4711_v27  ;;  %2495 = vmatpush.bf16.msra.mxu0 %v4456_v31  ;;  %v4505_v26 = vld [vmem:[#allocation2 + $0x90] sm:$0xf0] }
 0x1a1   :  { %v4439_v32 = vld [vmem:[#allocation2] sm:$0xf]  ;;  %v6041_v47 = vld [vmem:[#allocation2 + $0xc] sm:$0xf0]  ;;  %v4840_v40 = vor.u32 %v6141_v30, %v4839_v28  ;;  %2508 = vmatpush.bf16.msra.mxu1 %v4584_v33  ;;  %v6087_v27 = vld [vmem:[#allocation2 + $0x184] sm:$0xf]  ;;  %v4508_v31 = vor.u32 %v6055_v25, %v4505_v26 }
 0x1a2   :  { %v4567_v36 = vld [vmem:[#allocation2 + $0x100] sm:$0xf]  ;;  %v6073_v37 = vld [vmem:[#allocation2 + $0x10c] sm:$0xf0]  ;;  %v4440_v52 = vor.u32 %v6041_v47, %v4439_v32  ;;  %2521 = vmatpush.bf16.msra.mxu2 %v4712_v34  ;;  %v4633_v39 = vld [vmem:[#allocation2 + $0x190] sm:$0xf0] }
 0x1a3   :  { %v4695_v38 = vld [vmem:[#allocation2 + $0x200] sm:$0xf]  ;;  %v6105_v42 = vld [vmem:[#allocation2 + $0x20c] sm:$0xf0]  ;;  %v4568_v56 = vor.u32 %v6073_v37, %v4567_v36  ;;  %2534 = vmatpush.bf16.msra.mxu3 %v4840_v40  ;;  %v4636_v34 = vor.u32 %v6087_v27, %v4633_v39  ;;  %v6051_v37 = vld [vmem:[#allocation2 + $0x64] sm:$0xf] }
 0x1a4   :  { %v4823_v41 = vld [vmem:[#allocation2 + $0x300] sm:$0xf]  ;;  %v6137_v44 = vld [vmem:[#allocation2 + $0x30c] sm:$0xf0]  ;;  %v4696_v49 = vor.u32 %v6105_v42, %v4695_v38  ;;  %2496 = vmatpush.bf16.msra.mxu0 %v4440_v52  ;;  %v4489_v38 = vld [vmem:[#allocation2 + $0x70] sm:$0xf0] }
 0x1a5   :  { %v5063_v46 = vld [vmem:[#allocation2 + $0x4e0] sm:$0xf]  ;;  %v6197_v48 = vld [vmem:[#allocation2 + $0x4ec] sm:$0xf0]  ;;  %v4824_v57 = vor.u32 %v6137_v44, %v4823_v41  ;;  %2509 = vmatpush.bf16.msra.mxu1 %v4568_v56  ;;  %v6083_v40 = vld [vmem:[#allocation2 + $0x164] sm:$0xf] }
 0x1a6   :  { %v5191_v51 = vld [vmem:[#allocation2 + $0x5e0] sm:$0xf]  ;;  %v6229_v60 = vld [vmem:[#allocation2 + $0x5ec] sm:$0xf0]  ;;  %v5064_v12 = vor.u32 %v6197_v48, %v5063_v46  ;;  %2522 = vmatpush.bf16.msra.mxu2 %v4696_v49  ;;  %v4617_v42 = vld [vmem:[#allocation2 + $0x170] sm:$0xf0] }
 0x1a7   :  { %v5192_v13 = vor.u32 %v6229_v60, %v5191_v51  ;;  %v5047_v45 = vld [vmem:[#allocation2 + $0x4c0] sm:$0xf]  ;;  %v6193_v59 = vld [vmem:[#allocation2 + $0x4cc] sm:$0xf0]  ;;  %2535 = vmatpush.bf16.msra.mxu3 %v4824_v57  ;;  %v4492_v60 = vor.u32 %v6051_v37, %v4489_v38  ;;  %v4620_v49 = vor.u32 %v6083_v40, %v4617_v42  ;;  %v4473_v57 = vld [vmem:[#allocation2 + $0x50] sm:$0xf0] }
 0x1a8   :  { %v5175_v6 = vld [vmem:[#allocation2 + $0x5c0] sm:$0xf]  ;;  %v6225_v1 = vld [vmem:[#allocation2 + $0x5cc] sm:$0xf0]  ;;  %2541 = vmatpush.bf16.msrb.mxu0 %v5064_v12  ;;  %v5048_v3 = vor.u32 %v6193_v59, %v5047_v45  ;;  %v6079_v12 = vld [vmem:[#allocation2 + $0x144] sm:$0xf] }
 0x1a9   :  { %2554 = vmatpush.bf16.msrb.mxu1 %v5192_v13  ;;  %v5176_v9 = vor.u32 %v6225_v1, %v5175_v6  ;;  %v5031_v53 = vld [vmem:[#allocation2 + $0x4a0] sm:$0xf]  ;;  %v6189_v16 = vld [vmem:[#allocation2 + $0x4ac] sm:$0xf0]  ;;  %v4601_v13 = vld [vmem:[#allocation2 + $0x150] sm:$0xf0]  ;;  %v4476_v6 = vor.u32 %v6047_v63, %v4473_v57 }
 0x1aa   :  { %2567 = vmatpush.bf16.msrb.mxu2 %v4556_v58  ;;  %v5159_v35 = vld [vmem:[#allocation2 + $0x5a0] sm:$0xf]  ;;  %v6221_v10 = vld [vmem:[#allocation2 + $0x5ac] sm:$0xf0]  ;;  %v5032_v8 = vor.u32 %v6189_v16, %v5031_v53  ;;  %v4604_v2 = vor.u32 %v6079_v12, %v4601_v13  ;;  %v6043_v29 = vld [vmem:[#allocation2 + $0x24] sm:$0xf] }
 0x1ab   :  { %2580 = vmatpush.bf16.msrb.mxu3 %v4684_v7  ;;  %v5015_v54 = vld [vmem:[#allocation2 + $0x480] sm:$0xf]  ;;  %v1099_v19 = vld [vmem:[#allocation17] sm:$0x3f]  ;;  %v5160_v20 = vor.u32 %v6221_v10, %v5159_v35  ;;  %v4457_v50 = vld [vmem:[#allocation2 + $0x30] sm:$0xf0] }
 0x1ac   :  { %2542 = vmatpush.bf16.msrb.mxu0 %v5048_v3  ;;  %v6185_v61 = vld [vmem:[#allocation2 + $0x48c] sm:$0xf0]  ;;  %v5143_v22 = vld [vmem:[#allocation2 + $0x580] sm:$0xf]  ;;  %1516 = vst [vmem:[#allocation1] ss:$9 sm:$0xff] %v1099_v19  ;;  %v4460_v5 = vor.u32 %v6043_v29, %v4457_v50 }
 0x1ad   :  { %2555 = vmatpush.bf16.msrb.mxu1 %v5176_v9  ;;  %v6217_v24 = vld [vmem:[#allocation2 + $0x58c] sm:$0xf0]  ;;  %v5016_v28 = vor.u32 %v6185_v61, %v5015_v54  ;;  %v4999_v32 = vld [vmem:[#allocation2 + $0x460] sm:$0xf]  ;;  %v6075_v3 = vld [vmem:[#allocation2 + $0x124] sm:$0xf] }
 0x1ae   :  { %2568 = vmatpush.bf16.msrb.mxu2 %v4540_v11  ;;  %v5144_v30 = vor.u32 %v6217_v24, %v5143_v22  ;;  %v6181_v47 = vld [vmem:[#allocation2 + $0x46c] sm:$0xf0]  ;;  %v5127_v33 = vld [vmem:[#allocation2 + $0x560] sm:$0xf]  ;;  %v4585_v9 = vld [vmem:[#allocation2 + $0x130] sm:$0xf0] }
 0x1af   :  { %2581 = vmatpush.bf16.msrb.mxu3 %v4668_v4  ;;  %v6213_v36 = vld [vmem:[#allocation2 + $0x56c] sm:$0xf0]  ;;  %v4983_v41 = vld [vmem:[#allocation2 + $0x440] sm:$0xf]  ;;  %v5000_v44 = vor.u32 %v6181_v47, %v4999_v32  ;;  %v1100_v10 = vld [vmem:[#allocation17 + $0x6] sm:$0x3f]  ;;  %v4588_v54 = vor.u32 %v6075_v3, %v4585_v9 }
 0x1b0   :  { %2543 = vmatpush.bf16.msrb.mxu0 %v5032_v8  ;;  %v5128_v52 = vor.u32 %v6213_v36, %v5127_v33  ;;  %v6177_v55 = vld [vmem:[#allocation2 + $0x44c] sm:$0xf0]  ;;  %v5111_v43 = vld [vmem:[#allocation2 + $0x540] sm:$0xf]  ;;  %v6039_v8 = vld [vmem:[#allocation2 + $0x4] sm:$0xf] }
 0x1b1   :  { %2556 = vmatpush.bf16.msrb.mxu1 %v5160_v20  ;;  %v6209_v62 = vld [vmem:[#allocation2 + $0x54c] sm:$0xf0]  ;;  %v4984_v58 = vor.u32 %v6177_v55, %v4983_v41  ;;  %v4967_v45 = vld [vmem:[#allocation2 + $0x420] sm:$0xf]  ;;  %v4441_v19 = vld [vmem:[#allocation2 + $0x10] sm:$0xf0] }
 0x1b2   :  { %2569 = vmatpush.bf16.msrb.mxu2 %v4524_v21  ;;  %v5112_v59 = vor.u32 %v6209_v62, %v5111_v43  ;;  %v6173_v7 = vld [vmem:[#allocation2 + $0x42c] sm:$0xf0]  ;;  %v5095_v1 = vld [vmem:[#allocation2 + $0x520] sm:$0xf]  ;;  %v6071_v20 = vld [vmem:[#allocation2 + $0x104] sm:$0xf] }
 0x1b3   :  { %2582 = vmatpush.bf16.msrb.mxu3 %v4652_v23  ;;  %v7004_v46 = vld [vmem:[#allocation1 + $0x12] sm:$0xff]  ;;  %v7006_v48 = vld [vmem:[#allocation1] sm:$0xff]  ;;  %v7010_v56 = vld [vmem:[#allocation1 + $0x9] sm:$0xff]  ;;  %v4968_v16 = vor.u32 %v6173_v7, %v4967_v45 }
 0x1b4   :  { %2544 = vmatpush.bf16.msrb.mxu0 %v5016_v28  ;;  %v7008_v51 = vld [vmem:[#allocation1 + $0x1b] sm:$0xff]  ;;  %2523 = vmatmul.bf16.vlgmr.msra.gmra.mxu2 %v7004_v46  ;;  %v4951_v11 = vld [vmem:[#allocation2 + $0x400] sm:$0xf]  ;;  %v7018_v17 = vld [vmem:[#allocation1 + $0x2d] sm:$0xff]  ;;  %v4444_v28 = vor.u32 %v6039_v8, %v4441_v19 }
 0x1b5   :  { %2557 = vmatpush.bf16.msrb.mxu1 %v5144_v30  ;;  %2497 = vmatmul.bf16.vlgmr.msra.gmra.mxu0 %v7006_v48  ;;  %v6205_v15 = vld [vmem:[#allocation2 + $0x52c] sm:$0xf0]  ;;  %v5079_v35 = vld [vmem:[#allocation2 + $0x500] sm:$0xf]  ;;  %v4569_v21 = vld [vmem:[#allocation2 + $0x110] sm:$0xf0] }
 0x1b6   :  { %2570 = vmatpush.bf16.msrb.mxu2 %v4508_v31  ;;  %2536 = vmatmul.bf16.vlgmr.msra.gmra.mxu3 %v7008_v51  ;;  %v6169_v53 = vld [vmem:[#allocation2 + $0x40c] sm:$0xf0]  ;;  %v7016_v4 = vld [vmem:[#allocation1 + $0x24] sm:$0xff]  ;;  %v5096_v18 = vor.u32 %v6205_v15, %v5095_v1  ;;  %v6131_v61 = vld [vmem:[#allocation2 + $0x2e4] sm:$0xf]  ;;  %v4572_v32 = vor.u32 %v6071_v20, %v4569_v21 }
 0x1b7   :  { %2583 = vmatpush.bf16.msrb.mxu3 %v4636_v34  ;;  %2510 = vmatmul.bf16.vlgmr.msra.gmra.mxu1 %v7010_v56  ;;  %v6201_v14 = vld [vmem:[#allocation2 + $0x50c] sm:$0xf0]  ;;  %2802 = vst [vmem:[#allocation1] ss:$9 sm:$0xff] %v1100_v10  ;;  %v4809_v22 = vld [vmem:[#allocation2 + $0x2f0] sm:$0xf0]  ;;  %v4952_v24 = vor.u32 %v6169_v53, %v4951_v11 }
 0x1b8   :  { %2545 = vmatpush.bf16.msrb.mxu0 %v5000_v44  ;;  %v6163_v23 = vld [vmem:[#allocation2 + $0x3e4] sm:$0xf]  ;;  %v4937_v25 = vld [vmem:[#allocation2 + $0x3f0] sm:$0xf0]  ;;  %v5080_v39 = vor.u32 %v6201_v14, %v5079_v35  ;;  %v4812_v47 = vor.u32 %v6131_v61, %v4809_v22 }
 0x1b9   :  { %2558 = vmatpush.bf16.msrb.mxu1 %v5128_v52  ;;  %v6195_v26 = vld [vmem:[#allocation2 + $0x4e4] sm:$0xf]  ;;  %v5065_v27 = vld [vmem:[#allocation2 + $0x4f0] sm:$0xf0]  ;;  %v4940_v33 = vor.u32 %v6163_v23, %v4937_v25 }
 0x1ba   :  { %2571 = vmatpush.bf16.msrb.mxu2 %v4492_v60  ;;  %v6227_v30 = vld [vmem:[#allocation2 + $0x5e4] sm:$0xf]  ;;  %v5193_v31 = vld [vmem:[#allocation2 + $0x5f0] sm:$0xf0]  ;;  %v5068_v34 = vor.u32 %v6195_v26, %v5065_v27 }
 0x1bb   :  { %2584 = vmatpush.bf16.msrb.mxu3 %v4620_v49  ;;  %v6127_v36 = vld [vmem:[#allocation2 + $0x2c4] sm:$0xf]  ;;  %v4793_v37 = vld [vmem:[#allocation2 + $0x2d0] sm:$0xf0]  ;;  %v5196_v40 = vor.u32 %v6227_v30, %v5193_v31 }
 0x1bc   :  { %2546 = vmatpush.bf16.msrb.mxu0 %v4984_v58  ;;  %v6159_v38 = vld [vmem:[#allocation2 + $0x3c4] sm:$0xf]  ;;  %v4921_v42 = vld [vmem:[#allocation2 + $0x3d0] sm:$0xf0]  ;;  %v4796_v55 = vor.u32 %v6127_v36, %v4793_v37 }
 0x1bd   :  { %2559 = vmatpush.bf16.msrb.mxu1 %v5112_v59  ;;  %v6191_v41 = vld [vmem:[#allocation2 + $0x4c4] sm:$0xf]  ;;  %v5049_v44 = vld [vmem:[#allocation2 + $0x4d0] sm:$0xf0]  ;;  %v4924_v43 = vor.u32 %v6159_v38, %v4921_v42 }
 0x1be   :  { %2572 = vmatpush.bf16.msrb.mxu2 %v4476_v6  ;;  %v6223_v52 = vld [vmem:[#allocation2 + $0x5c4] sm:$0xf]  ;;  %v5177_v60 = vld [vmem:[#allocation2 + $0x5d0] sm:$0xf0]  ;;  %v5052_v49 = vor.u32 %v6191_v41, %v5049_v44 }
 0x1bf   :  { %2585 = vmatpush.bf16.msrb.mxu3 %v4604_v2  ;;  %v6123_v62 = vld [vmem:[#allocation2 + $0x2a4] sm:$0xf]  ;;  %v4777_v63 = vld [vmem:[#allocation2 + $0x2b0] sm:$0xf0]  ;;  %v5180_v12 = vor.u32 %v6223_v52, %v5177_v60 }
 0x1c0   :  { %2547 = vmatpush.bf16.msrb.mxu0 %v4968_v16  ;;  %v6155_v57 = vld [vmem:[#allocation2 + $0x3a4] sm:$0xf]  ;;  %v4905_v13 = vld [vmem:[#allocation2 + $0x3b0] sm:$0xf0]  ;;  %v4780_v7 = vor.u32 %v6123_v62, %v4777_v63 }
 0x1c1   :  { %2560 = vmatpush.bf16.msrb.mxu1 %v5096_v18  ;;  %v6187_v58 = vld [vmem:[#allocation2 + $0x4a4] sm:$0xf]  ;;  %v5033_v45 = vld [vmem:[#allocation2 + $0x4b0] sm:$0xf0]  ;;  %v4908_v1 = vor.u32 %v6155_v57, %v4905_v13 }
 0x1c2   :  { %2573 = vmatpush.bf16.msrb.mxu2 %v4460_v5  ;;  %v6219_v59 = vld [vmem:[#allocation2 + $0x5a4] sm:$0xf]  ;;  %v5161_v6 = vld [vmem:[#allocation2 + $0x5b0] sm:$0xf0]  ;;  %v5036_v15 = vor.u32 %v6187_v58, %v5033_v45 }
 0x1c3   :  { %2586 = vmatpush.bf16.msrb.mxu3 %v4588_v54  ;;  %v6119_v2 = vld [vmem:[#allocation2 + $0x284] sm:$0xf]  ;;  %v4761_v29 = vld [vmem:[#allocation2 + $0x290] sm:$0xf0]  ;;  %v5164_v3 = vor.u32 %v6219_v59, %v5161_v6 }
 0x1c4   :  { %2548 = vmatpush.bf16.msrb.mxu0 %v4952_v24  ;;  %v6151_v50 = vld [vmem:[#allocation2 + $0x384] sm:$0xf]  ;;  %v4889_v9 = vld [vmem:[#allocation2 + $0x390] sm:$0xf0]  ;;  %v4764_v10 = vor.u32 %v6119_v2, %v4761_v29  ;;  %v4559_v2 = vld [vmem:[#allocation2 + $0xe8] sm:$0xf] }
 0x1c5   :  { %2561 = vmatpush.bf16.msrb.mxu1 %v5080_v39  ;;  %v6183_v11 = vld [vmem:[#allocation2 + $0x484] sm:$0xf]  ;;  %v5017_v53 = vld [vmem:[#allocation2 + $0x490] sm:$0xf0]  ;;  %v4892_v18 = vor.u32 %v6151_v50, %v4889_v9  ;;  %v6070_v29 = vld [vmem:[#allocation2 + $0xf4] sm:$0xf0] }
 0x1c6   :  { %2574 = vmatpush.bf16.msrb.mxu2 %v4444_v28  ;;  %v6215_v16 = vld [vmem:[#allocation2 + $0x584] sm:$0xf]  ;;  %v5145_v35 = vld [vmem:[#allocation2 + $0x590] sm:$0xf0]  ;;  %v5020_v5 = vor.u32 %v6183_v11, %v5017_v53  ;;  %v4687_v50 = vld [vmem:[#allocation2 + $0x1e8] sm:$0xf] }
 0x1c7   :  { %2587 = vmatpush.bf16.msrb.mxu3 %v4572_v32  ;;  %2549 = vmatmul.bf16.vlgmr.msrb.gmra.mxu0 %v7016_v4  ;;  %v6115_v14 = vld [vmem:[#allocation2 + $0x264] sm:$0xf]  ;;  %v4745_v8 = vld [vmem:[#allocation2 + $0x270] sm:$0xf0]  ;;  %v5148_v19 = vor.u32 %v6215_v16, %v5145_v35  ;;  %v6102_v9 = vld [vmem:[#allocation2 + $0x1f4] sm:$0xf0] }
 0x1c8   :  { %2593 = vmatpush.bf16.msra.mxu0 %v4812_v47  ;;  %2562 = vmatmul.bf16.vlgmr.msrb.gmra.mxu1 %v7018_v17  ;;  %v6147_v54 = vld [vmem:[#allocation2 + $0x364] sm:$0xf]  ;;  %v4873_v20 = vld [vmem:[#allocation2 + $0x370] sm:$0xf0]  ;;  %v4748_v24 = vor.u32 %v6115_v14, %v4745_v8  ;;  %v4815_v11 = vld [vmem:[#allocation2 + $0x2e8] sm:$0xf]  ;;  %v4560_v14 = vor.u32 %v6070_v29, %v4559_v2  ;;  %v4688_v8 = vor.u32 %v6102_v9, %v4687_v50 }
 0x1c9   :  { %2606 = vmatpush.bf16.msra.mxu1 %v4940_v33  ;;  %2575 = vmatmul.bf16.vlgmr.msrb.gmra.mxu2 %v7006_v48  ;;  %v6179_v21 = vld [vmem:[#allocation2 + $0x464] sm:$0xf]  ;;  %v5001_v61 = vld [vmem:[#allocation2 + $0x470] sm:$0xf0]  ;;  %v4876_v25 = vor.u32 %v6147_v54, %v4873_v20  ;;  %v6134_v53 = vld [vmem:[#allocation2 + $0x2f4] sm:$0xf0] }
 0x1ca   :  { %2619 = vmatpush.bf16.msra.mxu2 %v5068_v34  ;;  %2588 = vmatmul.bf16.vlgmr.msrb.gmra.mxu3 %v7010_v56  ;;  %v6211_v22 = vld [vmem:[#allocation2 + $0x564] sm:$0xf]  ;;  %v5129_v23 = vld [vmem:[#allocation2 + $0x570] sm:$0xf0]  ;;  %v5004_v26 = vor.u32 %v6179_v21, %v5001_v61  ;;  %v4816_v54 = vor.u32 %v6134_v53, %v4815_v11  ;;  %v6066_v20 = vld [vmem:[#allocation2 + $0xd4] sm:$0xf0] }
 0x1cb   :  { %2632 = vmatpush.bf16.msra.mxu3 %v5196_v40  ;;  %v6111_v27 = vld [vmem:[#allocation2 + $0x244] sm:$0xf]  ;;  %v4729_v39 = vld [vmem:[#allocation2 + $0x250] sm:$0xf0]  ;;  %v5132_v30 = vor.u32 %v6211_v22, %v5129_v23  ;;  %v4671_v21 = vld [vmem:[#allocation2 + $0x1c8] sm:$0xf] }
 0x1cc   :  { %2594 = vmatpush.bf16.msra.mxu0 %v4796_v55  ;;  %v6143_v28 = vld [vmem:[#allocation2 + $0x344] sm:$0xf]  ;;  %v4857_v31 = vld [vmem:[#allocation2 + $0x350] sm:$0xf0]  ;;  %v4732_v36 = vor.u32 %v6111_v27, %v4729_v39  ;;  %v6098_v22 = vld [vmem:[#allocation2 + $0x1d4] sm:$0xf0] }
 0x1cd   :  { %2607 = vmatpush.bf16.msra.mxu1 %v4924_v43  ;;  %v6175_v32 = vld [vmem:[#allocation2 + $0x444] sm:$0xf]  ;;  %v4985_v47 = vld [vmem:[#allocation2 + $0x450] sm:$0xf0]  ;;  %v4860_v37 = vor.u32 %v6143_v28, %v4857_v31  ;;  %v4799_v23 = vld [vmem:[#allocation2 + $0x2c8] sm:$0xf]  ;;  %v4672_v39 = vor.u32 %v6098_v22, %v4671_v21 }
 0x1ce   :  { %2620 = vmatpush.bf16.msra.mxu2 %v5052_v49  ;;  %v6207_v33 = vld [vmem:[#allocation2 + $0x544] sm:$0xf]  ;;  %v5113_v34 = vld [vmem:[#allocation2 + $0x550] sm:$0xf0]  ;;  %v4988_v38 = vor.u32 %v6175_v32, %v4985_v47  ;;  %v6062_v31 = vld [vmem:[#allocation2 + $0xb4] sm:$0xf0] }
 0x1cf   :  { %2633 = vmatpush.bf16.msra.mxu3 %v5180_v12  ;;  %v6107_v40 = vld [vmem:[#allocation2 + $0x224] sm:$0xf]  ;;  %v4713_v42 = vld [vmem:[#allocation2 + $0x230] sm:$0xf0]  ;;  %v5116_v44 = vor.u32 %v6207_v33, %v5113_v34  ;;  %v4655_v32 = vld [vmem:[#allocation2 + $0x1a8] sm:$0xf] }
 0x1d0   :  { %2595 = vmatpush.bf16.msra.mxu0 %v4780_v7  ;;  %v6139_v41 = vld [vmem:[#allocation2 + $0x324] sm:$0xf]  ;;  %v4841_v52 = vld [vmem:[#allocation2 + $0x330] sm:$0xf0]  ;;  %v4716_v62 = vor.u32 %v6107_v40, %v4713_v42  ;;  %v6094_v33 = vld [vmem:[#allocation2 + $0x1b4] sm:$0xf0] }
 0x1d1   :  { %2608 = vmatpush.bf16.msra.mxu1 %v4908_v1  ;;  %v6171_v60 = vld [vmem:[#allocation2 + $0x424] sm:$0xf]  ;;  %v4969_v55 = vld [vmem:[#allocation2 + $0x430] sm:$0xf0]  ;;  %v4844_v12 = vor.u32 %v6139_v41, %v4841_v52  ;;  %v4783_v34 = vld [vmem:[#allocation2 + $0x2a8] sm:$0xf]  ;;  %v4656_v42 = vor.u32 %v6094_v33, %v4655_v32 }
 0x1d2   :  { %2621 = vmatpush.bf16.msra.mxu2 %v5036_v15  ;;  %v6203_v43 = vld [vmem:[#allocation2 + $0x524] sm:$0xf]  ;;  %v5097_v49 = vld [vmem:[#allocation2 + $0x530] sm:$0xf0]  ;;  %v4972_v13 = vor.u32 %v6171_v60, %v4969_v55  ;;  %v6058_v52 = vld [vmem:[#allocation2 + $0x94] sm:$0xf0] }
 0x1d3   :  { %2634 = vmatpush.bf16.msra.mxu3 %v5164_v3  ;;  %v6103_v63 = vld [vmem:[#allocation2 + $0x204] sm:$0xf]  ;;  %v4697_v57 = vld [vmem:[#allocation2 + $0x210] sm:$0xf0]  ;;  %v5100_v6 = vor.u32 %v6203_v43, %v5097_v49  ;;  %v4639_v60 = vld [vmem:[#allocation2 + $0x188] sm:$0xf] }
 0x1d4   :  { %2596 = vmatpush.bf16.msra.mxu0 %v4764_v10  ;;  %v6135_v58 = vld [vmem:[#allocation2 + $0x304] sm:$0xf]  ;;  %v4825_v45 = vld [vmem:[#allocation2 + $0x310] sm:$0xf0]  ;;  %v4700_v3 = vor.u32 %v6103_v63, %v4697_v57  ;;  %v4943_v10 = vld [vmem:[#allocation2 + $0x3e8] sm:$0xf] }
 0x1d5   :  { %2609 = vmatpush.bf16.msra.mxu1 %v4892_v18  ;;  %v6167_v59 = vld [vmem:[#allocation2 + $0x404] sm:$0xf]  ;;  %v4953_v7 = vld [vmem:[#allocation2 + $0x410] sm:$0xf0]  ;;  %v4828_v16 = vor.u32 %v6135_v58, %v4825_v45  ;;  %v6166_v18 = vld [vmem:[#allocation2 + $0x3f4] sm:$0xf0] }
 0x1d6   :  { %2622 = vmatpush.bf16.msra.mxu2 %v5020_v5  ;;  %v6199_v1 = vld [vmem:[#allocation2 + $0x504] sm:$0xf]  ;;  %v5081_v15 = vld [vmem:[#allocation2 + $0x510] sm:$0xf0]  ;;  %v4956_v35 = vor.u32 %v6167_v59, %v4953_v7  ;;  %v4944_v61 = vor.u32 %v6166_v18, %v4943_v10  ;;  %v6090_v43 = vld [vmem:[#allocation2 + $0x194] sm:$0xf0] }
 0x1d7   :  { %2635 = vmatpush.bf16.msra.mxu3 %v5148_v19  ;;  %v5084_v5 = vor.u32 %v6199_v1, %v5081_v15  ;;  %v4543_v19 = vld [vmem:[#allocation2 + $0xc8] sm:$0xf]  ;;  %v6154_v57 = vld [vmem:[#allocation2 + $0x394] sm:$0xf0] }
 0x1d8   :  { %2597 = vmatpush.bf16.msra.mxu0 %v4748_v24  ;;  %v6130_v24 = vld [vmem:[#allocation2 + $0x2d4] sm:$0xf0]  ;;  %v4544_v27 = vor.u32 %v6066_v20, %v4543_v19  ;;  %v4767_v49 = vld [vmem:[#allocation2 + $0x288] sm:$0xf] }
 0x1d9   :  { %2610 = vmatpush.bf16.msra.mxu1 %v4876_v25  ;;  %v4927_v25 = vld [vmem:[#allocation2 + $0x3c8] sm:$0xf]  ;;  %v4800_v28 = vor.u32 %v6130_v24, %v4799_v23  ;;  %v6054_v59 = vld [vmem:[#allocation2 + $0x74] sm:$0xf0] }
 0x1da   :  { %2623 = vmatpush.bf16.msra.mxu2 %v5004_v26  ;;  %v6162_v26 = vld [vmem:[#allocation2 + $0x3d4] sm:$0xf0]  ;;  %v4895_v63 = vld [vmem:[#allocation2 + $0x388] sm:$0xf] }
 0x1db   :  { %2636 = vmatpush.bf16.msra.mxu3 %v5132_v30  ;;  %v4527_v30 = vld [vmem:[#allocation2 + $0xa8] sm:$0xf]  ;;  %v4928_v47 = vor.u32 %v6162_v26, %v4927_v25  ;;  %v4896_v7 = vor.u32 %v6154_v57, %v4895_v63  ;;  %v6086_v1 = vld [vmem:[#allocation2 + $0x174] sm:$0xf0] }
 0x1dc   :  { %2598 = vmatpush.bf16.msra.mxu0 %v4732_v36  ;;  %v6126_v36 = vld [vmem:[#allocation2 + $0x2b4] sm:$0xf0]  ;;  %v4528_v40 = vor.u32 %v6062_v31, %v4527_v30  ;;  %v4495_v45 = vld [vmem:[#allocation2 + $0x68] sm:$0xf] }
 0x1dd   :  { %2611 = vmatpush.bf16.msra.mxu1 %v4860_v37  ;;  %v4911_v37 = vld [vmem:[#allocation2 + $0x3a8] sm:$0xf]  ;;  %v4784_v41 = vor.u32 %v6126_v36, %v4783_v34  ;;  %v6118_v2 = vld [vmem:[#allocation2 + $0x274] sm:$0xf0] }
 0x1de   :  { %2624 = vmatpush.bf16.msra.mxu2 %v4988_v38  ;;  %v6158_v38 = vld [vmem:[#allocation2 + $0x3b4] sm:$0xf0]  ;;  %v4751_v15 = vld [vmem:[#allocation2 + $0x268] sm:$0xf] }
 0x1df   :  { %2637 = vmatpush.bf16.msra.mxu3 %v5116_v44  ;;  %v4511_v44 = vld [vmem:[#allocation2 + $0x88] sm:$0xf]  ;;  %v4912_v55 = vor.u32 %v6158_v38, %v4911_v37  ;;  %v6150_v50 = vld [vmem:[#allocation2 + $0x374] sm:$0xf0]  ;;  %v4752_v11 = vor.u32 %v6118_v2, %v4751_v15 }
 0x1e0   :  { %2599 = vmatpush.bf16.msra.mxu0 %v4716_v62  ;;  %v6122_v62 = vld [vmem:[#allocation2 + $0x294] sm:$0xf0]  ;;  %v4879_v29 = vld [vmem:[#allocation2 + $0x368] sm:$0xf] }
 0x1e1   :  { %2612 = vmatpush.bf16.msra.mxu1 %v4844_v12  ;;  %v4512_v12 = vor.u32 %v6058_v52, %v4511_v44  ;;  %v4768_v58 = vor.u32 %v6122_v62, %v4767_v49  ;;  %v4479_v53 = vld [vmem:[#allocation2 + $0x48] sm:$0xf]  ;;  %v4880_v10 = vor.u32 %v6150_v50, %v4879_v29  ;;  %v6082_v18 = vld [vmem:[#allocation2 + $0x154] sm:$0xf0]  ;;  %v6068_v49 = vld [vmem:[#allocation2 + $0xec] sm:$0xf] }
 0x1e2   :  { %2625 = vmatpush.bf16.msra.mxu2 %v4972_v13  ;;  %v4640_v13 = vor.u32 %v6090_v43, %v4639_v60  ;;  %v6046_v22 = vld [vmem:[#allocation2 + $0x34] sm:$0xf0]  ;;  %v4591_v23 = vld [vmem:[#allocation2 + $0x128] sm:$0xf]  ;;  %v4561_v62 = vld [vmem:[#allocation2 + $0xf8] sm:$0xf0] }
 0x1e3   :  { %2638 = vmatpush.bf16.msra.mxu3 %v5100_v6  ;;  %v4623_v6 = vld [vmem:[#allocation2 + $0x168] sm:$0xf]  ;;  %v6078_v25 = vld [vmem:[#allocation2 + $0x134] sm:$0xf0]  ;;  %v6064_v50 = vld [vmem:[#allocation2 + $0xcc] sm:$0xf] }
 0x1e4   :  { %2600 = vmatpush.bf16.msra.mxu0 %v4700_v3  ;;  %v4496_v3 = vor.u32 %v6054_v59, %v4495_v45  ;;  %v4624_v9 = vor.u32 %v6086_v1, %v4623_v6  ;;  %v4719_v26 = vld [vmem:[#allocation2 + $0x228] sm:$0xf]  ;;  %v6042_v32 = vld [vmem:[#allocation2 + $0x14] sm:$0xf0]  ;;  %v4564_v6 = vor.u32 %v6068_v49, %v4561_v62 }
 0x1e5   :  { %2613 = vmatpush.bf16.msra.mxu1 %v4828_v16  ;;  %v6050_v16 = vld [vmem:[#allocation2 + $0x54] sm:$0xf0]  ;;  %v4447_v31 = vld [vmem:[#allocation2 + $0x8] sm:$0xf] }
 0x1e6   :  { %2626 = vmatpush.bf16.msra.mxu2 %v4956_v35  ;;  %v4607_v35 = vld [vmem:[#allocation2 + $0x148] sm:$0xf]  ;;  %v4480_v19 = vor.u32 %v6050_v16, %v4479_v53  ;;  %v6074_v36 = vld [vmem:[#allocation2 + $0x114] sm:$0xf0] }
 0x1e7   :  { %2639 = vmatpush.bf16.msra.mxu3 %v5084_v5  ;;  %2601 = vmatmul.bf16.vlgmr.msra.gmra.mxu0 %v7004_v46  ;;  %v4735_v5 = vld [vmem:[#allocation2 + $0x248] sm:$0xf]  ;;  %v4608_v20 = vor.u32 %v6082_v18, %v4607_v35  ;;  %v6198_v52 = vld [vmem:[#allocation2 + $0x4f4] sm:$0xf0] }
 0x1e8   :  { %2645 = vmatpush.bf16.msrb.mxu0 %v4560_v14  ;;  %2614 = vmatmul.bf16.vlgmr.msra.gmra.mxu1 %v7008_v51  ;;  %v6114_v14 = vld [vmem:[#allocation2 + $0x254] sm:$0xf0]  ;;  %v4575_v34 = vld [vmem:[#allocation2 + $0x108] sm:$0xf] }
 0x1e9   :  { %2658 = vmatpush.bf16.msrb.mxu1 %v4688_v8  ;;  %2627 = vmatmul.bf16.vlgmr.msra.gmra.mxu2 %v7016_v4  ;;  %v4863_v8 = vld [vmem:[#allocation2 + $0x348] sm:$0xf]  ;;  %v4736_v21 = vor.u32 %v6114_v14, %v4735_v5  ;;  %v6230_v43 = vld [vmem:[#allocation2 + $0x5f4] sm:$0xf0]  ;;  %v4576_v63 = vor.u32 %v6074_v36, %v4575_v34 }
 0x1ea   :  { %2671 = vmatpush.bf16.msrb.mxu2 %v4816_v54  ;;  %2640 = vmatmul.bf16.vlgmr.msra.gmra.mxu3 %v7018_v17  ;;  %v6146_v54 = vld [vmem:[#allocation2 + $0x354] sm:$0xf0]  ;;  %v4703_v37 = vld [vmem:[#allocation2 + $0x208] sm:$0xf] }
 0x1eb   :  { %2684 = vmatpush.bf16.msrb.mxu3 %v4944_v61  ;;  %v4463_v61 = vld [vmem:[#allocation2 + $0x28] sm:$0xf]  ;;  %v4864_v24 = vor.u32 %v6146_v54, %v4863_v8  ;;  %v6194_v1 = vld [vmem:[#allocation2 + $0x4d4] sm:$0xf0]  ;;  %v6060_v54 = vld [vmem:[#allocation2 + $0xac] sm:$0xf] }
 0x1ec   :  { %2646 = vmatpush.bf16.msrb.mxu0 %v4544_v27  ;;  %v6110_v27 = vld [vmem:[#allocation2 + $0x234] sm:$0xf0]  ;;  %v4464_v30 = vor.u32 %v6046_v22, %v4463_v61  ;;  %v5071_v44 = vld [vmem:[#allocation2 + $0x4e8] sm:$0xf] }
 0x1ed   :  { %2659 = vmatpush.bf16.msrb.mxu1 %v4672_v39  ;;  %v4847_v39 = vld [vmem:[#allocation2 + $0x328] sm:$0xf]  ;;  %v4720_v33 = vor.u32 %v6110_v27, %v4719_v26  ;;  %v5072_v45 = vor.u32 %v6198_v52, %v5071_v44  ;;  %v6226_v29 = vld [vmem:[#allocation2 + $0x5d4] sm:$0xf0]  ;;  %v4497_v44 = vld [vmem:[#allocation2 + $0x78] sm:$0xf0] }
 0x1ee   :  { %2672 = vmatpush.bf16.msrb.mxu2 %v4800_v28  ;;  %v6142_v28 = vld [vmem:[#allocation2 + $0x334] sm:$0xf0]  ;;  %v5199_v60 = vld [vmem:[#allocation2 + $0x5e8] sm:$0xf]  ;;  %v6084_v52 = vld [vmem:[#allocation2 + $0x16c] sm:$0xf] }
 0x1ef   :  { %2685 = vmatpush.bf16.msrb.mxu3 %v4928_v47  ;;  %v4592_v47 = vor.u32 %v6078_v25, %v4591_v23  ;;  %v4848_v38 = vor.u32 %v6142_v28, %v4847_v39  ;;  %v5200_v59 = vor.u32 %v6230_v43, %v5199_v60  ;;  %v5183_v15 = vld [vmem:[#allocation2 + $0x5c8] sm:$0xf]  ;;  %v6190_v18 = vld [vmem:[#allocation2 + $0x4b4] sm:$0xf0]  ;;  %v6056_v28 = vld [vmem:[#allocation2 + $0x8c] sm:$0xf] }
 0x1f0   :  { %2647 = vmatpush.bf16.msrb.mxu0 %v4528_v40  ;;  %v6106_v40 = vld [vmem:[#allocation2 + $0x214] sm:$0xf0]  ;;  %v5184_v16 = vor.u32 %v6226_v29, %v5183_v15  ;;  %v5167_v5 = vld [vmem:[#allocation2 + $0x5a8] sm:$0xf]  ;;  %v4625_v60 = vld [vmem:[#allocation2 + $0x178] sm:$0xf0] }
 0x1f1   :  { %2660 = vmatpush.bf16.msrb.mxu1 %v4656_v42  ;;  %v4831_v42 = vld [vmem:[#allocation2 + $0x308] sm:$0xf]  ;;  %v4704_v57 = vor.u32 %v6106_v40, %v4703_v37  ;;  %v6222_v8 = vld [vmem:[#allocation2 + $0x5b4] sm:$0xf0] }
 0x1f2   :  { %2673 = vmatpush.bf16.msrb.mxu2 %v4784_v41  ;;  %v6138_v41 = vld [vmem:[#allocation2 + $0x314] sm:$0xf0]  ;;  %v5168_v22 = vor.u32 %v6222_v8, %v5167_v5  ;;  %v5151_v26 = vld [vmem:[#allocation2 + $0x588] sm:$0xf] }
 0x1f3   :  { %2686 = vmatpush.bf16.msrb.mxu3 %v4912_v55  ;;  %v4448_v55 = vor.u32 %v6042_v32, %v4447_v31  ;;  %v6186_v25 = vld [vmem:[#allocation2 + $0x494] sm:$0xf0]  ;;  %v6088_v31 = vld [vmem:[#allocation2 + $0x18c] sm:$0xf]  ;;  %v4641_v32 = vld [vmem:[#allocation2 + $0x198] sm:$0xf0] }
 0x1f4   :  { %2648 = vmatpush.bf16.msrb.mxu0 %v4512_v12  ;;  %v6100_v12 = vld [vmem:[#allocation2 + $0x1ec] sm:$0xf]  ;;  %v6218_v39 = vld [vmem:[#allocation2 + $0x594] sm:$0xf0]  ;;  %v5007_v36 = vld [vmem:[#allocation2 + $0x468] sm:$0xf]  ;;  %v4644_v40 = vor.u32 %v6088_v31, %v4641_v32 }
 0x1f5   :  { %2661 = vmatpush.bf16.msrb.mxu1 %v4640_v13  ;;  %v4689_v13 = vld [vmem:[#allocation2 + $0x1f8] sm:$0xf0]  ;;  %v6182_v37 = vld [vmem:[#allocation2 + $0x474] sm:$0xf0]  ;;  %v4991_v62 = vld [vmem:[#allocation2 + $0x448] sm:$0xf] }
 0x1f6   :  { %2674 = vmatpush.bf16.msrb.mxu2 %v4768_v58  ;;  %v4832_v58 = vor.u32 %v6138_v41, %v4831_v42  ;;  %v4692_v2 = vor.u32 %v6100_v12, %v4689_v13  ;;  %v6214_v42 = vld [vmem:[#allocation2 + $0x574] sm:$0xf0]  ;;  %v6052_v41 = vld [vmem:[#allocation2 + $0x6c] sm:$0xf]  ;;  %v4628_v12 = vor.u32 %v6084_v52, %v4625_v60  ;;  %v4929_v52 = vld [vmem:[#allocation2 + $0x3d8] sm:$0xf0] }
 0x1f7   :  { %2687 = vmatpush.bf16.msrb.mxu3 %v4896_v7  ;;  %v5055_v7 = vld [vmem:[#allocation2 + $0x4c8] sm:$0xf]  ;;  %v4500_v49 = vor.u32 %v6052_v41, %v4497_v44  ;;  %v6210_v13 = vld [vmem:[#allocation2 + $0x554] sm:$0xf0]  ;;  %v6160_v41 = vld [vmem:[#allocation2 + $0x3cc] sm:$0xf] }
 0x1f8   :  { %2649 = vmatpush.bf16.msrb.mxu0 %v4496_v3  ;;  %v4545_v3 = vld [vmem:[#allocation2 + $0xd8] sm:$0xf0]  ;;  %v5056_v53 = vor.u32 %v6194_v1, %v5055_v7  ;;  %v6174_v29 = vld [vmem:[#allocation2 + $0x434] sm:$0xf0]  ;;  %v6192_v60 = vld [vmem:[#allocation2 + $0x4cc] sm:$0xf] }
 0x1f9   :  { %2662 = vmatpush.bf16.msrb.mxu1 %v4624_v9  ;;  %v6096_v9 = vld [vmem:[#allocation2 + $0x1cc] sm:$0xf]  ;;  %v4548_v35 = vor.u32 %v6064_v50, %v4545_v3  ;;  %v5103_v50 = vld [vmem:[#allocation2 + $0x528] sm:$0xf]  ;;  %v6170_v5 = vld [vmem:[#allocation2 + $0x414] sm:$0xf0] }
 0x1fa   :  { %2675 = vmatpush.bf16.msrb.mxu2 %v4752_v11  ;;  %v4673_v11 = vld [vmem:[#allocation2 + $0x1d8] sm:$0xf0] }
 0x1fb   :  { %2688 = vmatpush.bf16.msrb.mxu3 %v4880_v10  ;;  %v5039_v10 = vld [vmem:[#allocation2 + $0x4a8] sm:$0xf]  ;;  %v4676_v14 = vor.u32 %v6096_v9, %v4673_v11  ;;  %v6206_v9 = vld [vmem:[#allocation2 + $0x534] sm:$0xf0]  ;;  %v6044_v11 = vld [vmem:[#allocation2 + $0x2c] sm:$0xf] }
 0x1fc   :  { %2650 = vmatpush.bf16.msrb.mxu0 %v4480_v19  ;;  %v4529_v19 = vld [vmem:[#allocation2 + $0xb8] sm:$0xf0]  ;;  %v5040_v61 = vor.u32 %v6190_v18, %v5039_v10  ;;  %v4959_v18 = vld [vmem:[#allocation2 + $0x408] sm:$0xf] }
 0x1fd   :  { %2663 = vmatpush.bf16.msrb.mxu1 %v4608_v20  ;;  %v6092_v20 = vld [vmem:[#allocation2 + $0x1ac] sm:$0xf]  ;;  %v4532_v23 = vor.u32 %v6060_v54, %v4529_v19  ;;  %v5087_v54 = vld [vmem:[#allocation2 + $0x508] sm:$0xf]  ;;  %v6202_v19 = vld [vmem:[#allocation2 + $0x514] sm:$0xf0] }
 0x1fe   :  { %2676 = vmatpush.bf16.msrb.mxu2 %v4736_v21  ;;  %v4657_v21 = vld [vmem:[#allocation2 + $0x1b8] sm:$0xf0]  ;;  %v5088_v31 = vor.u32 %v6202_v19, %v5087_v54  ;;  %v6148_v19 = vld [vmem:[#allocation2 + $0x36c] sm:$0xf] }
 0x1ff   :  { %2689 = vmatpush.bf16.msrb.mxu3 %v4864_v24  ;;  %v5023_v24 = vld [vmem:[#allocation2 + $0x488] sm:$0xf]  ;;  %v4660_v27 = vor.u32 %v6092_v20, %v4657_v21  ;;  %v6040_v20 = vld [vmem:[#allocation2 + $0xc] sm:$0xf]  ;;  %v4753_v54 = vld [vmem:[#allocation2 + $0x278] sm:$0xf0] }
 0x200   :  { %2651 = vmatpush.bf16.msrb.mxu0 %v4464_v30  ;;  %v4513_v30 = vld [vmem:[#allocation2 + $0x98] sm:$0xf0] }
 0x201   :  { %2664 = vmatpush.bf16.msrb.mxu1 %v4592_v47  ;;  %v5024_v47 = vor.u32 %v6186_v25, %v5023_v24  ;;  %v4516_v34 = vor.u32 %v6056_v28, %v4513_v30  ;;  %v6132_v24 = vld [vmem:[#allocation2 + $0x2ec] sm:$0xf]  ;;  %v4817_v25 = vld [vmem:[#allocation2 + $0x2f8] sm:$0xf0] }
 0x202   :  { %2677 = vmatpush.bf16.msrb.mxu2 %v4720_v33  ;;  %v5152_v33 = vor.u32 %v6218_v39, %v5151_v26  ;;  %v6164_v26 = vld [vmem:[#allocation2 + $0x3ec] sm:$0xf]  ;;  %v4945_v39 = vld [vmem:[#allocation2 + $0x3f8] sm:$0xf0] }
 0x203   :  { %2690 = vmatpush.bf16.msrb.mxu3 %v4848_v38  ;;  %v5135_v38 = vld [vmem:[#allocation2 + $0x568] sm:$0xf]  ;;  %v6196_v28 = vld [vmem:[#allocation2 + $0x4ec] sm:$0xf]  ;;  %v5073_v30 = vld [vmem:[#allocation2 + $0x4f8] sm:$0xf0] }
 0x204   :  { %2652 = vmatpush.bf16.msrb.mxu0 %v4448_v55  ;;  %v5008_v55 = vor.u32 %v6182_v37, %v5007_v36  ;;  %v5136_v43 = vor.u32 %v6214_v42, %v5135_v38  ;;  %v4820_v36 = vor.u32 %v6132_v24, %v4817_v25  ;;  %v4948_v37 = vor.u32 %v6164_v26, %v4945_v39  ;;  %v4801_v42 = vld [vmem:[#allocation2 + $0x2d8] sm:$0xf0]  ;;  %v6212_v24 = vld [vmem:[#allocation2 + $0x56c] sm:$0xf] }
 0x205   :  { %2665 = vmatpush.bf16.msrb.mxu1 %v4576_v63  ;;  %v6178_v63 = vld [vmem:[#allocation2 + $0x454] sm:$0xf0]  ;;  %v5076_v38 = vor.u32 %v6196_v28, %v5073_v30  ;;  %v5137_v25 = vld [vmem:[#allocation2 + $0x578] sm:$0xf0] }
 0x206   :  { %2678 = vmatpush.bf16.msrb.mxu2 %v4704_v57  ;;  %v5119_v57 = vld [vmem:[#allocation2 + $0x548] sm:$0xf]  ;;  %v4992_v7 = vor.u32 %v6178_v63, %v4991_v62  ;;  %v4932_v63 = vor.u32 %v6160_v41, %v4929_v52  ;;  %v4737_v30 = vld [vmem:[#allocation2 + $0x258] sm:$0xf0] }
 0x207   :  { %2691 = vmatpush.bf16.msrb.mxu3 %v4832_v58  ;;  %2653 = vmatmul.bf16.vlgmr.msrb.gmra.mxu0 %v7006_v48  ;;  %v6048_v58 = vld [vmem:[#allocation2 + $0x4c] sm:$0xf]  ;;  %v5120_v1 = vor.u32 %v6210_v13, %v5119_v57  ;;  %v4785_v13 = vld [vmem:[#allocation2 + $0x2b8] sm:$0xf0] }
 0x208   :  { %2697 = vmatpush.bf16.msra.mxu0 %v5072_v45  ;;  %2666 = vmatmul.bf16.vlgmr.msrb.gmra.mxu1 %v7010_v56  ;;  %v4481_v45 = vld [vmem:[#allocation2 + $0x58] sm:$0xf0] }
 0x209   :  { %2710 = vmatpush.bf16.msra.mxu1 %v5200_v59  ;;  %2679 = vmatmul.bf16.vlgmr.msrb.gmra.mxu2 %v7004_v46  ;;  %v6080_v59 = vld [vmem:[#allocation2 + $0x14c] sm:$0xf]  ;;  %v4484_v15 = vor.u32 %v6048_v58, %v4481_v45  ;;  %v4721_v52 = vld [vmem:[#allocation2 + $0x238] sm:$0xf0] }
 0x20a   :  { %2723 = vmatpush.bf16.msra.mxu2 %v4564_v6  ;;  %2692 = vmatmul.bf16.vlgmr.msrb.gmra.mxu3 %v7008_v51  ;;  %v4609_v6 = vld [vmem:[#allocation2 + $0x158] sm:$0xf0]  ;;  %v6156_v58 = vld [vmem:[#allocation2 + $0x3ac] sm:$0xf] }
 0x20b   :  { %2736 = vmatpush.bf16.msra.mxu3 %v4692_v2  ;;  %v4975_v2 = vld [vmem:[#allocation2 + $0x428] sm:$0xf]  ;;  %v4612_v3 = vor.u32 %v6080_v59, %v4609_v6  ;;  %v4913_v59 = vld [vmem:[#allocation2 + $0x3b8] sm:$0xf0]  ;;  %v6188_v6 = vld [vmem:[#allocation2 + $0x4ac] sm:$0xf] }
 0x20c   :  { %2698 = vmatpush.bf16.msra.mxu0 %v5056_v53  ;;  %v4465_v53 = vld [vmem:[#allocation2 + $0x38] sm:$0xf0]  ;;  %v4976_v10 = vor.u32 %v6174_v29, %v4975_v2  ;;  %v4916_v29 = vor.u32 %v6156_v58, %v4913_v59  ;;  %v6104_v58 = vld [vmem:[#allocation2 + $0x20c] sm:$0xf] }
 0x20d   :  { %2711 = vmatpush.bf16.msra.mxu1 %v5184_v16  ;;  %v6076_v16 = vld [vmem:[#allocation2 + $0x12c] sm:$0xf]  ;;  %v4468_v8 = vor.u32 %v6044_v11, %v4465_v53 }
 0x20e   :  { %2724 = vmatpush.bf16.msra.mxu2 %v4548_v35  ;;  %v4593_v35 = vld [vmem:[#allocation2 + $0x138] sm:$0xf0]  ;;  %v6152_v11 = vld [vmem:[#allocation2 + $0x38c] sm:$0xf] }
 0x20f   :  { %2737 = vmatpush.bf16.msra.mxu3 %v4676_v14  ;;  %v5104_v14 = vor.u32 %v6206_v9, %v5103_v50  ;;  %v4596_v21 = vor.u32 %v6076_v16, %v4593_v35  ;;  %v4769_v9 = vld [vmem:[#allocation2 + $0x298] sm:$0xf0]  ;;  %v6184_v35 = vld [vmem:[#allocation2 + $0x48c] sm:$0xf] }
 0x210   :  { %2699 = vmatpush.bf16.msra.mxu0 %v5040_v61  ;;  %v4449_v61 = vld [vmem:[#allocation2 + $0x18] sm:$0xf0] }
 0x211   :  { %2712 = vmatpush.bf16.msra.mxu1 %v5168_v22  ;;  %v6072_v22 = vld [vmem:[#allocation2 + $0x10c] sm:$0xf]  ;;  %v4452_v32 = vor.u32 %v6040_v20, %v4449_v61  ;;  %v4897_v16 = vld [vmem:[#allocation2 + $0x398] sm:$0xf0]  ;;  %v7037_v20 = vunpack.c.l.bf16 %v6850_v0 }
 0x212   :  { %2725 = vmatpush.bf16.msra.mxu2 %v4532_v23  ;;  %v4577_v23 = vld [vmem:[#allocation2 + $0x118] sm:$0xf0] }
 0x213   :  { %2738 = vmatpush.bf16.msra.mxu3 %v4660_v27  ;;  %v4960_v27 = vor.u32 %v6170_v5, %v4959_v18  ;;  %v6216_v18 = vld [vmem:[#allocation2 + $0x58c] sm:$0xf]  ;;  %v5153_v5 = vld [vmem:[#allocation2 + $0x598] sm:$0xf0] }
 0x214   :  { %2700 = vmatpush.bf16.msra.mxu0 %v5024_v47  ;;  %v6228_v47 = vld [vmem:[#allocation2 + $0x5ec] sm:$0xf]  ;;  %v4881_v61 = vld [vmem:[#allocation2 + $0x378] sm:$0xf0] }
 0x215   :  { %2713 = vmatpush.bf16.msra.mxu1 %v5152_v33  ;;  %v5201_v33 = vld [vmem:[#allocation2 + $0x5f8] sm:$0xf0]  ;;  %v4884_v39 = vor.u32 %v6148_v19, %v4881_v61  ;;  %v5703_v19 = vld [vmem:[#allocation2 + $0x9e0] sm:$0xf] }
 0x216   :  { %2726 = vmatpush.bf16.msra.mxu2 %v4516_v34  ;;  %v4580_v34 = vor.u32 %v6072_v22, %v4577_v23  ;;  %v5204_v44 = vor.u32 %v6228_v47, %v5201_v33  ;;  %v6180_v22 = vld [vmem:[#allocation2 + $0x46c] sm:$0xf]  ;;  %v5009_v23 = vld [vmem:[#allocation2 + $0x478] sm:$0xf0]  ;;  %v5140_v47 = vor.u32 %v6212_v24, %v5137_v25 }
 0x217   :  { %2739 = vmatpush.bf16.msra.mxu3 %v4644_v40  ;;  %v6128_v40 = vld [vmem:[#allocation2 + $0x2cc] sm:$0xf]  ;;  %v5012_v28 = vor.u32 %v6180_v22, %v5009_v23  ;;  %v4865_v33 = vld [vmem:[#allocation2 + $0x358] sm:$0xf0] }
 0x218   :  { %2701 = vmatpush.bf16.msra.mxu0 %v5008_v55  ;;  %v5057_v55 = vld [vmem:[#allocation2 + $0x4d8] sm:$0xf0]  ;;  %v4804_v62 = vor.u32 %v6128_v40, %v4801_v42  ;;  %v6108_v42 = vld [vmem:[#allocation2 + $0x22c] sm:$0xf] }
 0x219   :  { %2714 = vmatpush.bf16.msra.mxu1 %v5136_v43  ;;  %v6224_v43 = vld [vmem:[#allocation2 + $0x5cc] sm:$0xf]  ;;  %v5060_v57 = vor.u32 %v6192_v60, %v5057_v55 }
 0x21a   :  { %2727 = vmatpush.bf16.msra.mxu2 %v4500_v49  ;;  %v5185_v49 = vld [vmem:[#allocation2 + $0x5d8] sm:$0xf0]  ;;  %v6140_v60 = vld [vmem:[#allocation2 + $0x32c] sm:$0xf] }
 0x21b   :  { %2740 = vmatpush.bf16.msra.mxu3 %v4628_v12  ;;  %v6124_v12 = vld [vmem:[#allocation2 + $0x2ac] sm:$0xf]  ;;  %v5188_v45 = vor.u32 %v6224_v43, %v5185_v49  ;;  %v4849_v49 = vld [vmem:[#allocation2 + $0x338] sm:$0xf0] }
 0x21c   :  { %2702 = vmatpush.bf16.msra.mxu0 %v4992_v7  ;;  %v5041_v7 = vld [vmem:[#allocation2 + $0x4b8] sm:$0xf0]  ;;  %v4788_v2 = vor.u32 %v6124_v12, %v4785_v13  ;;  %v4724_v13 = vor.u32 %v6108_v42, %v4721_v52  ;;  %v5287_v52 = vld [vmem:[#allocation2 + $0x6a0] sm:$0xf] }
 0x21d   :  { %2715 = vmatpush.bf16.msra.mxu1 %v5120_v1  ;;  %v6220_v1 = vld [vmem:[#allocation2 + $0x5ac] sm:$0xf]  ;;  %v5044_v50 = vor.u32 %v6188_v6, %v5041_v7  ;;  %v5105_v12 = vld [vmem:[#allocation2 + $0x538] sm:$0xf0]  ;;  %v4852_v6 = vor.u32 %v6140_v60, %v4849_v49  ;;  %v6253_v60 = vld [vmem:[#allocation2 + $0x6ac] sm:$0xf0] }
 0x21e   :  { %2728 = vmatpush.bf16.msra.mxu2 %v4484_v15  ;;  %v5169_v15 = vld [vmem:[#allocation2 + $0x5b8] sm:$0xf0]  ;;  %v6285_v49 = vld [vmem:[#allocation2 + $0x7ac] sm:$0xf0] }
 0x21f   :  { %2741 = vmatpush.bf16.msra.mxu3 %v4612_v3  ;;  %v6120_v3 = vld [vmem:[#allocation2 + $0x28c] sm:$0xf]  ;;  %v5172_v53 = vor.u32 %v6220_v1, %v5169_v15  ;;  %v4833_v15 = vld [vmem:[#allocation2 + $0x318] sm:$0xf0] }
 0x220   :  { %2703 = vmatpush.bf16.msra.mxu0 %v4976_v10  ;;  %v5025_v10 = vld [vmem:[#allocation2 + $0x498] sm:$0xf0]  ;;  %v6136_v1 = vld [vmem:[#allocation2 + $0x30c] sm:$0xf] }
 0x221   :  { %2716 = vmatpush.bf16.msra.mxu1 %v5104_v14  ;;  %v4900_v14 = vor.u32 %v6152_v11, %v4897_v16  ;;  %v6200_v11 = vld [vmem:[#allocation2 + $0x50c] sm:$0xf]  ;;  %v5319_v16 = vld [vmem:[#allocation2 + $0x6e0] sm:$0xf] }
 0x222   :  { %2729 = vmatpush.bf16.msra.mxu2 %v4468_v8  ;;  %v6116_v8 = vld [vmem:[#allocation2 + $0x26c] sm:$0xf] }
 0x223   :  { %2742 = vmatpush.bf16.msra.mxu3 %v4596_v21  ;;  %v5156_v21 = vor.u32 %v6216_v18, %v5153_v5  ;;  %v4756_v26 = vor.u32 %v6116_v8, %v4753_v54  ;;  %v4836_v8 = vor.u32 %v6136_v1, %v4833_v15  ;;  %v5399_v1 = vld [vmem:[#allocation2 + $0x780] sm:$0xf] }
 0x224   :  { %2704 = vmatpush.bf16.msra.mxu0 %v4960_v27  ;;  %v6112_v27 = vld [vmem:[#allocation2 + $0x24c] sm:$0xf] }
 0x225   :  { %2717 = vmatpush.bf16.msra.mxu1 %v5088_v31  ;;  %v6144_v31 = vld [vmem:[#allocation2 + $0x34c] sm:$0xf]  ;;  %v4740_v40 = vor.u32 %v6112_v27, %v4737_v30  ;;  %v5431_v30 = vld [vmem:[#allocation2 + $0x7c0] sm:$0xf] }
 0x226   :  { %2730 = vmatpush.bf16.msra.mxu2 %v4452_v32  ;;  %v1491_v32 = vperm.slane %v7037_v20, 0  ;;  %v4868_v41 = vor.u32 %v6144_v31, %v4865_v33  ;;  %v6321_v33 = vld [vmem:[#allocation2 + $0x8cc] sm:$0xf0] }
 0x227   :  { %2743 = vmatpush.bf16.msra.mxu3 %v4580_v34  ;;  %2705 = vmatmul.bf16.vlgmr.msra.gmra.mxu0 %v7016_v4  ;;  %v6176_v34 = vld [vmem:[#allocation2 + $0x44c] sm:$0xf] }
 0x228   :  { %2749 = vmatpush.bf16.msrb.mxu0 %v4820_v36  ;;  %2718 = vmatmul.bf16.vlgmr.msra.gmra.mxu1 %v7018_v17  ;;  %v4993_v36 = vld [vmem:[#allocation2 + $0x458] sm:$0xf0]  ;;  %v1507_v55 = vperm.slane %v1491_v32, 0  ;;  %v6289_v32 = vld [vmem:[#allocation2 + $0x7cc] sm:$0xf0] }
 0x229   :  { %2762 = vmatpush.bf16.msrb.mxu1 %v4948_v37  ;;  %2731 = vmatmul.bf16.vlgmr.msra.gmra.mxu2 %v7006_v48  ;;  %v4772_v48 = vor.u32 %v6120_v3, %v4769_v9  ;;  %v6208_v37 = vld [vmem:[#allocation2 + $0x54c] sm:$0xf]  ;;  %v4961_v9 = vld [vmem:[#allocation2 + $0x418] sm:$0xf0] }
 0x22a   :  { %2775 = vmatpush.bf16.msrb.mxu2 %v5076_v38  ;;  %2744 = vmatmul.bf16.vlgmr.msra.gmra.mxu3 %v7010_v56  ;;  %v5028_v56 = vor.u32 %v6184_v35, %v5025_v10  ;;  %v5121_v38 = vld [vmem:[#allocation2 + $0x558] sm:$0xf0]  ;;  %v6261_v35 = vld [vmem:[#allocation2 + $0x6ec] sm:$0xf0]  ;;  %v5447_v10 = vld [vmem:[#allocation2 + $0x7e0] sm:$0xf] }
 0x22b   :  { %2788 = vmatpush.bf16.msrb.mxu3 %v5204_v44  ;;  %v4996_v44 = vor.u32 %v6176_v34, %v4993_v36  ;;  %v5124_v43 = vor.u32 %v6208_v37, %v5121_v38  ;;  %v5320_v23 = vor.u32 %v6261_v35, %v5319_v16  ;;  %v5687_v37 = vld [vmem:[#allocation2 + $0x9c0] sm:$0xf]  ;;  %v6353_v38 = vld [vmem:[#allocation2 + $0x9cc] sm:$0xf0] }
 0x22c   :  { %2750 = vmatpush.bf16.msrb.mxu0 %v4804_v62  ;;  %v6172_v62 = vld [vmem:[#allocation2 + $0x42c] sm:$0xf] }
 0x22d   :  { %2763 = vmatpush.bf16.msrb.mxu1 %v4932_v63  ;;  %v4977_v63 = vld [vmem:[#allocation2 + $0x438] sm:$0xf0] }
 0x22e   :  { %2776 = vmatpush.bf16.msrb.mxu2 %v5060_v57  ;;  %v6204_v57 = vld [vmem:[#allocation2 + $0x52c] sm:$0xf]  ;;  %v4980_v7 = vor.u32 %v6172_v62, %v4977_v63  ;;  %v5543_v62 = vld [vmem:[#allocation2 + $0x8a0] sm:$0xf]  ;;  %v6317_v63 = vld [vmem:[#allocation2 + $0x8ac] sm:$0xf0] }
 0x22f   :  { %2789 = vmatpush.bf16.msrb.mxu3 %v5188_v45  ;;  %v4705_v45 = vld [vmem:[#allocation2 + $0x218] sm:$0xf0]  ;;  %v5108_v3 = vor.u32 %v6204_v57, %v5105_v12  ;;  %v5671_v57 = vld [vmem:[#allocation2 + $0x9a0] sm:$0xf]  ;;  %v6349_v12 = vld [vmem:[#allocation2 + $0x9ac] sm:$0xf0] }
 0x230   :  { %2751 = vmatpush.bf16.msrb.mxu0 %v4788_v2  ;;  %v6168_v2 = vld [vmem:[#allocation2 + $0x40c] sm:$0xf]  ;;  %v4708_v5 = vor.u32 %v6104_v58, %v4705_v45  ;;  %v5288_v58 = vor.u32 %v6253_v60, %v5287_v52  ;;  %v5672_v15 = vor.u32 %v6349_v12, %v5671_v57  ;;  %v6237_v52 = vld [vmem:[#allocation2 + $0x62c] sm:$0xf0]  ;;  %v5351_v60 = vld [vmem:[#allocation2 + $0x720] sm:$0xf] }
 0x231   :  { %2764 = vmatpush.bf16.msrb.mxu1 %v4916_v29  ;;  %v4964_v54 = vor.u32 %v6168_v2, %v4961_v9  ;;  %v5527_v2 = vld [vmem:[#allocation2 + $0x880] sm:$0xf]  ;;  %v1492_v9 = vperm.slane %v7037_v20, 2  ;;  %v6333_v12 = vld [vmem:[#allocation2 + $0x92c] sm:$0xf0] }
 0x232   :  { %2777 = vmatpush.bf16.msrb.mxu2 %v5044_v50  ;;  %v2498_v59 = vpop.f32.mrf.mxu0  ;;  %v5607_v57 = vld [vmem:[#allocation2 + $0x920] sm:$0xf] }
 0x233   :  { %2790 = vmatpush.bf16.msrb.mxu3 %v5172_v53  ;;  %v2499_v29 = vadd.f32 %v2498_v59, %v1507_v55  ;;  %v5089_v53 = vld [vmem:[#allocation2 + $0x518] sm:$0xf0]  ;;  %v5415_v55 = vld [vmem:[#allocation2 + $0x7a0] sm:$0xf] }
 0x234   :  { %2752 = vmatpush.bf16.msrb.mxu0 %v4772_v48  ;;  %v2511_v50 = vpop.f32.mrf.mxu1  ;;  %v6293_v48 = vld [vmem:[#allocation2 + $0x7ec] sm:$0xf0]  ;;  %v5092_v22 = vor.u32 %v6200_v11, %v5089_v53  ;;  %v5416_v59 = vor.u32 %v6285_v49, %v5415_v55 }
 0x235   :  { %2765 = vmatpush.bf16.msrb.mxu1 %v4900_v14  ;;  %v2512_v18 = vadd.f32 %v2511_v50, %v2499_v29  ;;  %v5575_v14 = vld [vmem:[#allocation2 + $0x8e0] sm:$0xf]  ;;  %v6345_v50 = vld [vmem:[#allocation2 + $0x98c] sm:$0xf0] }
 0x236   :  { %2778 = vmatpush.bf16.msrb.mxu2 %v5028_v56  ;;  %v6325_v56 = vld [vmem:[#allocation2 + $0x8ec] sm:$0xf0]  ;;  %v5655_v29 = vld [vmem:[#allocation2 + $0x980] sm:$0xf] }
 0x237   :  { %2791 = vmatpush.bf16.msrb.mxu3 %v5156_v21  ;;  %v6357_v21 = vld [vmem:[#allocation2 + $0x9ec] sm:$0xf0]  ;;  %v2524_v61 = vpop.f32.mrf.mxu2  ;;  %v5576_v27 = vor.u32 %v6325_v56, %v5575_v14  ;;  %v5511_v56 = vld [vmem:[#allocation2 + $0x860] sm:$0xf] }
 0x238   :  { %2753 = vmatpush.bf16.msrb.mxu0 %v4756_v26  ;;  %v2525_v24 = vadd.f32 %v2524_v61, %v2512_v18  ;;  %v5448_v26 = vor.u32 %v6293_v48, %v5447_v10  ;;  %v5704_v31 = vor.u32 %v6357_v21, %v5703_v19  ;;  %v5255_v10 = vld [vmem:[#allocation2 + $0x660] sm:$0xf]  ;;  %v6245_v18 = vld [vmem:[#allocation2 + $0x66c] sm:$0xf0]  ;;  %v5656_v48 = vor.u32 %v6345_v50, %v5655_v29 }
 0x239   :  { %2766 = vmatpush.bf16.msrb.mxu1 %v4884_v39  ;;  %v2537_v25 = vpop.f32.mrf.mxu3  ;;  %v5303_v39 = vld [vmem:[#allocation2 + $0x6c0] sm:$0xf]  ;;  %v6277_v14 = vld [vmem:[#allocation2 + $0x76c] sm:$0xf0]  ;;  %v1508_v61 = vperm.slane %v1492_v9, 0 }
 0x23a   :  { %2779 = vmatpush.bf16.msrb.mxu2 %v5012_v28  ;;  %v6257_v28 = vld [vmem:[#allocation2 + $0x6cc] sm:$0xf0]  ;;  %v2538_v34 = vadd.f32 %v2537_v25, %v2525_v24  ;;  %v2500_v36 = vpop.f32.mrf.mxu0  ;;  %v5639_v19 = vld [vmem:[#allocation2 + $0x960] sm:$0xf] }
 0x23b   :  { %2792 = vmatpush.bf16.msrb.mxu3 %v5140_v47  ;;  %v5559_v47 = vld [vmem:[#allocation2 + $0x8c0] sm:$0xf]  ;;  %v5304_v42 = vor.u32 %v6257_v28, %v5303_v39  ;;  %v6341_v21 = vld [vmem:[#allocation2 + $0x96c] sm:$0xf0] }
 0x23c   :  { %2754 = vmatpush.bf16.msrb.mxu0 %v4740_v40  ;;  %v2513_v40 = vpop.f32.mrf.mxu1  ;;  %v5239_v25 = vld [vmem:[#allocation2 + $0x640] sm:$0xf]  ;;  %v5640_v39 = vor.u32 %v6341_v21, %v5639_v19  ;;  %v6273_v28 = vld [vmem:[#allocation2 + $0x74c] sm:$0xf0] }
 0x23d   :  { %2767 = vmatpush.bf16.msrb.mxu1 %v4868_v41  ;;  %v5432_v41 = vor.u32 %v6289_v32, %v5431_v30  ;;  %v5495_v30 = vld [vmem:[#allocation2 + $0x840] sm:$0xf]  ;;  %v6269_v49 = vld [vmem:[#allocation2 + $0x72c] sm:$0xf0] }
 0x23e   :  { %2780 = vmatpush.bf16.msrb.mxu2 %v4996_v44  ;;  %v5560_v44 = vor.u32 %v6321_v33, %v5559_v47  ;;  %v5623_v47 = vld [vmem:[#allocation2 + $0x940] sm:$0xf]  ;;  %v6337_v33 = vld [vmem:[#allocation2 + $0x94c] sm:$0xf0] }
 0x23f   :  { %2793 = vmatpush.bf16.msrb.mxu3 %v5124_v43  ;;  %v5688_v43 = vor.u32 %v6353_v38, %v5687_v37  ;;  %v5831_v50 = vld [vmem:[#allocation2 + $0xae0] sm:$0xf] }
 0x240   :  { %2755 = vmatpush.bf16.msrb.mxu0 %v4724_v13  ;;  %v2526_v13 = vpop.f32.mrf.mxu2  ;;  %v5959_v9 = vld [vmem:[#allocation2 + $0xbe0] sm:$0xf] }
 0x241   :  { %2768 = vmatpush.bf16.msrb.mxu1 %v4852_v6  ;;  %v2539_v45 = vpop.f32.mrf.mxu3  ;;  %v5271_v6 = vld [vmem:[#allocation2 + $0x680] sm:$0xf] }
 0x242   :  { %2781 = vmatpush.bf16.msrb.mxu2 %v4980_v7  ;;  %v6249_v7 = vld [vmem:[#allocation2 + $0x68c] sm:$0xf0]  ;;  %v5815_v21 = vld [vmem:[#allocation2 + $0xac0] sm:$0xf] }
 0x243   :  { %2794 = vmatpush.bf16.msrb.mxu3 %v5108_v3  ;;  %v6233_v45 = vld [vmem:[#allocation2 + $0x60c] sm:$0xf0] }
 0x244   :  { %2756 = vmatpush.bf16.msrb.mxu0 %v4708_v5  ;;  %v2550_v3 = vpop.f32.mrf.mxu0  ;;  %v5383_v5 = vld [vmem:[#allocation2 + $0x760] sm:$0xf] }
 0x245   :  { %2769 = vmatpush.bf16.msrb.mxu1 %v4836_v8  ;;  %v2551_v11 = vadd.f32 %v2550_v3, %v2538_v34  ;;  %v2563_v53 = vpop.f32.mrf.mxu1  ;;  %v6309_v8 = vld [vmem:[#allocation2 + $0x86c] sm:$0xf0] }
 0x246   :  { %2782 = vmatpush.bf16.msrb.mxu2 %v4964_v54  ;;  %v5512_v24 = vor.u32 %v6309_v8, %v5511_v56  ;;  %v6389_v3 = vld [vmem:[#allocation2 + $0xaec] sm:$0xf0] }
 0x247   :  { %2795 = vmatpush.bf16.msrb.mxu3 %v5092_v22  ;;  %2757 = vmatmul.bf16.vlgmr.msrb.gmra.mxu0 %v7004_v46  ;;  %v6281_v46 = vld [vmem:[#allocation2 + $0x78c] sm:$0xf0]  ;;  %v7045_v54 = vadd.f32 %v2563_v53, %v2551_v11  ;;  %v5256_v22 = vor.u32 %v6245_v18, %v5255_v10  ;;  %v5832_v56 = vor.u32 %v6389_v3, %v5831_v50  ;;  %v5895_v3 = vld [vmem:[#allocation2 + $0xb60] sm:$0xf] }
 0x248   :  { %3775 = vmatpush.bf16.msra.mxu0 %v5320_v23  ;;  %2770 = vmatmul.bf16.vlgmr.msrb.gmra.mxu1 %v7008_v51  ;;  %v5272_v51 = vor.u32 %v6249_v7, %v5271_v6  ;;  %v5400_v16 = vor.u32 %v6281_v46, %v5399_v1  ;;  %v5384_v23 = vor.u32 %v6277_v14, %v5383_v5  ;;  %v5335_v6 = vld [vmem:[#allocation2 + $0x700] sm:$0xf]  ;;  %v6265_v7 = vld [vmem:[#allocation2 + $0x70c] sm:$0xf0]  ;;  %v6291_v5 = vld [vmem:[#allocation2 + $0x7e4] sm:$0xf] }
 0x249   :  { %3788 = vmatpush.bf16.msra.mxu1 %v5448_v26  ;;  %2783 = vmatmul.bf16.vlgmr.msrb.gmra.mxu2 %v7016_v4  ;;  %v5544_v4 = vor.u32 %v6317_v63, %v5543_v62  ;;  %v6241_v26 = vld [vmem:[#allocation2 + $0x64c] sm:$0xf0]  ;;  %v5479_v62 = vld [vmem:[#allocation2 + $0x820] sm:$0xf]  ;;  %v5336_v10 = vor.u32 %v6265_v7, %v5335_v6  ;;  %v5401_v6 = vld [vmem:[#allocation2 + $0x790] sm:$0xf0] }
 0x24a   :  { %3801 = vmatpush.bf16.msra.mxu2 %v5576_v27  ;;  %2796 = vmatmul.bf16.vlgmr.msrb.gmra.mxu3 %v7018_v17  ;;  %v6313_v17 = vld [vmem:[#allocation2 + $0x88c] sm:$0xf0]  ;;  %v5367_v27 = vld [vmem:[#allocation2 + $0x740] sm:$0xf]  ;;  %v5240_v38 = vor.u32 %v6241_v26, %v5239_v25  ;;  %v6255_v25 = vld [vmem:[#allocation2 + $0x6c4] sm:$0xf] }
 0x24b   :  { %3814 = vmatpush.bf16.msra.mxu3 %v5704_v31  ;;  %v5528_v35 = vor.u32 %v6313_v17, %v5527_v2  ;;  %v6305_v31 = vld [vmem:[#allocation2 + $0x84c] sm:$0xf0]  ;;  %v5463_v1 = vld [vmem:[#allocation2 + $0x800] sm:$0xf]  ;;  %v5305_v26 = vld [vmem:[#allocation2 + $0x6d0] sm:$0xf0] }
 0x24c   :  { %3776 = vmatpush.bf16.msra.mxu0 %v5304_v42  ;;  %v2576_v32 = vpop.f32.mrf.mxu2  ;;  %v2552_v37 = vpop.f32.mrf.mxu0  ;;  %v5368_v42 = vor.u32 %v6273_v28, %v5367_v27  ;;  %v6301_v63 = vld [vmem:[#allocation2 + $0x82c] sm:$0xf0]  ;;  %v5591_v2 = vld [vmem:[#allocation2 + $0x900] sm:$0xf]  ;;  %v6287_v27 = vld [vmem:[#allocation2 + $0x7c4] sm:$0xf] }
 0x24d   :  { %3789 = vmatpush.bf16.msra.mxu1 %v5432_v41  ;;  %v2577_v34 = vadd.f32 %v2576_v32, %v1508_v61  ;;  %v2589_v36 = vpop.f32.mrf.mxu3  ;;  %v2565_v40 = vpop.f32.mrf.mxu1  ;;  %v5496_v41 = vor.u32 %v6305_v31, %v5495_v30  ;;  %v6297_v46 = vld [vmem:[#allocation2 + $0x80c] sm:$0xf0]  ;;  %v5799_v31 = vld [vmem:[#allocation2 + $0xaa0] sm:$0xf]  ;;  %v7051_v32 = vld [vmem:[#allocation1] sm:$0xff] }
 0x24e   :  { %3802 = vmatpush.bf16.msra.mxu2 %v5560_v44  ;;  %v5223_v44 = vld [vmem:[#allocation2 + $0x620] sm:$0xf]  ;;  %v6329_v17 = vld [vmem:[#allocation2 + $0x90c] sm:$0xf0]  ;;  %v5464_v18 = vor.u32 %v6297_v46, %v5463_v1 }
 0x24f   :  { %3815 = vmatpush.bf16.msra.mxu3 %v5688_v43  ;;  %v7047_v55 = vadd.f32 %v2589_v36, %v2577_v34  ;;  %v5624_v43 = vor.u32 %v6337_v33, %v5623_v47  ;;  %v5224_v13 = vor.u32 %v6237_v52, %v5223_v44  ;;  %v6421_v53 = vld [vmem:[#allocation2 + $0xbec] sm:$0xf0]  ;;  %v5592_v14 = vor.u32 %v6329_v17, %v5591_v2  ;;  %v5927_v37 = vld [vmem:[#allocation2 + $0xba0] sm:$0xf]  ;;  %v5289_v44 = vld [vmem:[#allocation2 + $0x6b0] sm:$0xf0] }
 0x250   :  { %3777 = vmatpush.bf16.msra.mxu0 %v5288_v58  ;;  %v5207_v58 = vld [vmem:[#allocation2 + $0x600] sm:$0xf]  ;;  %v5960_v8 = vor.u32 %v6421_v53, %v5959_v9  ;;  %v6385_v61 = vld [vmem:[#allocation2 + $0xacc] sm:$0xf0]  ;;  %v5308_v34 = vor.u32 %v6255_v25, %v5305_v26  ;;  %v6283_v52 = vld [vmem:[#allocation2 + $0x7a4] sm:$0xf] }
 0x251   :  { %3790 = vmatpush.bf16.msra.mxu1 %v5416_v59  ;;  %v5352_v59 = vor.u32 %v6269_v49, %v5351_v60  ;;  %v5208_v11 = vor.u32 %v6233_v45, %v5207_v58  ;;  %v7049_v28 = vld [vmem:[#allocation1 + $0x12] sm:$0xff]  ;;  %v5816_v30 = vor.u32 %v6385_v61, %v5815_v21  ;;  %v7053_v47 = vld [vmem:[#allocation1 + $0x1b] sm:$0xff]  ;;  %v6247_v45 = vld [vmem:[#allocation2 + $0x684] sm:$0xf] }
 0x252   :  { %3803 = vmatpush.bf16.msra.mxu2 %v5544_v4  ;;  %v5480_v4 = vor.u32 %v6301_v63, %v5479_v62  ;;  %v6381_v36 = vld [vmem:[#allocation2 + $0xaac] sm:$0xf0]  ;;  %v5417_v60 = vld [vmem:[#allocation2 + $0x7b0] sm:$0xf0]  ;;  %v5783_v63 = vld [vmem:[#allocation2 + $0xa80] sm:$0xf] }
 0x253   :  { %3816 = vmatpush.bf16.msra.mxu3 %v5672_v15  ;;  %v5608_v15 = vor.u32 %v6333_v12, %v5607_v57  ;;  %v6377_v57 = vld [vmem:[#allocation2 + $0xa8c] sm:$0xf0]  ;;  %v5911_v12 = vld [vmem:[#allocation2 + $0xb80] sm:$0xf]  ;;  %v5257_v53 = vld [vmem:[#allocation2 + $0x670] sm:$0xf0] }
 0x254   :  { %3778 = vmatpush.bf16.msra.mxu0 %v5272_v51  ;;  %v2578_v29 = vpop.f32.mrf.mxu2  ;;  %v6409_v58 = vld [vmem:[#allocation2 + $0xb8c] sm:$0xf0]  ;;  %v5784_v7 = vor.u32 %v6377_v57, %v5783_v63  ;;  %v6271_v25 = vld [vmem:[#allocation2 + $0x744] sm:$0xf]  ;;  %v5369_v26 = vld [vmem:[#allocation2 + $0x750] sm:$0xf0] }
 0x255   :  { %3791 = vmatpush.bf16.msra.mxu1 %v5400_v16  ;;  %v2591_v51 = vpop.f32.mrf.mxu3  ;;  %v6259_v16 = vld [vmem:[#allocation2 + $0x6e4] sm:$0xf]  ;;  %v5767_v29 = vld [vmem:[#allocation2 + $0xa60] sm:$0xf]  ;;  %v6373_v50 = vld [vmem:[#allocation2 + $0xa6c] sm:$0xf0] }
 0x256   :  { %3804 = vmatpush.bf16.msra.mxu2 %v5528_v35  ;;  %v5321_v35 = vld [vmem:[#allocation2 + $0x6f0] sm:$0xf0]  ;;  %v6405_v51 = vld [vmem:[#allocation2 + $0xb6c] sm:$0xf0]  ;;  %v5719_v63 = vld [vmem:[#allocation2 + $0xa00] sm:$0xf] }
 0x257   :  { %3817 = vmatpush.bf16.msra.mxu3 %v5656_v48  ;;  %v5449_v48 = vld [vmem:[#allocation2 + $0x7f0] sm:$0xf0]  ;;  %v5324_v19 = vor.u32 %v6259_v16, %v5321_v35  ;;  %v6275_v35 = vld [vmem:[#allocation2 + $0x764] sm:$0xf]  ;;  %v6361_v57 = vld [vmem:[#allocation2 + $0xa0c] sm:$0xf0] }
 0x258   :  { %3779 = vmatpush.bf16.msra.mxu0 %v5256_v22  ;;  %v5943_v22 = vld [vmem:[#allocation2 + $0xbc0] sm:$0xf] }
 0x259   :  { %3792 = vmatpush.bf16.msra.mxu1 %v5384_v23  ;;  %v5452_v23 = vor.u32 %v6291_v5, %v5449_v48  ;;  %v5896_v5 = vor.u32 %v6405_v51, %v5895_v3  ;;  %v6387_v3 = vld [vmem:[#allocation2 + $0xae4] sm:$0xf] }
 0x25a   :  { %3805 = vmatpush.bf16.msra.mxu2 %v5512_v24  ;;  %v6417_v24 = vld [vmem:[#allocation2 + $0xbcc] sm:$0xf0] }
 0x25b   :  { %3818 = vmatpush.bf16.msra.mxu3 %v5640_v39  ;;  %v5433_v39 = vld [vmem:[#allocation2 + $0x7d0] sm:$0xf0]  ;;  %v5944_v33 = vor.u32 %v6417_v24, %v5943_v22  ;;  %v6401_v22 = vld [vmem:[#allocation2 + $0xb4c] sm:$0xf0] }
 0x25c   :  { %3780 = vmatpush.bf16.msra.mxu0 %v5240_v38  ;;  %v7055_v38 = vld [vmem:[#allocation1 + $0x9] sm:$0xff]  ;;  %v5436_v40 = vor.u32 %v6287_v27, %v5433_v39  ;;  %v5241_v24 = vld [vmem:[#allocation2 + $0x650] sm:$0xf0] }
 0x25d   :  { %3793 = vmatpush.bf16.msra.mxu1 %v5368_v42  ;;  %v6413_v42 = vld [vmem:[#allocation2 + $0xbac] sm:$0xf0] }
 0x25e   :  { %3806 = vmatpush.bf16.msra.mxu2 %v5496_v41  ;;  %v6251_v41 = vld [vmem:[#allocation2 + $0x6a4] sm:$0xf]  ;;  %v5928_v49 = vor.u32 %v6413_v42, %v5927_v37  ;;  %v5863_v37 = vld [vmem:[#allocation2 + $0xb20] sm:$0xf] }
 0x25f   :  { %3819 = vmatpush.bf16.msra.mxu3 %v5624_v43  ;;  %v5800_v43 = vor.u32 %v6381_v36, %v5799_v31  ;;  %v5292_v62 = vor.u32 %v6251_v41, %v5289_v44  ;;  %v6365_v36 = vld [vmem:[#allocation2 + $0xa2c] sm:$0xf0]  ;;  %v5372_v41 = vor.u32 %v6271_v25, %v5369_v26  ;;  %v7067_v25 = vld [vmem:[#allocation1 + $0x2d] sm:$0xff] }
 0x260   :  { %3781 = vmatpush.bf16.msra.mxu0 %v5224_v13  ;;  %v5420_v13 = vor.u32 %v6283_v52, %v5417_v60  ;;  %v6397_v44 = vld [vmem:[#allocation2 + $0xb2c] sm:$0xf0]  ;;  %v6235_v52 = vld [vmem:[#allocation2 + $0x624] sm:$0xf]  ;;  %v5225_v60 = vld [vmem:[#allocation2 + $0x630] sm:$0xf0] }
 0x261   :  { %3794 = vmatpush.bf16.msra.mxu1 %v5352_v59  ;;  %v5273_v59 = vld [vmem:[#allocation2 + $0x690] sm:$0xf0] }
 0x262   :  { %3807 = vmatpush.bf16.msra.mxu2 %v5480_v4  ;;  %v6279_v4 = vld [vmem:[#allocation2 + $0x784] sm:$0xf]  ;;  %v5276_v46 = vor.u32 %v6247_v45, %v5273_v59  ;;  %v6393_v45 = vld [vmem:[#allocation2 + $0xb0c] sm:$0xf0] }
 0x263   :  { %3820 = vmatpush.bf16.msra.mxu3 %v5608_v15  ;;  %v5912_v15 = vor.u32 %v6409_v58, %v5911_v12  ;;  %v5404_v9 = vor.u32 %v6279_v4, %v5401_v6  ;;  %v5864_v12 = vor.u32 %v6397_v44, %v5863_v37  ;;  %v5847_v58 = vld [vmem:[#allocation2 + $0xb00] sm:$0xf]  ;;  %v6231_v59 = vld [vmem:[#allocation2 + $0x604] sm:$0xf]  ;;  %v5209_v6 = vld [vmem:[#allocation2 + $0x610] sm:$0xf0] }
 0x264   :  { %3782 = vmatpush.bf16.msra.mxu0 %v5208_v11  ;;  %v2602_v1 = vpop.f32.mrf.mxu0  ;;  %v6243_v11 = vld [vmem:[#allocation2 + $0x664] sm:$0xf]  ;;  %v5848_v51 = vor.u32 %v6393_v45, %v5847_v58  ;;  %v5801_v37 = vld [vmem:[#allocation2 + $0xab0] sm:$0xf0] }
 0x265   :  { %3795 = vmatpush.bf16.msra.mxu1 %v5336_v10  ;;  %v2603_v2 = vadd.f32 %v2602_v1, %v7047_v55  ;;  %v2615_v17 = vpop.f32.mrf.mxu1  ;;  %v5385_v10 = vld [vmem:[#allocation2 + $0x770] sm:$0xf0]  ;;  %v5260_v48 = vor.u32 %v6243_v11, %v5257_v53  ;;  %v5751_v55 = vld [vmem:[#allocation2 + $0xa40] sm:$0xf]  ;;  %v5212_v11 = vor.u32 %v6231_v59, %v5209_v6  ;;  %v6419_v53 = vld [vmem:[#allocation2 + $0xbe4] sm:$0xf] }
 0x266   :  { %3808 = vmatpush.bf16.msra.mxu2 %v5464_v18  ;;  %v5768_v18 = vor.u32 %v6373_v50, %v5767_v29  ;;  %v5337_v1 = vld [vmem:[#allocation2 + $0x710] sm:$0xf0]  ;;  %v5720_v29 = vor.u32 %v6361_v57, %v5719_v63  ;;  %v6407_v58 = vld [vmem:[#allocation2 + $0xb84] sm:$0xf] }
 0x267   :  { %3821 = vmatpush.bf16.msra.mxu3 %v5592_v14  ;;  %3783 = vmatmul.bf16.vlgmr.msra.gmra.mxu0 %v7051_v32  ;;  %v2616_v16 = vadd.f32 %v2615_v17, %v2603_v2  ;;  %v5577_v2 = vld [vmem:[#allocation2 + $0x8f0] sm:$0xf0]  ;;  %v6355_v17 = vld [vmem:[#allocation2 + $0x9e4] sm:$0xf] }
 0x268   :  { %3827 = vmatpush.bf16.msrb.mxu0 %v5832_v56  ;;  %3796 = vmatmul.bf16.vlgmr.msra.gmra.mxu1 %v7055_v38  ;;  %v6369_v56 = vld [vmem:[#allocation2 + $0xa4c] sm:$0xf0]  ;;  %v5705_v50 = vld [vmem:[#allocation2 + $0x9f0] sm:$0xf0] }
 0x269   :  { %3840 = vmatpush.bf16.msrb.mxu1 %v5960_v8  ;;  %3809 = vmatmul.bf16.vlgmr.msra.gmra.mxu2 %v7049_v28  ;;  %v5879_v8 = vld [vmem:[#allocation2 + $0xb40] sm:$0xf]  ;;  %v5752_v39 = vor.u32 %v6369_v56, %v5751_v55  ;;  %v6351_v55 = vld [vmem:[#allocation2 + $0x9c4] sm:$0xf]  ;;  %v5657_v57 = vld [vmem:[#allocation2 + $0x990] sm:$0xf0] }
 0x26a   :  { %3853 = vmatpush.bf16.msrb.mxu2 %v5324_v19  ;;  %3822 = vmatmul.bf16.vlgmr.msra.gmra.mxu3 %v7053_v47  ;;  %v5388_v19 = vor.u32 %v6275_v35, %v5385_v10  ;;  %v5880_v31 = vor.u32 %v6401_v22, %v5879_v8  ;;  %v5689_v8 = vld [vmem:[#allocation2 + $0x9d0] sm:$0xf0] }
 0x26b   :  { %3866 = vmatpush.bf16.msrb.mxu3 %v5452_v23  ;;  %v6239_v23 = vld [vmem:[#allocation2 + $0x644] sm:$0xf]  ;;  %v5945_v22 = vld [vmem:[#allocation2 + $0xbd0] sm:$0xf0]  ;;  %v5692_v26 = vor.u32 %v6351_v55, %v5689_v8 }
 0x26c   :  { %3828 = vmatpush.bf16.msrb.mxu0 %v5816_v30  ;;  %v2628_v14 = vpop.f32.mrf.mxu2  ;;  %v2604_v30 = vpop.f32.mrf.mxu0  ;;  %v5913_v45 = vld [vmem:[#allocation2 + $0xb90] sm:$0xf0]  ;;  %v6399_v8 = vld [vmem:[#allocation2 + $0xb44] sm:$0xf] }
 0x26d   :  { %3841 = vmatpush.bf16.msrb.mxu1 %v5944_v33  ;;  %v2629_v21 = vadd.f32 %v2628_v14, %v2616_v16  ;;  %v2641_v61 = vpop.f32.mrf.mxu3  ;;  %v5244_v33 = vor.u32 %v6239_v23, %v5241_v24  ;;  %v5961_v16 = vld [vmem:[#allocation2 + $0xbf0] sm:$0xf0]  ;;  %v7065_v23 = vld [vmem:[#allocation1 + $0x24] sm:$0xff] }
 0x26e   :  { %3854 = vmatpush.bf16.msrb.mxu2 %v5308_v34  ;;  %v5735_v34 = vld [vmem:[#allocation2 + $0xa20] sm:$0xf]  ;;  %v5561_v14 = vld [vmem:[#allocation2 + $0x8d0] sm:$0xf0]  ;;  %v5964_v56 = vor.u32 %v6419_v53, %v5961_v16  ;;  %v6303_v16 = vld [vmem:[#allocation2 + $0x844] sm:$0xf] }
 0x26f   :  { %3867 = vmatpush.bf16.msrb.mxu3 %v5436_v40  ;;  %v2642_v27 = vadd.f32 %v2641_v61, %v2629_v21  ;;  %v2617_v40 = vpop.f32.mrf.mxu1  ;;  %v5817_v21 = vld [vmem:[#allocation2 + $0xad0] sm:$0xf0]  ;;  %v6415_v61 = vld [vmem:[#allocation2 + $0xbc4] sm:$0xf] }
 0x270   :  { %3829 = vmatpush.bf16.msrb.mxu0 %v5800_v43  ;;  %v6267_v43 = vld [vmem:[#allocation2 + $0x724] sm:$0xf]  ;;  %v5545_v30 = vld [vmem:[#allocation2 + $0x8b0] sm:$0xf0] }
 0x271   :  { %3842 = vmatpush.bf16.msrb.mxu1 %v5928_v49  ;;  %v7063_v42 = vpack.c.bf16 %v2642_v27, %v7045_v54  ;;  %v5353_v49 = vld [vmem:[#allocation2 + $0x730] sm:$0xf0]  ;;  %v6411_v40 = vld [vmem:[#allocation2 + $0xba4] sm:$0xf] }
 0x272   :  { %3855 = vmatpush.bf16.msrb.mxu2 %v5292_v62  ;;  %v5736_v62 = vor.u32 %v6365_v36, %v5735_v34  ;;  %v5356_v54 = vor.u32 %v6267_v43, %v5353_v49  ;;  %v5673_v34 = vld [vmem:[#allocation2 + $0x9b0] sm:$0xf0]  ;;  %v6379_v36 = vld [vmem:[#allocation2 + $0xaa4] sm:$0xf] }
 0x273   :  { %3868 = vmatpush.bf16.msrb.mxu3 %v5420_v13  ;;  %v5228_v13 = vor.u32 %v6235_v52, %v5225_v60  ;;  %v5804_v60 = vor.u32 %v6379_v36, %v5801_v37  ;;  %v6311_v43 = vld [vmem:[#allocation2 + $0x884] sm:$0xf]  ;;  %v5529_v49 = vld [vmem:[#allocation2 + $0x890] sm:$0xf0] }
 0x274   :  { %3830 = vmatpush.bf16.msrb.mxu0 %v5784_v7  ;;  %v2630_v4 = vpop.f32.mrf.mxu2  ;;  %v6263_v7 = vld [vmem:[#allocation2 + $0x704] sm:$0xf]  ;;  %v5532_v59 = vor.u32 %v6311_v43, %v5529_v49  ;;  %v5753_v55 = vld [vmem:[#allocation2 + $0xa50] sm:$0xf0] }
 0x275   :  { %3843 = vmatpush.bf16.msrb.mxu1 %v5912_v15  ;;  %v2643_v15 = vpop.f32.mrf.mxu3  ;;  %v5340_v35 = vor.u32 %v6263_v7, %v5337_v1  ;;  %v6307_v7 = vld [vmem:[#allocation2 + $0x864] sm:$0xf]  ;;  %v5513_v1 = vld [vmem:[#allocation2 + $0x870] sm:$0xf0] }
 0x276   :  { %3856 = vmatpush.bf16.msrb.mxu2 %v5276_v46  ;;  %v6323_v46 = vld [vmem:[#allocation2 + $0x8e4] sm:$0xf]  ;;  %v5737_v36 = vld [vmem:[#allocation2 + $0xa30] sm:$0xf0] }
 0x277   :  { %3869 = vmatpush.bf16.msrb.mxu3 %v5404_v9  ;;  %v5833_v9 = vld [vmem:[#allocation2 + $0xaf0] sm:$0xf0]  ;;  %v5580_v10 = vor.u32 %v6323_v46, %v5577_v2  ;;  %v6339_v15 = vld [vmem:[#allocation2 + $0x964] sm:$0xf]  ;;  %v5916_v2 = vor.u32 %v6407_v58, %v5913_v45 }
 0x278   :  { %3831 = vmatpush.bf16.msrb.mxu0 %v5768_v18  ;;  %v5708_v18 = vor.u32 %v6355_v17, %v5705_v50  ;;  %v5641_v17 = vld [vmem:[#allocation2 + $0x970] sm:$0xf0]  ;;  %v6395_v37 = vld [vmem:[#allocation2 + $0xb24] sm:$0xf] }
 0x279   :  { %3844 = vmatpush.bf16.msrb.mxu1 %v5896_v5  ;;  %v5836_v5 = vor.u32 %v6387_v3, %v5833_v9  ;;  %v5769_v50 = vld [vmem:[#allocation2 + $0xa70] sm:$0xf0]  ;;  %v6403_v3 = vld [vmem:[#allocation2 + $0xb64] sm:$0xf] }
 0x27a   :  { %3857 = vmatpush.bf16.msrb.mxu2 %v5260_v48  ;;  %v6319_v48 = vld [vmem:[#allocation2 + $0x8c4] sm:$0xf]  ;;  %v5897_v9 = vld [vmem:[#allocation2 + $0xb70] sm:$0xf0] }
 0x27b   :  { %3870 = vmatpush.bf16.msrb.mxu3 %v5388_v19  ;;  %v6383_v19 = vld [vmem:[#allocation2 + $0xac4] sm:$0xf]  ;;  %v5564_v24 = vor.u32 %v6319_v48, %v5561_v14  ;;  %v5625_v48 = vld [vmem:[#allocation2 + $0x950] sm:$0xf0] }
 0x27c   :  { %3832 = vmatpush.bf16.msrb.mxu0 %v5752_v39  ;;  %v5820_v27 = vor.u32 %v6383_v19, %v5817_v21  ;;  %v6315_v39 = vld [vmem:[#allocation2 + $0x8a4] sm:$0xf]  ;;  %v5881_v19 = vld [vmem:[#allocation2 + $0xb50] sm:$0xf0] }
 0x27d   :  { %3845 = vmatpush.bf16.msrb.mxu1 %v5880_v31  ;;  %v6347_v31 = vld [vmem:[#allocation2 + $0x9a4] sm:$0xf]  ;;  %v5548_v44 = vor.u32 %v6315_v39, %v5545_v30  ;;  %v5849_v45 = vld [vmem:[#allocation2 + $0xb10] sm:$0xf0] }
 0x27e   :  { %3858 = vmatpush.bf16.msrb.mxu2 %v5244_v33  ;;  %v5948_v33 = vor.u32 %v6415_v61, %v5945_v22  ;;  %v5676_v52 = vor.u32 %v6347_v31, %v5673_v34  ;;  %v6367_v14 = vld [vmem:[#allocation2 + $0xa44] sm:$0xf]  ;;  %v5884_v31 = vor.u32 %v6399_v8, %v5881_v19  ;;  %v6322_v8 = vld [vmem:[#allocation2 + $0x8d4] sm:$0xf0]  ;;  %v5695_v19 = vld [vmem:[#allocation2 + $0x9c8] sm:$0xf] }
 0x27f   :  { %3871 = vmatpush.bf16.msrb.mxu3 %v5372_v41  ;;  %v5929_v41 = vld [vmem:[#allocation2 + $0xbb0] sm:$0xf0]  ;;  %v6331_v39 = vld [vmem:[#allocation2 + $0x924] sm:$0xf] }
 0x280   :  { %3833 = vmatpush.bf16.msrb.mxu0 %v5736_v62  ;;  %v6343_v62 = vld [vmem:[#allocation2 + $0x984] sm:$0xf]  ;;  %v5932_v63 = vor.u32 %v6411_v40, %v5929_v41  ;;  %v5865_v40 = vld [vmem:[#allocation2 + $0xb30] sm:$0xf0] }
 0x281   :  { %3846 = vmatpush.bf16.msrb.mxu1 %v5864_v12  ;;  %v6375_v12 = vld [vmem:[#allocation2 + $0xa84] sm:$0xf] }
 0x282   :  { %3859 = vmatpush.bf16.msrb.mxu2 %v5228_v13  ;;  %v5785_v13 = vld [vmem:[#allocation2 + $0xa90] sm:$0xf0]  ;;  %v6363_v34 = vld [vmem:[#allocation2 + $0xa24] sm:$0xf] }
 0x283   :  { %3872 = vmatpush.bf16.msrb.mxu3 %v5356_v54  ;;  %v5660_v54 = vor.u32 %v6343_v62, %v5657_v57  ;;  %v5788_v6 = vor.u32 %v6375_v12, %v5785_v13  ;;  %v5740_v43 = vor.u32 %v6363_v34, %v5737_v36  ;;  %v6327_v49 = vld [vmem:[#allocation2 + $0x904] sm:$0xf]  ;;  %v5593_v62 = vld [vmem:[#allocation2 + $0x910] sm:$0xf0]  ;;  %v5868_v12 = vor.u32 %v6395_v37, %v5865_v40  ;;  %v6318_v34 = vld [vmem:[#allocation2 + $0x8b4] sm:$0xf0] }
 0x284   :  { %3834 = vmatpush.bf16.msrb.mxu0 %v5720_v29  ;;  %v7073_v4 = vpop.f32.mrf.mxu0  ;;  %v6371_v29 = vld [vmem:[#allocation2 + $0xa64] sm:$0xf]  ;;  %v5721_v13 = vld [vmem:[#allocation2 + $0xa10] sm:$0xf0]  ;;  %v5679_v36 = vld [vmem:[#allocation2 + $0x9a8] sm:$0xf] }
 0x285   :  { %3847 = vmatpush.bf16.msrb.mxu1 %v5848_v51  ;;  %v7075_v46 = vpop.f32.mrf.mxu1  ;;  %v5516_v51 = vor.u32 %v6307_v7, %v5513_v1  ;;  %v5772_v53 = vor.u32 %v6371_v29, %v5769_v50  ;;  %v6391_v58 = vld [vmem:[#allocation2 + $0xb04] sm:$0xf]  ;;  %v5455_v7 = vld [vmem:[#allocation2 + $0x7e8] sm:$0xf]  ;;  %v5596_v29 = vor.u32 %v6327_v49, %v5593_v62  ;;  %v6350_v37 = vld [vmem:[#allocation2 + $0x9b4] sm:$0xf0] }
 0x286   :  { %3860 = vmatpush.bf16.msrb.mxu2 %v5212_v11  ;;  %v5644_v11 = vor.u32 %v6339_v15, %v5641_v17  ;;  %v6294_v15 = vld [vmem:[#allocation2 + $0x7f4] sm:$0xf0]  ;;  %v5680_v49 = vor.u32 %v6350_v37, %v5679_v36 }
 0x287   :  { %3873 = vmatpush.bf16.msrb.mxu3 %v5340_v35  ;;  %3835 = vmatmul.bf16.vlgmr.msrb.gmra.mxu0 %v7065_v23  ;;  %v5497_v35 = vld [vmem:[#allocation2 + $0x850] sm:$0xf0]  ;;  %v6326_v17 = vld [vmem:[#allocation2 + $0x8f4] sm:$0xf0] }
 0x288   :  { %3879 = vmatpush.bf16.msra.mxu0 %v5580_v10  ;;  %3848 = vmatmul.bf16.vlgmr.msrb.gmra.mxu1 %v7067_v25  ;;  %v6335_v10 = vld [vmem:[#allocation2 + $0x944] sm:$0xf]  ;;  %v5500_v21 = vor.u32 %v6303_v16, %v5497_v35  ;;  %v5311_v35 = vld [vmem:[#allocation2 + $0x6c8] sm:$0xf]  ;;  %v6282_v62 = vld [vmem:[#allocation2 + $0x794] sm:$0xf0] }
 0x289   :  { %3892 = vmatpush.bf16.msra.mxu1 %v5708_v18  ;;  %3861 = vmatmul.bf16.vlgmr.msrb.gmra.mxu2 %v7051_v32  ;;  %v5628_v22 = vor.u32 %v6335_v10, %v5625_v48  ;;  %v6258_v10 = vld [vmem:[#allocation2 + $0x6d4] sm:$0xf0] }
 0x28a   :  { %3905 = vmatpush.bf16.msra.mxu2 %v5836_v5  ;;  %3874 = vmatmul.bf16.vlgmr.msrb.gmra.mxu3 %v7055_v38  ;;  %v5900_v5 = vor.u32 %v6403_v3, %v5897_v9  ;;  %v5711_v3 = vld [vmem:[#allocation2 + $0x9e8] sm:$0xf]  ;;  %v6358_v9 = vld [vmem:[#allocation2 + $0x9f4] sm:$0xf0] }
 0x28b   :  { %3918 = vmatpush.bf16.msra.mxu3 %v5964_v56  ;;  %v5712_v48 = vor.u32 %v6358_v9, %v5711_v3  ;;  %v5647_v3 = vld [vmem:[#allocation2 + $0x968] sm:$0xf]  ;;  %v6342_v9 = vld [vmem:[#allocation2 + $0x974] sm:$0xf0] }
 0x28c   :  { %3880 = vmatpush.bf16.msra.mxu0 %v5564_v24  ;;  %v7077_v18 = vpop.f32.mrf.mxu2  ;;  %v2656_v61 = vpop.f32.mrf.mxu0  ;;  %v5756_v24 = vor.u32 %v6367_v14, %v5753_v55  ;;  %v6290_v14 = vld [vmem:[#allocation2 + $0x7d4] sm:$0xf0]  ;;  %v5567_v55 = vld [vmem:[#allocation2 + $0x8c8] sm:$0xf] }
 0x28d   :  { %3893 = vmatpush.bf16.msra.mxu1 %v5692_v26  ;;  %v7079_v56 = vpop.f32.mrf.mxu3  ;;  %v6299_v26 = vld [vmem:[#allocation2 + $0x824] sm:$0xf]  ;;  %v2669_v30 = vpop.f32.mrf.mxu1  ;;  %v5312_v61 = vor.u32 %v6258_v10, %v5311_v35  ;;  %v6242_v35 = vld [vmem:[#allocation2 + $0x654] sm:$0xf0]  ;;  %v5375_v10 = vld [vmem:[#allocation2 + $0x748] sm:$0xf] }
 0x28e   :  { %3906 = vmatpush.bf16.msra.mxu2 %v5820_v27  ;;  %v5481_v27 = vld [vmem:[#allocation2 + $0x830] sm:$0xf0]  ;;  %v6270_v37 = vld [vmem:[#allocation2 + $0x734] sm:$0xf0] }
 0x28f   :  { %3919 = vmatpush.bf16.msra.mxu3 %v5948_v33  ;;  %v5609_v33 = vld [vmem:[#allocation2 + $0x930] sm:$0xf0]  ;;  %v5484_v41 = vor.u32 %v6299_v26, %v5481_v27  ;;  %v5295_v26 = vld [vmem:[#allocation2 + $0x6a8] sm:$0xf]  ;;  %v6254_v27 = vld [vmem:[#allocation2 + $0x6b4] sm:$0xf0] }
 0x290   :  { %3881 = vmatpush.bf16.msra.mxu0 %v5548_v44  ;;  %v6295_v44 = vld [vmem:[#allocation2 + $0x804] sm:$0xf]  ;;  %v5296_v40 = vor.u32 %v6254_v27, %v5295_v26 }
 0x291   :  { %3894 = vmatpush.bf16.msra.mxu1 %v5676_v52  ;;  %v5465_v52 = vld [vmem:[#allocation2 + $0x810] sm:$0xf0] }
 0x292   :  { %3907 = vmatpush.bf16.msra.mxu2 %v5804_v60  ;;  %v5612_v60 = vor.u32 %v6331_v39, %v5609_v33  ;;  %v5468_v1 = vor.u32 %v6295_v44, %v5465_v52  ;;  %v5423_v39 = vld [vmem:[#allocation2 + $0x7a8] sm:$0xf] }
 0x293   :  { %3920 = vmatpush.bf16.msra.mxu3 %v5932_v63  ;;  %v6359_v63 = vld [vmem:[#allocation2 + $0xa04] sm:$0xf]  ;;  %v5551_v33 = vld [vmem:[#allocation2 + $0x8a8] sm:$0xf] }
 0x294   :  { %3882 = vmatpush.bf16.msra.mxu0 %v5532_v59  ;;  %v2682_v57 = vpop.f32.mrf.mxu2  ;;  %v5724_v50 = vor.u32 %v6359_v63, %v5721_v13  ;;  %v5552_v44 = vor.u32 %v6318_v34, %v5551_v33  ;;  %v5279_v52 = vld [vmem:[#allocation2 + $0x688] sm:$0xf]  ;;  %v6346_v13 = vld [vmem:[#allocation2 + $0x994] sm:$0xf0] }
 0x295   :  { %3895 = vmatpush.bf16.msra.mxu1 %v5660_v54  ;;  %v2695_v59 = vpop.f32.mrf.mxu3  ;;  %v5327_v54 = vld [vmem:[#allocation2 + $0x6e8] sm:$0xf]  ;;  %v6314_v57 = vld [vmem:[#allocation2 + $0x894] sm:$0xf0] }
 0x296   :  { %3908 = vmatpush.bf16.msra.mxu2 %v5788_v6  ;;  %v6262_v6 = vld [vmem:[#allocation2 + $0x6f4] sm:$0xf0]  ;;  %v5535_v63 = vld [vmem:[#allocation2 + $0x888] sm:$0xf] }
 0x297   :  { %3921 = vmatpush.bf16.msra.mxu3 %v5916_v2  ;;  %v5583_v2 = vld [vmem:[#allocation2 + $0x8e8] sm:$0xf]  ;;  %v6238_v33 = vld [vmem:[#allocation2 + $0x634] sm:$0xf0] }
 0x298   :  { %3883 = vmatpush.bf16.msra.mxu0 %v5516_v51  ;;  %v5852_v51 = vor.u32 %v6391_v58, %v5849_v45  ;;  %v5584_v16 = vor.u32 %v6326_v17, %v5583_v2  ;;  %v6278_v17 = vld [vmem:[#allocation2 + $0x774] sm:$0xf0]  ;;  %v5359_v34 = vld [vmem:[#allocation2 + $0x728] sm:$0xf] }
 0x299   :  { %3896 = vmatpush.bf16.msra.mxu1 %v5644_v11  ;;  %v5328_v11 = vor.u32 %v6262_v6, %v5327_v54  ;;  %v5536_v6 = vor.u32 %v6314_v57, %v5535_v63  ;;  %v5343_v63 = vld [vmem:[#allocation2 + $0x708] sm:$0xf]  ;;  %v5360_v57 = vor.u32 %v6270_v37, %v5359_v34  ;;  %v5441_v34 = vld [vmem:[#allocation2 + $0x7d8] sm:$0xf0] }
 0x29a   :  { %3909 = vmatpush.bf16.msra.mxu2 %v5772_v53  ;;  %v5456_v53 = vor.u32 %v6294_v15, %v5455_v7  ;;  %v5263_v7 = vld [vmem:[#allocation2 + $0x668] sm:$0xf] }
 0x29b   :  { %3922 = vmatpush.bf16.msra.mxu3 %v5900_v5  ;;  %v5439_v5 = vld [vmem:[#allocation2 + $0x7c8] sm:$0xf] }
 0x29c   :  { %3884 = vmatpush.bf16.msra.mxu0 %v5500_v21  ;;  %v6354_v21 = vld [vmem:[#allocation2 + $0x9d4] sm:$0xf0]  ;;  %v5391_v15 = vld [vmem:[#allocation2 + $0x768] sm:$0xf] }
 0x29d   :  { %3897 = vmatpush.bf16.msra.mxu1 %v5628_v22  ;;  %v5440_v22 = vor.u32 %v6290_v14, %v5439_v5  ;;  %v5696_v30 = vor.u32 %v6354_v21, %v5695_v19  ;;  %v5648_v5 = vor.u32 %v6342_v9, %v5647_v3  ;;  %v5503_v14 = vld [vmem:[#allocation2 + $0x848] sm:$0xf]  ;;  %v1493_v19 = vperm.slane %v7037_v20, 4 }
 0x29e   :  { %3910 = vmatpush.bf16.msra.mxu2 %v5756_v24  ;;  %v5568_v24 = vor.u32 %v6322_v8, %v5567_v55  ;;  %v6306_v55 = vld [vmem:[#allocation2 + $0x854] sm:$0xf0]  ;;  %v5631_v21 = vld [vmem:[#allocation2 + $0x948] sm:$0xf] }
 0x29f   :  { %3923 = vmatpush.bf16.msra.mxu3 %v5884_v31  ;;  %v6286_v31 = vld [vmem:[#allocation2 + $0x7b4] sm:$0xf0] }
 0x2a0   :  { %3885 = vmatpush.bf16.msra.mxu0 %v5484_v41  ;;  %v5424_v41 = vor.u32 %v6286_v31, %v5423_v39  ;;  %v5231_v31 = vld [vmem:[#allocation2 + $0x628] sm:$0xf] }
 0x2a1   :  { %3898 = vmatpush.bf16.msra.mxu1 %v5612_v60  ;;  %v6250_v60 = vld [vmem:[#allocation2 + $0x694] sm:$0xf0] }
 0x2a2   :  { %3911 = vmatpush.bf16.msra.mxu2 %v5740_v43  ;;  %v5407_v43 = vld [vmem:[#allocation2 + $0x788] sm:$0xf]  ;;  %v5280_v45 = vor.u32 %v6250_v60, %v5279_v52  ;;  %v6334_v60 = vld [vmem:[#allocation2 + $0x934] sm:$0xf0] }
 0x2a3   :  { %3924 = vmatpush.bf16.msra.mxu3 %v5868_v12  ;;  %v5663_v12 = vld [vmem:[#allocation2 + $0x988] sm:$0xf]  ;;  %v5408_v54 = vor.u32 %v6282_v62, %v5407_v43  ;;  %v5232_v43 = vor.u32 %v6238_v33, %v5231_v31  ;;  %v6234_v62 = vld [vmem:[#allocation2 + $0x614] sm:$0xf0]  ;;  %v5313_v31 = vld [vmem:[#allocation2 + $0x6d8] sm:$0xf0] }
 0x2a4   :  { %3886 = vmatpush.bf16.msra.mxu0 %v5468_v1  ;;  %v7085_v58 = vpop.f32.mrf.mxu0  ;;  %v6246_v1 = vld [vmem:[#allocation2 + $0x674] sm:$0xf0]  ;;  %v5664_v2 = vor.u32 %v6346_v13, %v5663_v12  ;;  %v5615_v52 = vld [vmem:[#allocation2 + $0x928] sm:$0xf]  ;;  %v6288_v33 = vld [vmem:[#allocation2 + $0x7cc] sm:$0xf] }
 0x2a5   :  { %3899 = vmatpush.bf16.msra.mxu1 %v5596_v29  ;;  %v7087_v59 = vpop.f32.mrf.mxu1  ;;  %v5519_v29 = vld [vmem:[#allocation2 + $0x868] sm:$0xf]  ;;  %v6266_v13 = vld [vmem:[#allocation2 + $0x714] sm:$0xf0] }
 0x2a6   :  { %3912 = vmatpush.bf16.msra.mxu2 %v5724_v50  ;;  %v6310_v50 = vld [vmem:[#allocation2 + $0x874] sm:$0xf0] }
 0x2a7   :  { %3925 = vmatpush.bf16.msra.mxu3 %v5852_v51  ;;  %3887 = vmatmul.bf16.vlgmr.msra.gmra.mxu0 %v7049_v28  ;;  %v5264_v51 = vor.u32 %v6246_v1, %v5263_v7  ;;  %v5599_v7 = vld [vmem:[#allocation2 + $0x908] sm:$0xf]  ;;  %v6330_v1 = vld [vmem:[#allocation2 + $0x914] sm:$0xf0] }
 0x2a8   :  { %3931 = vmatpush.bf16.msrb.mxu0 %v5328_v11  ;;  %3900 = vmatmul.bf16.vlgmr.msra.gmra.mxu1 %v7053_v47  ;;  %v5392_v11 = vor.u32 %v6278_v17, %v5391_v15  ;;  %v5839_v15 = vld [vmem:[#allocation2 + $0xae8] sm:$0xf]  ;;  %v6390_v17 = vld [vmem:[#allocation2 + $0xaf4] sm:$0xf0] }
 0x2a9   :  { %3944 = vmatpush.bf16.msrb.mxu1 %v5456_v53  ;;  %3913 = vmatmul.bf16.vlgmr.msra.gmra.mxu2 %v7065_v23  ;;  %v5520_v53 = vor.u32 %v6310_v50, %v5519_v29  ;;  %v5967_v29 = vld [vmem:[#allocation2 + $0xbe8] sm:$0xf]  ;;  %v1494_v50 = vperm.slane %v7037_v20, 6 }
 0x2aa   :  { %3957 = vmatpush.bf16.msrb.mxu2 %v5584_v16  ;;  %3926 = vmatmul.bf16.vlgmr.msra.gmra.mxu3 %v7067_v25  ;;  %v5247_v16 = vld [vmem:[#allocation2 + $0x648] sm:$0xf] }
 0x2ab   :  { %3970 = vmatpush.bf16.msrb.mxu3 %v5712_v48  ;;  %v6274_v48 = vld [vmem:[#allocation2 + $0x754] sm:$0xf0]  ;;  %v5248_v26 = vor.u32 %v6242_v35, %v5247_v16  ;;  %v5344_v16 = vor.u32 %v6266_v13, %v5343_v63  ;;  %v5297_v63 = vld [vmem:[#allocation2 + $0x6b8] sm:$0xf0] }
 0x2ac   :  { %3932 = vmatpush.bf16.msrb.mxu0 %v5312_v61  ;;  %v7089_v8 = vpop.f32.mrf.mxu2  ;;  %v6338_v61 = vld [vmem:[#allocation2 + $0x954] sm:$0xf0]  ;;  %v5376_v39 = vor.u32 %v6274_v48, %v5375_v10  ;;  %v6292_v10 = vld [vmem:[#allocation2 + $0x7ec] sm:$0xf] }
 0x2ad   :  { %3945 = vmatpush.bf16.msrb.mxu1 %v5440_v22  ;;  %v7092_v22 = vpop.f32.mrf.mxu3  ;;  %v2721_v27 = vpop.f32.mrf.mxu1  ;;  %v5632_v36 = vor.u32 %v6338_v61, %v5631_v21  ;;  %v1510_v61 = vperm.slane %v1494_v50, 0 }
 0x2ae   :  { %3958 = vmatpush.bf16.msrb.mxu2 %v5568_v24  ;;  %v2708_v24 = vpop.f32.mrf.mxu0 }
 0x2af   :  { %3971 = vmatpush.bf16.msrb.mxu3 %v5696_v30  ;;  %v5504_v30 = vor.u32 %v6306_v55, %v5503_v14  ;;  %v5600_v14 = vor.u32 %v6330_v1, %v5599_v7  ;;  %v5840_v55 = vor.u32 %v6390_v17, %v5839_v15  ;;  %v6386_v24 = vld [vmem:[#allocation2 + $0xad4] sm:$0xf0]  ;;  %v2733_v37 = vadd.f32 %v7089_v8, %v1510_v61  ;;  %v5919_v7 = vld [vmem:[#allocation2 + $0xb88] sm:$0xf]  ;;  %v6248_v15 = vld [vmem:[#allocation2 + $0x68c] sm:$0xf] }
 0x2b0   :  { %3933 = vmatpush.bf16.msrb.mxu0 %v5296_v40  ;;  %v5487_v40 = vld [vmem:[#allocation2 + $0x828] sm:$0xf] }
 0x2b1   :  { %3946 = vmatpush.bf16.msrb.mxu1 %v5424_v41  ;;  %v6302_v41 = vld [vmem:[#allocation2 + $0x834] sm:$0xf0]  ;;  %v2746_v13 = vadd.f32 %v7092_v22, %v2733_v37  ;;  %v5377_v37 = vld [vmem:[#allocation2 + $0x758] sm:$0xf0] }
 0x2b2   :  { %3959 = vmatpush.bf16.msrb.mxu2 %v5552_v44  ;;  %v1509_v44 = vperm.slane %v1493_v19, 0  ;;  %v5488_v12 = vor.u32 %v6302_v41, %v5487_v40  ;;  %v5823_v19 = vld [vmem:[#allocation2 + $0xac8] sm:$0xf] }
 0x2b3   :  { %3972 = vmatpush.bf16.msrb.mxu3 %v5680_v49  ;;  %v5215_v49 = vld [vmem:[#allocation2 + $0x608] sm:$0xf] }
 0x2b4   :  { %3934 = vmatpush.bf16.msrb.mxu0 %v5280_v45  ;;  %v5471_v45 = vld [vmem:[#allocation2 + $0x808] sm:$0xf]  ;;  %v5216_v9 = vor.u32 %v6234_v62, %v5215_v49  ;;  %v2655_v48 = vadd.f32 %v7073_v4, %v1509_v44  ;;  %v6414_v49 = vld [vmem:[#allocation2 + $0xbb4] sm:$0xf0]  ;;  %v6252_v62 = vld [vmem:[#allocation2 + $0x6ac] sm:$0xf] }
 0x2b5   :  { %3947 = vmatpush.bf16.msrb.mxu1 %v5408_v54  ;;  %v6298_v54 = vld [vmem:[#allocation2 + $0x814] sm:$0xf0]  ;;  %v2747_v3 = vpop.f32.mrf.mxu3  ;;  %v5807_v44 = vld [vmem:[#allocation2 + $0xaa8] sm:$0xf] }
 0x2b6   :  { %3960 = vmatpush.bf16.msrb.mxu2 %v5536_v6  ;;  %v5616_v6 = vor.u32 %v6334_v60, %v5615_v52  ;;  %v5472_v35 = vor.u32 %v6298_v54, %v5471_v45  ;;  %v2668_v4 = vadd.f32 %v7075_v46, %v2655_v48  ;;  %v6382_v52 = vld [vmem:[#allocation2 + $0xab4] sm:$0xf0]  ;;  %v5935_v60 = vld [vmem:[#allocation2 + $0xba8] sm:$0xf]  ;;  %v6284_v46 = vld [vmem:[#allocation2 + $0x7ac] sm:$0xf]  ;;  %v5300_v54 = vor.u32 %v6252_v62, %v5297_v63 }
 0x2b7   :  { %3973 = vmatpush.bf16.msrb.mxu3 %v5664_v2  ;;  %v2734_v2 = vpop.f32.mrf.mxu2  ;;  %v5936_v45 = vor.u32 %v6414_v49, %v5935_v60  ;;  %v6366_v60 = vld [vmem:[#allocation2 + $0xa34] sm:$0xf0]  ;;  %v5871_v63 = vld [vmem:[#allocation2 + $0xb28] sm:$0xf] }
 0x2b8   :  { %3935 = vmatpush.bf16.msrb.mxu0 %v5264_v51  ;;  %v6422_v51 = vld [vmem:[#allocation2 + $0xbf4] sm:$0xf0]  ;;  %v2681_v8 = vadd.f32 %v7077_v18, %v2668_v4  ;;  %v6280_v2 = vld [vmem:[#allocation2 + $0x78c] sm:$0xf]  ;;  %v5409_v18 = vld [vmem:[#allocation2 + $0x798] sm:$0xf0] }
 0x2b9   :  { %3948 = vmatpush.bf16.msrb.mxu1 %v5392_v11  ;;  %v6260_v11 = vld [vmem:[#allocation2 + $0x6ec] sm:$0xf]  ;;  %v5968_v21 = vor.u32 %v6422_v51, %v5967_v29  ;;  %v5775_v51 = vld [vmem:[#allocation2 + $0xa68] sm:$0xf]  ;;  %v5249_v4 = vld [vmem:[#allocation2 + $0x658] sm:$0xf0] }
 0x2ba   :  { %3961 = vmatpush.bf16.msrb.mxu2 %v5520_v53  ;;  %v5329_v53 = vld [vmem:[#allocation2 + $0x6f8] sm:$0xf0]  ;;  %v2694_v17 = vadd.f32 %v7079_v56, %v2681_v8 }
 0x2bb   :  { %3974 = vmatpush.bf16.msrb.mxu3 %v5648_v5  ;;  %v5457_v5 = vld [vmem:[#allocation2 + $0x7f8] sm:$0xf0]  ;;  %v5332_v20 = vor.u32 %v6260_v11, %v5329_v53  ;;  %v6374_v11 = vld [vmem:[#allocation2 + $0xa74] sm:$0xf0]  ;;  %v5903_v53 = vld [vmem:[#allocation2 + $0xb68] sm:$0xf] }
 0x2bc   :  { %3936 = vmatpush.bf16.msrb.mxu0 %v5248_v26  ;;  %v5951_v26 = vld [vmem:[#allocation2 + $0xbc8] sm:$0xf]  ;;  %v5460_v27 = vor.u32 %v6292_v10, %v5457_v5  ;;  %v6244_v10 = vld [vmem:[#allocation2 + $0x66c] sm:$0xf]  ;;  %v5265_v5 = vld [vmem:[#allocation2 + $0x678] sm:$0xf0] }
 0x2bd   :  { %3949 = vmatpush.bf16.msrb.mxu1 %v5376_v39  ;;  %v6418_v39 = vld [vmem:[#allocation2 + $0xbd4] sm:$0xf0]  ;;  %v5393_v56 = vld [vmem:[#allocation2 + $0x778] sm:$0xf0] }
 0x2be   :  { %3962 = vmatpush.bf16.msrb.mxu2 %v5504_v30  ;;  %v6256_v30 = vld [vmem:[#allocation2 + $0x6cc] sm:$0xf]  ;;  %v5952_v40 = vor.u32 %v6418_v39, %v5951_v26  ;;  %v6370_v26 = vld [vmem:[#allocation2 + $0xa54] sm:$0xf0] }
 0x2bf   :  { %3975 = vmatpush.bf16.msrb.mxu3 %v5632_v36  ;;  %v5824_v36 = vor.u32 %v6386_v24, %v5823_v19  ;;  %v5316_v41 = vor.u32 %v6256_v30, %v5313_v31  ;;  %v5776_v19 = vor.u32 %v6374_v11, %v5775_v51  ;;  %v5759_v24 = vld [vmem:[#allocation2 + $0xa48] sm:$0xf]  ;;  %v6324_v51 = vld [vmem:[#allocation2 + $0x8ec] sm:$0xf] }
 0x2c0   :  { %3937 = vmatpush.bf16.msrb.mxu0 %v5232_v43  ;;  %v5444_v43 = vor.u32 %v6288_v33, %v5441_v34  ;;  %v6402_v33 = vld [vmem:[#allocation2 + $0xb54] sm:$0xf0]  ;;  %v6240_v34 = vld [vmem:[#allocation2 + $0x64c] sm:$0xf] }
 0x2c1   :  { %3950 = vmatpush.bf16.msrb.mxu1 %v5360_v57  ;;  %v5425_v57 = vld [vmem:[#allocation2 + $0x7b8] sm:$0xf0]  ;;  %v5252_v62 = vor.u32 %v6240_v34, %v5249_v4  ;;  %v6384_v34 = vld [vmem:[#allocation2 + $0xacc] sm:$0xf] }
 0x2c2   :  { %3963 = vmatpush.bf16.msrb.mxu2 %v5488_v12  ;;  %v5808_v12 = vor.u32 %v6382_v52, %v5807_v44  ;;  %v5428_v1 = vor.u32 %v6284_v46, %v5425_v57  ;;  %v5760_v44 = vor.u32 %v6370_v26, %v5759_v24  ;;  %v5743_v52 = vld [vmem:[#allocation2 + $0xa28] sm:$0xf]  ;;  %v6398_v46 = vld [vmem:[#allocation2 + $0xb34] sm:$0xf0]  ;;  %v6236_v57 = vld [vmem:[#allocation2 + $0x62c] sm:$0xf] }
 0x2c3   :  { %3976 = vmatpush.bf16.msrb.mxu3 %v5616_v6  ;;  %v5791_v6 = vld [vmem:[#allocation2 + $0xa88] sm:$0xf]  ;;  %v5825_v4 = vld [vmem:[#allocation2 + $0xad8] sm:$0xf0] }
 0x2c4   :  { %3938 = vmatpush.bf16.msrb.mxu0 %v5216_v9  ;;  %v2758_v29 = vpop.f32.mrf.mxu0 }
 0x2c5   :  { %3951 = vmatpush.bf16.msrb.mxu1 %v5344_v16  ;;  %v2759_v3 = vadd.f32 %v2758_v29, %v2746_v13  ;;  %v2771_v9 = vpop.f32.mrf.mxu1  ;;  %v5412_v16 = vor.u32 %v6280_v2, %v5409_v18  ;;  %v6394_v18 = vld [vmem:[#allocation2 + $0xb14] sm:$0xf0] }
 0x2c6   :  { %3964 = vmatpush.bf16.msrb.mxu2 %v5472_v35  ;;  %v6406_v35 = vld [vmem:[#allocation2 + $0xb74] sm:$0xf0] }
 0x2c7   :  { %3977 = vmatpush.bf16.msrb.mxu3 %v5600_v14  ;;  %3939 = vmatmul.bf16.vlgmr.msrb.gmra.mxu0 %v7051_v32  ;;  %v6410_v32 = vld [vmem:[#allocation2 + $0xb94] sm:$0xf0]  ;;  %v2772_v48 = vadd.f32 %v2771_v9, %v2759_v3  ;;  %v6276_v14 = vld [vmem:[#allocation2 + $0x76c] sm:$0xf]  ;;  %v5345_v9 = vld [vmem:[#allocation2 + $0x718] sm:$0xf0] }
 0x2c8   :  { %3983 = vmatpush.bf16.msra.mxu0 %v5840_v55  ;;  %3952 = vmatmul.bf16.vlgmr.msrb.gmra.mxu1 %v7055_v38  ;;  %v5920_v22 = vor.u32 %v6410_v32, %v5919_v7  ;;  %v2707_v55 = vadd.f32 %v7085_v58, %v2694_v17  ;;  %v5396_v39 = vor.u32 %v6276_v14, %v5393_v56  ;;  %v4095_v58 = vrot.slane %v7063_v42, 3  ;;  %v6232_v17 = vld [vmem:[#allocation2 + $0x60c] sm:$0xf]  ;;  %v5841_v56 = vld [vmem:[#allocation2 + $0xaf8] sm:$0xf0] }
 0x2c9   :  { %3996 = vmatpush.bf16.msra.mxu1 %v5968_v21  ;;  %3965 = vmatmul.bf16.vlgmr.msrb.gmra.mxu2 %v7049_v28  ;;  %v6378_v28 = vld [vmem:[#allocation2 + $0xa94] sm:$0xf0]  ;;  %v5904_v21 = vor.u32 %v6406_v35, %v5903_v53  ;;  %v5744_v32 = vor.u32 %v6366_v60, %v5743_v52  ;;  %v6264_v3 = vld [vmem:[#allocation2 + $0x70c] sm:$0xf]  ;;  %v5553_v52 = vld [vmem:[#allocation2 + $0x8b8] sm:$0xf0] }
 0x2ca   :  { %4009 = vmatpush.bf16.msra.mxu2 %v5332_v20  ;;  %3978 = vmatmul.bf16.vlgmr.msrb.gmra.mxu3 %v7053_v47  ;;  %v5281_v47 = vld [vmem:[#allocation2 + $0x698] sm:$0xf0]  ;;  %v5792_v38 = vor.u32 %v6378_v28, %v5791_v6  ;;  %v5268_v20 = vor.u32 %v6244_v10, %v5265_v5  ;;  %v5727_v6 = vld [vmem:[#allocation2 + $0xa08] sm:$0xf]  ;;  %v6362_v28 = vld [vmem:[#allocation2 + $0xa14] sm:$0xf0] }
 0x2cb   :  { %4022 = vmatpush.bf16.msra.mxu3 %v5460_v27  ;;  %v5284_v50 = vor.u32 %v6248_v15, %v5281_v47  ;;  %v5887_v27 = vld [vmem:[#allocation2 + $0xb48] sm:$0xf]  ;;  %v5872_v47 = vor.u32 %v6398_v46, %v5871_v63  ;;  %v6356_v35 = vld [vmem:[#allocation2 + $0x9ec] sm:$0xf]  ;;  %v5713_v10 = vld [vmem:[#allocation2 + $0x9f8] sm:$0xf0] }
 0x2cc   :  { %3984 = vmatpush.bf16.msra.mxu0 %v5824_v36  ;;  %v2784_v61 = vpop.f32.mrf.mxu2  ;;  %v6272_v36 = vld [vmem:[#allocation2 + $0x74c] sm:$0xf]  ;;  %v5888_v49 = vor.u32 %v6402_v33, %v5887_v27  ;;  %v5855_v15 = vld [vmem:[#allocation2 + $0xb08] sm:$0xf]  ;;  %v5716_v24 = vor.u32 %v6356_v35, %v5713_v10  ;;  %v5697_v33 = vld [vmem:[#allocation2 + $0x9d8] sm:$0xf0] }
 0x2cd   :  { %3997 = vmatpush.bf16.msra.mxu1 %v5952_v40  ;;  %v2785_v30 = vadd.f32 %v2784_v61, %v2772_v48  ;;  %v2797_v31 = vpop.f32.mrf.mxu3  ;;  %v2720_v40 = vadd.f32 %v7087_v59, %v2707_v55  ;;  %v2773_v8 = vpop.f32.mrf.mxu1  ;;  %v5380_v13 = vor.u32 %v6272_v36, %v5377_v37  ;;  %v5361_v59 = vld [vmem:[#allocation2 + $0x738] sm:$0xf0]  ;;  %v5728_v48 = vor.u32 %v6362_v28, %v5727_v6  ;;  %v6388_v14 = vld [vmem:[#allocation2 + $0xaec] sm:$0xf] }
 0x2ce   :  { %4010 = vmatpush.bf16.msra.mxu2 %v5316_v41  ;;  %v5844_v26 = vor.u32 %v6388_v14, %v5841_v56  ;;  %v6320_v27 = vld [vmem:[#allocation2 + $0x8cc] sm:$0xf]  ;;  %v5953_v37 = vld [vmem:[#allocation2 + $0xbd8] sm:$0xf0] }
 0x2cf   :  { %4023 = vmatpush.bf16.msra.mxu3 %v5444_v43  ;;  %v2798_v41 = vadd.f32 %v2797_v31, %v2785_v30  ;;  %v2760_v43 = vpop.f32.mrf.mxu0  ;;  %v6352_v30 = vld [vmem:[#allocation2 + $0x9cc] sm:$0xf]  ;;  %v5681_v63 = vld [vmem:[#allocation2 + $0x9b8] sm:$0xf0] }
 0x2d0   :  { %3985 = vmatpush.bf16.msra.mxu0 %v5808_v12  ;;  %v6416_v36 = vld [vmem:[#allocation2 + $0xbcc] sm:$0xf]  ;;  %v7113_v43 = vunpack.c.h.bf16 %v6850_v0  ;;  %v5537_v28 = vld [vmem:[#allocation2 + $0x898] sm:$0xf0] }
 0x2d1   :  { %3998 = vmatpush.bf16.msra.mxu1 %v5936_v45  ;;  %v4088_v12 = vpack.c.bf16 %v2798_v41, %v2720_v40  ;;  %v5233_v45 = vld [vmem:[#allocation2 + $0x638] sm:$0xf0]  ;;  %v5700_v40 = vor.u32 %v6352_v30, %v5697_v33  ;;  %v5828_v41 = vor.u32 %v6384_v34, %v5825_v4  ;;  %v6348_v60 = vld [vmem:[#allocation2 + $0x9ac] sm:$0xf] }
 0x2d2   :  { %4011 = vmatpush.bf16.msra.mxu2 %v5300_v54  ;;  %v6268_v54 = vld [vmem:[#allocation2 + $0x72c] sm:$0xf]  ;;  %v5236_v2 = vor.u32 %v6236_v57, %v5233_v45  ;;  %v5809_v57 = vld [vmem:[#allocation2 + $0xab8] sm:$0xf0]  ;;  %v1495_v45 = vperm.slane %v7113_v43, 0 }
 0x2d3   :  { %4024 = vmatpush.bf16.msra.mxu3 %v5428_v1  ;;  %v4096_v7 = vrot.slane %v4088_v12, 6  ;;  %v4097_v1 = vrot.slane %v4088_v12, 1  ;;  %v6380_v46 = vld [vmem:[#allocation2 + $0xaac] sm:$0xf]  ;;  %v5937_v12 = vld [vmem:[#allocation2 + $0xbb8] sm:$0xf0] }
 0x2d4   :  { %3986 = vmatpush.bf16.msra.mxu0 %v5792_v38  ;;  %v5217_v38 = vld [vmem:[#allocation2 + $0x618] sm:$0xf0]  ;;  %v2786_v29 = vpop.f32.mrf.mxu2  ;;  %v6412_v8 = vld [vmem:[#allocation2 + $0xbac] sm:$0xf]  ;;  %v5812_v6 = vor.u32 %v6380_v46, %v5809_v57 }
 0x2d5   :  { %3999 = vmatpush.bf16.msra.mxu1 %v5920_v22  ;;  %v4104_v22 = vsel %vm4101_vm5, %v7063_v42, %v4095_v58  ;;  %v2799_v11 = vpop.f32.mrf.mxu3  ;;  %v4108_v53 = vsel %vm4105_vm6, %v4096_v7, %v4097_v1  ;;  %v5856_v42 = vor.u32 %v6394_v18, %v5855_v15  ;;  %v5220_v55 = vor.u32 %v6232_v17, %v5217_v38  ;;  %v6312_v0 = vld [vmem:[#allocation2 + $0x88c] sm:$0xf]  ;;  %v5665_v15 = vld [vmem:[#allocation2 + $0x998] sm:$0xf0] }
 0x2d6   :  { %4012 = vmatpush.bf16.msra.mxu2 %v5284_v50  ;;  %v5364_v50 = vor.u32 %v6268_v54, %v5361_v59  ;;  %v4110_v5 = vsel %vm4109_vm7, %v4104_v22, %v4108_v53  ;;  %v5684_v59 = vor.u32 %v6348_v60, %v5681_v63  ;;  %v6344_v7 = vld [vmem:[#allocation2 + $0x98c] sm:$0xf]  ;;  %v1511_v1 = vperm.slane %v1495_v45, 0  ;;  %v5921_v18 = vld [vmem:[#allocation2 + $0xb98] sm:$0xf0] }
 0x2d7   :  { %4025 = vmatpush.bf16.msra.mxu3 %v5412_v16  ;;  %v5585_v16 = vld [vmem:[#allocation2 + $0x8f8] sm:$0xf0]  ;;  %4120 = vst [vmem:[#allocation20] sm:$0xf] %v4110_v5  ;;  %v5540_v17 = vor.u32 %v6312_v0, %v5537_v28  ;;  %v6308_v22 = vld [vmem:[#allocation2 + $0x86c] sm:$0xf] }
 0x2d8   :  { %3987 = vmatpush.bf16.msra.mxu0 %v5776_v19  ;;  %v6420_v19 = vld [vmem:[#allocation2 + $0xbec] sm:$0xf]  ;;  %v5588_v61 = vor.u32 %v6324_v51, %v5585_v16  ;;  %v5649_v53 = vld [vmem:[#allocation2 + $0x978] sm:$0xf0] }
 0x2d9   :  { %4000 = vmatpush.bf16.msra.mxu1 %v5904_v21  ;;  %v5969_v21 = vld [vmem:[#allocation2 + $0xbf8] sm:$0xf0]  ;;  %v6372_v16 = vld [vmem:[#allocation2 + $0xa6c] sm:$0xf] }
 0x2da   :  { %4013 = vmatpush.bf16.msra.mxu2 %v5268_v20  ;;  %v5348_v20 = vor.u32 %v6264_v3, %v5345_v9  ;;  %v5972_v31 = vor.u32 %v6420_v19, %v5969_v21  ;;  %v6340_v3 = vld [vmem:[#allocation2 + $0x96c] sm:$0xf]  ;;  %v5777_v35 = vld [vmem:[#allocation2 + $0xa78] sm:$0xf0] }
 0x2db   :  { %4026 = vmatpush.bf16.msra.mxu3 %v5396_v39  ;;  %v5569_v39 = vld [vmem:[#allocation2 + $0x8d8] sm:$0xf0]  ;;  %v6404_v10 = vld [vmem:[#allocation2 + $0xb6c] sm:$0xf]  ;;  %v5652_v56 = vor.u32 %v6340_v3, %v5649_v53  ;;  %v1496_v3 = vperm.slane %v7113_v43, 2 }
 0x2dc   :  { %3988 = vmatpush.bf16.msra.mxu0 %v5760_v44  ;;  %v5572_v58 = vor.u32 %v6320_v27, %v5569_v39  ;;  %v6316_v44 = vld [vmem:[#allocation2 + $0x8ac] sm:$0xf]  ;;  %v5905_v5 = vld [vmem:[#allocation2 + $0xb78] sm:$0xf0] }
 0x2dd   :  { %4001 = vmatpush.bf16.msra.mxu1 %v5888_v49  ;;  %v5956_v49 = vor.u32 %v6416_v36, %v5953_v37  ;;  %v5556_v54 = vor.u32 %v6316_v44, %v5553_v52  ;;  %v5505_v19 = vld [vmem:[#allocation2 + $0x858] sm:$0xf0]  ;;  %v6336_v21 = vld [vmem:[#allocation2 + $0x94c] sm:$0xf]  ;;  %v1512_v53 = vperm.slane %v1496_v3, 0 }
 0x2de   :  { %4014 = vmatpush.bf16.msra.mxu2 %v5252_v62  ;;  %v6445_v62 = vld [vmem:[#allocation1] sm:$0xff]  ;;  %v6332_v44 = vld [vmem:[#allocation2 + $0x92c] sm:$0xf] }
 0x2df   :  { %4027 = vmatpush.bf16.msra.mxu3 %v5380_v13  ;;  %v6446_v13 = vld [vmem:[#allocation1 + $0x9] sm:$0xff]  ;;  %v5761_v27 = vld [vmem:[#allocation2 + $0xa58] sm:$0xf0]  ;;  %v6396_v46 = vld [vmem:[#allocation2 + $0xb2c] sm:$0xf] }
 0x2e0   :  { %3989 = vmatpush.bf16.msra.mxu0 %v5744_v32  ;;  %v5940_v32 = vor.u32 %v6412_v8, %v5937_v12  ;;  %v5889_v33 = vld [vmem:[#allocation2 + $0xb58] sm:$0xf0]  ;;  %v6296_v45 = vld [vmem:[#allocation2 + $0x80c] sm:$0xf] }
 0x2e1   :  { %4002 = vmatpush.bf16.msra.mxu1 %v5872_v47  ;;  %v5793_v47 = vld [vmem:[#allocation2 + $0xa98] sm:$0xf0]  ;;  %v6328_v0 = vld [vmem:[#allocation2 + $0x90c] sm:$0xf] }
 0x2e2   :  { %4015 = vmatpush.bf16.msra.mxu2 %v5236_v2  ;;  %v6408_v2 = vld [vmem:[#allocation2 + $0xb8c] sm:$0xf]  ;;  %v5745_v63 = vld [vmem:[#allocation2 + $0xa38] sm:$0xf0] }
 0x2e3   :  { %4028 = vmatpush.bf16.msra.mxu3 %v5364_v50  ;;  %v5521_v50 = vld [vmem:[#allocation2 + $0x878] sm:$0xf0]  ;;  %v5924_v11 = vor.u32 %v6408_v2, %v5921_v18 }
 0x2e4   :  { %3990 = vmatpush.bf16.msra.mxu0 %v5728_v48  ;;  %v3784_v38 = vpop.f32.mrf.mxu0  ;;  %v5524_v14 = vor.u32 %v6308_v22, %v5521_v50  ;;  %v5873_v57 = vld [vmem:[#allocation2 + $0xb38] sm:$0xf0]  ;;  %v6450_v22 = vld [vmem:[#allocation1 + $0x2d] sm:$0xff] }
 0x2e5   :  { %4003 = vmatpush.bf16.msra.mxu1 %v5856_v42  ;;  %v3785_v9 = vadd.f32 %v3784_v38, %v1511_v1  ;;  %v3797_v51 = vpop.f32.mrf.mxu1  ;;  %v5780_v42 = vor.u32 %v6372_v16, %v5777_v35  ;;  %v5601_v28 = vld [vmem:[#allocation2 + $0x918] sm:$0xf0]  ;;  %v6447_v38 = vld [vmem:[#allocation1 + $0x12] sm:$0xff] }
 0x2e6   :  { %4016 = vmatpush.bf16.msra.mxu2 %v5220_v55  ;;  %v6304_v55 = vld [vmem:[#allocation2 + $0x84c] sm:$0xf]  ;;  %v5729_v1 = vld [vmem:[#allocation2 + $0xa18] sm:$0xf0]  ;;  %v5604_v2 = vor.u32 %v6328_v0, %v5601_v28 }
 0x2e7   :  { %4029 = vmatpush.bf16.msra.mxu3 %v5348_v20  ;;  %3991 = vmatmul.bf16.vlgmr.msra.gmra.mxu0 %v7065_v23  ;;  %v6376_v23 = vld [vmem:[#allocation2 + $0xa8c] sm:$0xf]  ;;  %v3798_v48 = vadd.f32 %v3797_v51, %v3785_v9  ;;  %v5508_v34 = vor.u32 %v6304_v55, %v5505_v19 }
 0x2e8   :  { %4035 = vmatpush.bf16.msrb.mxu0 %v5588_v61  ;;  %4004 = vmatmul.bf16.vlgmr.msra.gmra.mxu1 %v7067_v25  ;;  %v5668_v25 = vor.u32 %v6344_v7, %v5665_v15  ;;  %v5796_v29 = vor.u32 %v6376_v23, %v5793_v47  ;;  %v5908_v61 = vor.u32 %v6404_v10, %v5905_v5  ;;  %v6360_v7 = vld [vmem:[#allocation2 + $0xa0c] sm:$0xf]  ;;  %v5857_v23 = vld [vmem:[#allocation2 + $0xb18] sm:$0xf0] }
 0x2e9   :  { %4048 = vmatpush.bf16.msrb.mxu1 %v5716_v24  ;;  %4017 = vmatmul.bf16.vlgmr.msra.gmra.mxu2 %v6445_v62  ;;  %v5633_v24 = vld [vmem:[#allocation2 + $0x958] sm:$0xf0]  ;;  %v6364_v62 = vld [vmem:[#allocation2 + $0xa2c] sm:$0xf]  ;;  %v5732_v18 = vor.u32 %v6360_v7, %v5729_v1 }
 0x2ea   :  { %4061 = vmatpush.bf16.msrb.mxu2 %v5844_v26  ;;  %4030 = vmatmul.bf16.vlgmr.msra.gmra.mxu3 %v6446_v13  ;;  %v6368_v26 = vld [vmem:[#allocation2 + $0xa4c] sm:$0xf]  ;;  %v5636_v37 = vor.u32 %v6336_v21, %v5633_v24  ;;  %v5748_v13 = vor.u32 %v6364_v62, %v5745_v63 }
 0x2eb   :  { %4074 = vmatpush.bf16.msrb.mxu3 %v5972_v31  ;;  %v6400_v31 = vld [vmem:[#allocation2 + $0xb4c] sm:$0xf] }
 0x2ec   :  { %4036 = vmatpush.bf16.msrb.mxu0 %v5572_v58  ;;  %v3810_v20 = vpop.f32.mrf.mxu2  ;;  %v3786_v36 = vpop.f32.mrf.mxu0  ;;  %v5764_v58 = vor.u32 %v6368_v26, %v5761_v27  ;;  %v5892_v60 = vor.u32 %v6400_v31, %v5889_v33  ;;  %v6392_v15 = vld [vmem:[#allocation2 + $0xb0c] sm:$0xf] }
 0x2ed   :  { %4049 = vmatpush.bf16.msrb.mxu1 %v5700_v40  ;;  %v3811_v39 = vadd.f32 %v3810_v20, %v3798_v48  ;;  %v3823_v30 = vpop.f32.mrf.mxu3  ;;  %v6300_v40 = vld [vmem:[#allocation2 + $0x82c] sm:$0xf]  ;;  %v3799_v52 = vpop.f32.mrf.mxu1 }
 0x2ee   :  { %4062 = vmatpush.bf16.msrb.mxu2 %v5828_v41  ;;  %v5489_v41 = vld [vmem:[#allocation2 + $0x838] sm:$0xf0] }
 0x2ef   :  { %4075 = vmatpush.bf16.msrb.mxu3 %v5956_v49  ;;  %v3824_v4 = vadd.f32 %v3823_v30, %v3811_v39  ;;  %v5617_v49 = vld [vmem:[#allocation2 + $0x938] sm:$0xf0]  ;;  %v5492_v8 = vor.u32 %v6300_v40, %v5489_v41 }
 0x2f0   :  { %4037 = vmatpush.bf16.msrb.mxu0 %v5556_v54  ;;  %v5620_v12 = vor.u32 %v6332_v44, %v5617_v49  ;;  %v5473_v54 = vld [vmem:[#allocation2 + $0x818] sm:$0xf0] }
 0x2f1   :  { %4050 = vmatpush.bf16.msrb.mxu1 %v5684_v59  ;;  %v5476_v47 = vor.u32 %v6296_v45, %v5473_v54  ;;  %v1498_v54 = vperm.slane %v7113_v43, 6 }
 0x2f2   :  { %4063 = vmatpush.bf16.msrb.mxu2 %v5812_v6  ;;  %v5876_v6 = vor.u32 %v6396_v46, %v5873_v57 }
 0x2f3   :  { %4076 = vmatpush.bf16.msrb.mxu3 %v5940_v32 }
 0x2f4   :  { %4038 = vmatpush.bf16.msrb.mxu0 %v5540_v17  ;;  %v3812_v59 = vpop.f32.mrf.mxu2  ;;  %v5860_v17 = vor.u32 %v6392_v15, %v5857_v23 }
 0x2f5   :  { %4051 = vmatpush.bf16.msrb.mxu1 %v5668_v25  ;;  %v3825_v32 = vpop.f32.mrf.mxu3  ;;  %v6448_v25 = vld [vmem:[#allocation1 + $0x1b] sm:$0xff]  ;;  %v1514_v59 = vperm.slane %v1498_v54, 0 }
 0x2f6   :  { %4064 = vmatpush.bf16.msrb.mxu2 %v5796_v29  ;;  %v6449_v29 = vld [vmem:[#allocation1 + $0x24] sm:$0xff] }
 0x2f7   :  { %4077 = vmatpush.bf16.msrb.mxu3 %v5924_v11 }
 0x2f8   :  { %4039 = vmatpush.bf16.msrb.mxu0 %v5524_v14 }
 0x2f9   :  { %4052 = vmatpush.bf16.msrb.mxu1 %v5652_v56 }
 0x2fa   :  { %4065 = vmatpush.bf16.msrb.mxu2 %v5780_v42 }
 0x2fb   :  { %4078 = vmatpush.bf16.msrb.mxu3 %v5908_v61 }
 0x2fc   :  { %4040 = vmatpush.bf16.msrb.mxu0 %v5508_v34 }
 0x2fd   :  { %4053 = vmatpush.bf16.msrb.mxu1 %v5636_v37 }
 0x2fe   :  { %4066 = vmatpush.bf16.msrb.mxu2 %v5764_v58 }
 0x2ff   :  { %4079 = vmatpush.bf16.msrb.mxu3 %v5892_v60 }
 0x300   :  { %4041 = vmatpush.bf16.msrb.mxu0 %v5492_v8  ;;  %v1497_v8 = vperm.slane %v7113_v43, 4 }
 0x301   :  { %4054 = vmatpush.bf16.msrb.mxu1 %v5620_v12 }
 0x302   :  { %4067 = vmatpush.bf16.msrb.mxu2 %v5748_v13  ;;  %v1513_v13 = vperm.slane %v1497_v8, 0 }
 0x303   :  { %4080 = vmatpush.bf16.msrb.mxu3 %v5876_v6 }
 0x304   :  { %4042 = vmatpush.bf16.msrb.mxu0 %v5476_v47  ;;  %v3836_v50 = vpop.f32.mrf.mxu0 }
 0x305   :  { %4055 = vmatpush.bf16.msrb.mxu1 %v5604_v2  ;;  %v3837_v9 = vadd.f32 %v3836_v50, %v3824_v4  ;;  %v3849_v51 = vpop.f32.mrf.mxu1 }
 0x306   :  { %4068 = vmatpush.bf16.msrb.mxu2 %v5732_v18 }
 0x307   :  { %4081 = vmatpush.bf16.msrb.mxu3 %v5860_v17  ;;  %4043 = vmatmul.bf16.vlgmr.msrb.gmra.mxu0 %v6447_v38  ;;  %v3850_v11 = vadd.f32 %v3849_v51, %v3837_v9 }
 0x308   :  { %4056 = vmatmul.bf16.vlgmr.msrb.gmra.mxu1 %v6448_v25 }
 0x309   :  { %4069 = vmatmul.bf16.vlgmr.msrb.gmra.mxu2 %v6449_v29 }
 0x30a   :  { %4082 = vmatmul.bf16.vlgmr.msrb.gmra.mxu3 %v6450_v22 }
 0x30c   :  { %v3862_v16 = vpop.f32.mrf.mxu2  ;;  %v3838_v5 = vpop.f32.mrf.mxu0 }
 0x30d   :  { %v3863_v35 = vadd.f32 %v3862_v16, %v1512_v53  ;;  %v3875_v10 = vpop.f32.mrf.mxu3  ;;  %v3851_v48 = vpop.f32.mrf.mxu1 }
 0x30f   :  { %v3876_v14 = vadd.f32 %v3875_v10, %v3863_v35 }
 0x314   :  { %v3864_v56 = vpop.f32.mrf.mxu2 }
 0x315   :  { %v3877_v42 = vpop.f32.mrf.mxu3 }
 0x324   :  { %v3888_v55 = vpop.f32.mrf.mxu0 }
 0x325   :  { %v3889_v19 = vadd.f32 %v3888_v55, %v3876_v14  ;;  %v3901_v21 = vpop.f32.mrf.mxu1 }
 0x327   :  { %v3902_v20 = vadd.f32 %v3901_v21, %v3889_v19 }
 0x32c   :  { %v3914_v61 = vpop.f32.mrf.mxu2  ;;  %v3890_v39 = vpop.f32.mrf.mxu0 }
 0x32d   :  { %v3915_v24 = vadd.f32 %v3914_v61, %v3902_v20  ;;  %v3927_v26 = vpop.f32.mrf.mxu3  ;;  %v3903_v30 = vpop.f32.mrf.mxu1 }
 0x32f   :  { %v3928_v27 = vadd.f32 %v3927_v26, %v3915_v24 }
 0x331   :  { %v4089_v31 = vpack.c.bf16 %v3928_v27, %v3850_v11 }
 0x333   :  { %v4098_v43 = vrot.slane %v4089_v31, 3 }
 0x334   :  { %v3916_v33 = vpop.f32.mrf.mxu2 }
 0x335   :  { %v3929_v34 = vpop.f32.mrf.mxu3  ;;  %v4113_v16 = vsel %vm4101_vm5, %v4089_v31, %v4098_v43 }
 0x344   :  { %v3940_v4 = vpop.f32.mrf.mxu0 }
 0x345   :  { %v3953_v36 = vpop.f32.mrf.mxu1  ;;  %v3941_v0 = vadd.f32 %v3940_v4, %v1513_v13 }
 0x347   :  { %v3954_v6 = vadd.f32 %v3953_v36, %v3941_v0 }
 0x34c   :  { %v3966_v37 = vpop.f32.mrf.mxu2  ;;  %v3942_v40 = vpop.f32.mrf.mxu0 }
 0x34d   :  { %v3979_v58 = vpop.f32.mrf.mxu3  ;;  %v3955_v41 = vpop.f32.mrf.mxu1  ;;  %v3967_v7 = vadd.f32 %v3966_v37, %v3954_v6 }
 0x34f   :  { %v3980_v23 = vadd.f32 %v3979_v58, %v3967_v7 }
 0x354   :  { %v3968_v44 = vpop.f32.mrf.mxu2 }
 0x355   :  { %v3981_v52 = vpop.f32.mrf.mxu3 }
 0x364   :  { %v3992_v60 = vpop.f32.mrf.mxu0 }
 0x365   :  { %v4005_v49 = vpop.f32.mrf.mxu1  ;;  %v3993_v2 = vadd.f32 %v3992_v60, %v3980_v23 }
 0x367   :  { %v4006_v50 = vadd.f32 %v4005_v49, %v3993_v2 }
 0x36c   :  { %v4018_v62 = vpop.f32.mrf.mxu2  ;;  %v3994_v46 = vpop.f32.mrf.mxu0 }
 0x36d   :  { %v4031_v63 = vpop.f32.mrf.mxu3  ;;  %v4007_v57 = vpop.f32.mrf.mxu1  ;;  %v4019_v28 = vadd.f32 %v4018_v62, %v1514_v59 }
 0x36f   :  { %v4032_v1 = vadd.f32 %v4031_v63, %v4019_v28 }
 0x374   :  { %v4020_v12 = vpop.f32.mrf.mxu2 }
 0x375   :  { %v4033_v45 = vpop.f32.mrf.mxu3 }
 0x384   :  { %v4044_v32 = vpop.f32.mrf.mxu0 }
 0x385   :  { %v4057_v15 = vpop.f32.mrf.mxu1  ;;  %v4045_v47 = vadd.f32 %v4044_v32, %v4032_v1 }
 0x387   :  { %v4058_v18 = vadd.f32 %v4057_v15, %v4045_v47 }
 0x38c   :  { %v4070_v17 = vpop.f32.mrf.mxu2  ;;  %v4046_v29 = vpop.f32.mrf.mxu0 }
 0x38d   :  { %v4071_v38 = vadd.f32 %v4070_v17, %v4058_v18  ;;  %v4083_v25 = vpop.f32.mrf.mxu3  ;;  %v4059_v22 = vpop.f32.mrf.mxu1 }
 0x38f   :  { %v4084_v3 = vadd.f32 %v4083_v25, %v4071_v38 }
 0x391   :  { %v4090_v9 = vpack.c.bf16 %v4084_v3, %v4006_v50 }
 0x393   :  { %v4099_v51 = vrot.slane %v4090_v9, 6  ;;  %v4100_v11 = vrot.slane %v4090_v9, 1 }
 0x394   :  { %v4072_v53 = vpop.f32.mrf.mxu2 }
 0x395   :  { %v4085_v35 = vpop.f32.mrf.mxu3  ;;  %v4116_v10 = vsel %vm4105_vm6, %v4099_v51, %v4100_v11 }
 0x396   :  { %v4117_v5 = vsel %vm4109_vm7, %v4113_v16, %v4116_v10 }
 0x397   :  { %4121 = vst [vmem:[#allocation20 + $0x4] sm:$0xf] %v4117_v5 }
 0x398   :  { %4147 = dma.vmem_to_hbm [thread:$0]  %s4140_s1, 128, %s4142_s12, [#allocation21], %s6734_s25, %s6734_s25, %s6735_s26  }
 0x399   :  { %6729 = dma.done.wait [#allocation7], 3072  }
 0x39a   :  { %6730 = vsyncadd [#allocation7], 4294964224 }
 0x39b   :  { %6731 = dma.done.wait [#allocation21], 128  }
 0x39c   :  { %6732 = vsyncadd [#allocation21], 4294967168 }
 0x39d   :  { %4156 = vsyncpa [#allocation6], 1 }
 0x39e   :  { %4157 = vsyncpa [#allocation9], 1 }
 0x39f   :  { %4158 = vsyncpa [#allocation12], 1 }
 0x3a0   :  { %4159 = vsyncpa [#allocation15], 1 }
 0x3a1   :  { %4160 = vsyncpa [#allocation18], 1 }
 0x3a2   :  { %4161 = vsyncpa [#allocation7], 1 }
 0x3a3   :  { %4162 = vsyncpa [#allocation21], 1 }
 0x3a4   :  { %4163 = vsyncmov [#allocation4] }
 0x3a7   :  { %s4164_s11 = vpop.sfrf %4163 }
 0x3a8   :  { %p5973_p0 = scmp.ne.s32.totalorder %s4164_s11, 0 }
 0x3aa   :  { %4168 = shalt.err (%p5973_p0)  }
 0x3ab   :  { %4170 = vsyncmov [#allocation4 + $0x1] }
 0x3ae   :  { %s4171_s3 = vpop.sfrf %4170 }
 0x3af   :  { %p5974_p1 = scmp.ne.s32.totalorder %s4171_s3, 0 }
 0x3b1   :  { %4175 = shalt.err (%p5974_p1)  }

</bundles_post_ra>
